<compile_context>
chip_gen: v7x
topology: tpu7x:2x2x1
jax: 0.10.0
libtpu: 0.0.40
codegen_flags: <defaults>
</compile_context>

<pallas_src>
import numpy as np
import jax
import jax.numpy as jnp
from jax.experimental import pallas as pl
from jax.experimental.pallas import tpu as pltpu


# ----------------------------------------------------------------------------
# Kernel: one row-tile of layer-1 pixels through all four ConvT+SiLU layers.
# ----------------------------------------------------------------------------
def _fused_decoder_kernel(x_ref, w1_ref, w2_ref, w3_ref, w4_ref,
                          b1_ref, b2_ref, b3_ref, b4_ref, o_ref):
    def ct_silu(h, w, b):
        # bf16 operands on the MXU, f32 accumulation / bias / activation.
        y = jnp.dot(h.astype(jnp.bfloat16), w,
                    preferred_element_type=jnp.float32) + b
        # SiLU with a single EUP op per element (tanh); mul/add are VALU.
        return y * (0.5 * jnp.tanh(0.5 * y) + 0.5)

    h1 = ct_silu(x_ref[...], w1_ref[...], b1_ref[...])    # (T, 256)  cols (k1, c1)
    h2 = ct_silu(h1, w2_ref[...], b2_ref[...])            # (T, 512)  cols (k1, k2, c2)

    w3 = w3_ref[...]
    b3 = b3_ref[...]
    w4 = w4_ref[...]
    b4 = b4_ref[...]
    # Layers 3/4 act independently on each k1 branch.  Each branch is a
    # 128-lane-aligned column block of h2 -> slicing is free (whole vregs),
    # and the small shared W3/W4 are reused for all 4 branches.
    for g in range(4):                                     # static unroll
        hg = h2[:, g * 128:(g + 1) * 128]                  # (T, 128) cols (k2, c2)
        h3 = ct_silu(hg, w3, b3)                           # (T, 256) cols (k2, k3, c3)
        h4 = ct_silu(h3, w4, b4)                           # (T, 192) cols (c, il, jl)
        o_ref[:, g * 192:(g + 1) * 192] = h4.astype(o_ref.dtype)


# ----------------------------------------------------------------------------
# Parameter construction / packing.
# ----------------------------------------------------------------------------
def init_decoder_params(key):
    """Deterministic synthetic params. ConvTranspose2d weight: (Cin, Cout, 2, 2)."""
    channels = [(256, 64), (64, 32), (32, 16), (16, 3)]
    params = []
    for li, (cin, cout) in enumerate(channels):
        kw, kb = jax.random.split(jax.random.fold_in(key, li))
        w = jax.random.normal(kw, (cin, cout, 2, 2), jnp.float32) * 0.05
        b = jax.random.normal(kb, (cout,), jnp.float32) * 0.05
        params.append((w, b))
    return params


def pack_decoder_params(params):
    """Pack ConvT(k=2,s=2) weights into the fused per-branch matmul form.

    Per layer:  w_mat[ci, (ki*2+kj)*Cout + co] = w[ci, co, ki, kj]
      W1 = w1_mat                    (256, 256)  cols (k1, c1)
      W2 = kron(I_4,  w2_mat)        (256, 512)  cols (k1, k2, c2)   k1 block-diag
      W3 = kron(I_4,  w3_mat)        (128, 256)  cols (k2, k3, c3)   applied per k1
      W4 = kron(I_16, w4_mat)        (256, 192)  then column-permuted so the
           final per-branch column order is (c, i_low[8], j_low[8]) -> the
           post-kernel pixel-unshuffle becomes a plain transpose.
    """
    (w1, b1), (w2, b2), (w3, b3), (w4, b4) = params

    def to_mat(w):
        cin, cout = w.shape[0], w.shape[1]
        return jnp.transpose(w, (0, 2, 3, 1)).reshape(cin, 4 * cout)

    w1m, w2m, w3m, w4m = (to_mat(w) for w in (w1, w2, w3, w4))

    def bd(wm, groups):
        return jnp.kron(jnp.eye(groups, dtype=wm.dtype), wm)

    W1 = w1m            # (256, 256)
    W2 = bd(w2m, 4)     # (256, 512)
    W3 = bd(w3m, 4)     # (128, 256)
    W4 = bd(w4m, 16)    # (256, 192), cols = k2*48 + k3*12 + k4*3 + c

    # Column permutation: new col = c*64 + i_low*8 + j_low, where
    # i_low = ki2*4 + ki3*2 + ki4 and j_low = kj2*4 + kj3*2 + kj4.
    src = np.empty(192, dtype=np.int32)
    for c in range(3):
        for ki2 in range(2):
            for kj2 in range(2):
                for ki3 in range(2):
                    for kj3 in range(2):
                        for ki4 in range(2):
                            for kj4 in range(2):
                                il = ki2 * 4 + ki3 * 2 + ki4
                                jl = kj2 * 4 + kj3 * 2 + kj4
                                k2 = ki2 * 2 + kj2
                                k3 = ki3 * 2 + kj3
                                k4 = ki4 * 2 + kj4
                                src[c * 64 + il * 8 + jl] = (
                                    k2 * 48 + k3 * 12 + k4 * 3 + c)
    W4 = W4[:, src]

    B1 = jnp.tile(b1, 4)[None, :]              # (1, 256)
    B2 = jnp.tile(b2, 16)[None, :]             # (1, 512)
    B3 = jnp.tile(b3, 16)[None, :]             # (1, 256)
    B4 = jnp.tile(b4, 64)[src][None, :]        # (1, 192)

    # bf16 weights halve resident weight HBM/VMEM traffic; biases stay f32.
    Ws = tuple(w.astype(jnp.bfloat16) for w in (W1, W2, W3, W4))
    Bs = tuple(b.astype(jnp.float32) for b in (B1, B2, B3, B4))
    return Ws, Bs


def _round_up(n, m):
    return (n + m - 1) // m * m


# ----------------------------------------------------------------------------
# Forward wrapper.
# ----------------------------------------------------------------------------
@jax.jit
def decoder_forward(x, packed):
    """x: (B, 12544) f32 -> (B, 3, 112, 112) f32 (NCHW, like PyTorch)."""
    Ws, Bs = packed
    B = x.shape[0]
    M = B * 49  # layer-1 pixels (7x7 per batch element)

    # Unflatten (B, 256*7*7) -> (B, 256, 7, 7) -> per-pixel channel rows, bf16.
    rows = jnp.transpose(x.reshape(B, 256, 49), (0, 2, 1)).reshape(M, 256)
    rows = rows.astype(jnp.bfloat16)

    # Tile heuristic: one grid step for small M (per-step overhead ~0.35 us is
    # a large fraction of a weight-DMA-bound call); 256/512-row tiles for big M.
    M8 = _round_up(M, 8)
    if M8 <= 512:
        T = M8
    elif M8 <= 4096:
        T = 256
    else:
        T = 512
    M_pad = _round_up(M, T)
    if M_pad != M:
        rows = jnp.pad(rows, ((0, M_pad - M), (0, 0)))
    grid_steps = M_pad // T

    n_out = 4 * Ws[3].shape[1]  # 4 branches * 192 = 768 lane-dense columns

    w_specs = [pl.BlockSpec(w.shape, lambda i: (0, 0)) for w in Ws]
    b_specs = [pl.BlockSpec(b.shape, lambda i: (0, 0)) for b in Bs]

    # MXU flops actually issued (incl. the residual 4x block-diag waste in
    # layers 2/3/4), one transcendental (tanh) per activation element.
    flops = 2 * M_pad * (256 * 256 + 256 * 512 + 4 * (128 * 256 + 256 * 192))
    transcendentals = M_pad * (256 + 512 + 4 * (256 + 192))
    bytes_accessed = (M_pad * 256 * 2 + M_pad * n_out * 4
                      + sum(int(w.size) * w.dtype.itemsize for w in Ws)
                      + sum(int(b.size) * b.dtype.itemsize for b in Bs))

    # With 1-2 grid steps the call is weight-DMA-bound: do NOT split across
    # v7x TensorCores (each would DMA its own weight copy).
    semantics = ("arbitrary",) if grid_steps <= 2 else ("parallel",)

    y = pl.pallas_call(
        _fused_decoder_kernel,
        out_shape=jax.ShapeDtypeStruct((M_pad, n_out), jnp.float32),
        grid=(grid_steps,),
        in_specs=([pl.BlockSpec((T, 256), lambda i: (i, 0))] + w_specs + b_specs),
        out_specs=pl.BlockSpec((T, n_out), lambda i: (i, 0)),
        compiler_params=pltpu.CompilerParams(
            dimension_semantics=semantics,
            vmem_limit_bytes=32 * 1024 * 1024),      # safe on v5e/v6e/v7x
        cost_estimate=pl.CostEstimate(
            flops=flops, transcendentals=transcendentals,
            bytes_accessed=bytes_accessed),
    )(rows, *Ws, *Bs)

    # Deferred pixel-unshuffle + NHWC->NCHW.  Row r = b*49 + i*7 + j; column
    # = (ki1*2 + kj1)*192 + c*64 + i_low*8 + j_low.  Output pixel:
    #   H = 16*i + 8*ki1 + i_low,   W = 16*j + 8*kj1 + j_low.
    y = y[:M].reshape(B, 7, 7, 2, 2, 3, 8, 8)
    #    axes:        b  i  j ki1 kj1 c  il jl
    y = jnp.transpose(y, (0, 5, 1, 3, 6, 2, 4, 7))   # (B, 3, 7, 2, 8, 7, 2, 8)
    return y.reshape(B, 3, 112, 112)


# ----------------------------------------------------------------------------
# Pure-jnp f32 reference (NCHW), matching ConvTranspose2d(k=2, s=2) + SiLU.
# ----------------------------------------------------------------------------
def _reference_forward(x, params):
    B = x.shape[0]
    h = x.reshape(B, 256, 7, 7)
    for (w, b) in params:
        # out[b, co, 2i+ki, 2j+kj] = sum_ci h[b, ci, i, j] * w[ci, co, ki, kj] + b[co]
        y = jnp.einsum("bcij,cokl->boikjl", h, w)
        Bx, co, H, kh, W, kw = y.shape
        y = y.reshape(Bx, co, H * kh, W * kw) + b[None, :, None, None]
        h = y * jax.nn.sigmoid(y)
    return h


if __name__ == "__main__":
    key = jax.random.PRNGKey(0)
    params = init_decoder_params(key)
    packed = pack_decoder_params(params)

    # Input implied by the module: (B, 256*7*7)
    B = 2
    x = jax.random.normal(jax.random.fold_in(key, 1000), (B, 256 * 7 * 7), jnp.float32)

    out = jax.block_until_ready(decoder_forward(x, packed))
    assert out.shape == (B, 3, 112, 112), out.shape

    ref = jax.block_until_ready(_reference_forward(x, params))
    # Kernel uses bf16 MXU operands / bf16 inter-layer activations; reference
    # is pure f32, so allow bf16-level tolerance.
    max_err = float(jnp.max(jnp.abs(out - ref)))
    assert jnp.allclose(out, ref, atol=5e-3, rtol=5e-2), max_err

    print("KERNEL_OK")
</pallas_src>

<mosaic_0001>
module attributes {stable_mosaic.version = 11 : i64} {
  func.func @_fused_decoder_kernel(%arg0: i32, %arg1: memref<104x256xbf16, #tpu.memory_space<vmem>>, %arg2: memref<256x256xbf16, #tpu.memory_space<vmem>>, %arg3: memref<256x512xbf16, #tpu.memory_space<vmem>>, %arg4: memref<128x256xbf16, #tpu.memory_space<vmem>>, %arg5: memref<256x192xbf16, #tpu.memory_space<vmem>>, %arg6: memref<1x256xf32, #tpu.memory_space<vmem>>, %arg7: memref<1x512xf32, #tpu.memory_space<vmem>>, %arg8: memref<1x256xf32, #tpu.memory_space<vmem>>, %arg9: memref<1x192xf32, #tpu.memory_space<vmem>>, %arg10: memref<104x768xf32, #tpu.memory_space<vmem>>) attributes {dimension_semantics = [#tpu.dimension_semantics<arbitrary>], iteration_bounds = array<i64: 1>, scalar_prefetch = 0 : i64, scratch_operands = 0 : i64, tpu.core_type = #tpu.core_type<tc>, window_params = [{transform_indices = @transform_0, window_bounds = array<i64: 104, 256>}, {pipeline_mode = #tpu.pipeline_mode<synchronous>, transform_indices = @transform_1, window_bounds = array<i64: 256, 256>}, {pipeline_mode = #tpu.pipeline_mode<synchronous>, transform_indices = @transform_2, window_bounds = array<i64: 256, 512>}, {pipeline_mode = #tpu.pipeline_mode<synchronous>, transform_indices = @transform_3, window_bounds = array<i64: 128, 256>}, {pipeline_mode = #tpu.pipeline_mode<synchronous>, transform_indices = @transform_4, window_bounds = array<i64: 256, 192>}, {pipeline_mode = #tpu.pipeline_mode<synchronous>, transform_indices = @transform_5, window_bounds = array<i64: 1, 256>}, {pipeline_mode = #tpu.pipeline_mode<synchronous>, transform_indices = @transform_6, window_bounds = array<i64: 1, 512>}, {pipeline_mode = #tpu.pipeline_mode<synchronous>, transform_indices = @transform_7, window_bounds = array<i64: 1, 256>}, {pipeline_mode = #tpu.pipeline_mode<synchronous>, transform_indices = @transform_8, window_bounds = array<i64: 1, 192>}, {transform_indices = @transform_9, window_bounds = array<i64: 104, 768>}]} {
    %c0 = arith.constant 0 : index
    %c0_0 = arith.constant 0 : index
    %0 = vector.load %arg1[%c0, %c0_0] : memref<104x256xbf16, #tpu.memory_space<vmem>>, vector<104x256xbf16>
    %c0_1 = arith.constant 0 : index
    %c0_2 = arith.constant 0 : index
    %1 = vector.load %arg2[%c0_1, %c0_2] : memref<256x256xbf16, #tpu.memory_space<vmem>>, vector<256x256xbf16>
    %c0_3 = arith.constant 0 : index
    %c0_4 = arith.constant 0 : index
    %2 = vector.load %arg6[%c0_3, %c0_4] : memref<1x256xf32, #tpu.memory_space<vmem>>, vector<1x256xf32>
    %cst = arith.constant dense<0.000000e+00> : vector<104x256xf32>
    %3 = tpu.matmul %0, %1, %cst {dimension_numbers = #tpu.dot_dimension_numbers<[1], [0], [0], [1], [0, 0, 1, 1], [], []>} : vector<104x256xbf16>, vector<256x256xbf16>, vector<104x256xf32> -> vector<104x256xf32>
    %4 = vector.broadcast %2 : vector<1x256xf32> to vector<104x256xf32>
    %5 = arith.addf %3, %4 : vector<104x256xf32>
    %cst_5 = arith.constant 5.000000e-01 : f32
    %6 = vector.broadcast %cst_5 : f32 to vector<104x256xf32>
    %7 = arith.mulf %6, %5 : vector<104x256xf32>
    %8 = math.tanh %7 : vector<104x256xf32>
    %cst_6 = arith.constant 5.000000e-01 : f32
    %9 = vector.broadcast %cst_6 : f32 to vector<104x256xf32>
    %10 = arith.mulf %9, %8 : vector<104x256xf32>
    %cst_7 = arith.constant 5.000000e-01 : f32
    %11 = vector.broadcast %cst_7 : f32 to vector<104x256xf32>
    %12 = arith.addf %10, %11 : vector<104x256xf32>
    %13 = arith.mulf %5, %12 : vector<104x256xf32>
    %c0_8 = arith.constant 0 : index
    %c0_9 = arith.constant 0 : index
    %14 = vector.load %arg3[%c0_8, %c0_9] : memref<256x512xbf16, #tpu.memory_space<vmem>>, vector<256x512xbf16>
    %c0_10 = arith.constant 0 : index
    %c0_11 = arith.constant 0 : index
    %15 = vector.load %arg7[%c0_10, %c0_11] : memref<1x512xf32, #tpu.memory_space<vmem>>, vector<1x512xf32>
    %16 = arith.truncf %13 : vector<104x256xf32> to vector<104x256xbf16>
    %cst_12 = arith.constant dense<0.000000e+00> : vector<104x512xf32>
    %17 = tpu.matmul %16, %14, %cst_12 {dimension_numbers = #tpu.dot_dimension_numbers<[1], [0], [0], [1], [0, 0, 1, 1], [], []>} : vector<104x256xbf16>, vector<256x512xbf16>, vector<104x512xf32> -> vector<104x512xf32>
    %18 = vector.broadcast %15 : vector<1x512xf32> to vector<104x512xf32>
    %19 = arith.addf %17, %18 : vector<104x512xf32>
    %cst_13 = arith.constant 5.000000e-01 : f32
    %20 = vector.broadcast %cst_13 : f32 to vector<104x512xf32>
    %21 = arith.mulf %20, %19 : vector<104x512xf32>
    %22 = math.tanh %21 : vector<104x512xf32>
    %cst_14 = arith.constant 5.000000e-01 : f32
    %23 = vector.broadcast %cst_14 : f32 to vector<104x512xf32>
    %24 = arith.mulf %23, %22 : vector<104x512xf32>
    %cst_15 = arith.constant 5.000000e-01 : f32
    %25 = vector.broadcast %cst_15 : f32 to vector<104x512xf32>
    %26 = arith.addf %24, %25 : vector<104x512xf32>
    %27 = arith.mulf %19, %26 : vector<104x512xf32>
    %c0_16 = arith.constant 0 : index
    %c0_17 = arith.constant 0 : index
    %28 = vector.load %arg4[%c0_16, %c0_17] : memref<128x256xbf16, #tpu.memory_space<vmem>>, vector<128x256xbf16>
    %c0_18 = arith.constant 0 : index
    %c0_19 = arith.constant 0 : index
    %29 = vector.load %arg8[%c0_18, %c0_19] : memref<1x256xf32, #tpu.memory_space<vmem>>, vector<1x256xf32>
    %c0_20 = arith.constant 0 : index
    %c0_21 = arith.constant 0 : index
    %30 = vector.load %arg5[%c0_20, %c0_21] : memref<256x192xbf16, #tpu.memory_space<vmem>>, vector<256x192xbf16>
    %c0_22 = arith.constant 0 : index
    %c0_23 = arith.constant 0 : index
    %31 = vector.load %arg9[%c0_22, %c0_23] : memref<1x192xf32, #tpu.memory_space<vmem>>, vector<1x192xf32>
    %32 = vector.extract_strided_slice %27 {offsets = [0, 0], sizes = [104, 128], strides = [1, 1]} : vector<104x512xf32> to vector<104x128xf32>
    %33 = arith.truncf %32 : vector<104x128xf32> to vector<104x128xbf16>
    %cst_24 = arith.constant dense<0.000000e+00> : vector<104x256xf32>
    %34 = tpu.matmul %33, %28, %cst_24 {dimension_numbers = #tpu.dot_dimension_numbers<[1], [0], [0], [1], [0, 0, 1, 1], [], []>} : vector<104x128xbf16>, vector<128x256xbf16>, vector<104x256xf32> -> vector<104x256xf32>
    %35 = vector.broadcast %29 : vector<1x256xf32> to vector<104x256xf32>
    %36 = arith.addf %34, %35 : vector<104x256xf32>
    %cst_25 = arith.constant 5.000000e-01 : f32
    %37 = vector.broadcast %cst_25 : f32 to vector<104x256xf32>
    %38 = arith.mulf %37, %36 : vector<104x256xf32>
    %39 = math.tanh %38 : vector<104x256xf32>
    %cst_26 = arith.constant 5.000000e-01 : f32
    %40 = vector.broadcast %cst_26 : f32 to vector<104x256xf32>
    %41 = arith.mulf %40, %39 : vector<104x256xf32>
    %cst_27 = arith.constant 5.000000e-01 : f32
    %42 = vector.broadcast %cst_27 : f32 to vector<104x256xf32>
    %43 = arith.addf %41, %42 : vector<104x256xf32>
    %44 = arith.mulf %36, %43 : vector<104x256xf32>
    %45 = arith.truncf %44 : vector<104x256xf32> to vector<104x256xbf16>
    %cst_28 = arith.constant dense<0.000000e+00> : vector<104x192xf32>
    %46 = tpu.matmul %45, %30, %cst_28 {dimension_numbers = #tpu.dot_dimension_numbers<[1], [0], [0], [1], [0, 0, 1, 1], [], []>} : vector<104x256xbf16>, vector<256x192xbf16>, vector<104x192xf32> -> vector<104x192xf32>
    %47 = vector.broadcast %31 : vector<1x192xf32> to vector<104x192xf32>
    %48 = arith.addf %46, %47 : vector<104x192xf32>
    %cst_29 = arith.constant 5.000000e-01 : f32
    %49 = vector.broadcast %cst_29 : f32 to vector<104x192xf32>
    %50 = arith.mulf %49, %48 : vector<104x192xf32>
    %51 = math.tanh %50 : vector<104x192xf32>
    %cst_30 = arith.constant 5.000000e-01 : f32
    %52 = vector.broadcast %cst_30 : f32 to vector<104x192xf32>
    %53 = arith.mulf %52, %51 : vector<104x192xf32>
    %cst_31 = arith.constant 5.000000e-01 : f32
    %54 = vector.broadcast %cst_31 : f32 to vector<104x192xf32>
    %55 = arith.addf %53, %54 : vector<104x192xf32>
    %56 = arith.mulf %48, %55 : vector<104x192xf32>
    %c0_32 = arith.constant 0 : index
    %c0_33 = arith.constant 0 : index
    %57 = vector.load %arg10[%c0_32, %c0_33] : memref<104x768xf32, #tpu.memory_space<vmem>>, vector<104x192xf32>
    tpu.vector_store %arg10[%c0_32, %c0_33], %56 {strides = array<i32>} : memref<104x768xf32, #tpu.memory_space<vmem>>, vector<104x192xf32>,
    %58 = vector.extract_strided_slice %27 {offsets = [0, 128], sizes = [104, 128], strides = [1, 1]} : vector<104x512xf32> to vector<104x128xf32>
    %59 = arith.truncf %58 : vector<104x128xf32> to vector<104x128xbf16>
    %cst_34 = arith.constant dense<0.000000e+00> : vector<104x256xf32>
    %60 = tpu.matmul %59, %28, %cst_34 {dimension_numbers = #tpu.dot_dimension_numbers<[1], [0], [0], [1], [0, 0, 1, 1], [], []>} : vector<104x128xbf16>, vector<128x256xbf16>, vector<104x256xf32> -> vector<104x256xf32>
    %61 = vector.broadcast %29 : vector<1x256xf32> to vector<104x256xf32>
    %62 = arith.addf %60, %61 : vector<104x256xf32>
    %cst_35 = arith.constant 5.000000e-01 : f32
    %63 = vector.broadcast %cst_35 : f32 to vector<104x256xf32>
    %64 = arith.mulf %63, %62 : vector<104x256xf32>
    %65 = math.tanh %64 : vector<104x256xf32>
    %cst_36 = arith.constant 5.000000e-01 : f32
    %66 = vector.broadcast %cst_36 : f32 to vector<104x256xf32>
    %67 = arith.mulf %66, %65 : vector<104x256xf32>
    %cst_37 = arith.constant 5.000000e-01 : f32
    %68 = vector.broadcast %cst_37 : f32 to vector<104x256xf32>
    %69 = arith.addf %67, %68 : vector<104x256xf32>
    %70 = arith.mulf %62, %69 : vector<104x256xf32>
    %71 = arith.truncf %70 : vector<104x256xf32> to vector<104x256xbf16>
    %cst_38 = arith.constant dense<0.000000e+00> : vector<104x192xf32>
    %72 = tpu.matmul %71, %30, %cst_38 {dimension_numbers = #tpu.dot_dimension_numbers<[1], [0], [0], [1], [0, 0, 1, 1], [], []>} : vector<104x256xbf16>, vector<256x192xbf16>, vector<104x192xf32> -> vector<104x192xf32>
    %73 = vector.broadcast %31 : vector<1x192xf32> to vector<104x192xf32>
    %74 = arith.addf %72, %73 : vector<104x192xf32>
    %cst_39 = arith.constant 5.000000e-01 : f32
    %75 = vector.broadcast %cst_39 : f32 to vector<104x192xf32>
    %76 = arith.mulf %75, %74 : vector<104x192xf32>
    %77 = math.tanh %76 : vector<104x192xf32>
    %cst_40 = arith.constant 5.000000e-01 : f32
    %78 = vector.broadcast %cst_40 : f32 to vector<104x192xf32>
    %79 = arith.mulf %78, %77 : vector<104x192xf32>
    %cst_41 = arith.constant 5.000000e-01 : f32
    %80 = vector.broadcast %cst_41 : f32 to vector<104x192xf32>
    %81 = arith.addf %79, %80 : vector<104x192xf32>
    %82 = arith.mulf %74, %81 : vector<104x192xf32>
    %c0_42 = arith.constant 0 : index
    %c192 = arith.constant 192 : index
    %83 = vector.load %arg10[%c0_42, %c192] : memref<104x768xf32, #tpu.memory_space<vmem>>, vector<104x192xf32>
    tpu.vector_store %arg10[%c0_42, %c192], %82 {strides = array<i32>} : memref<104x768xf32, #tpu.memory_space<vmem>>, vector<104x192xf32>,
    %84 = vector.extract_strided_slice %27 {offsets = [0, 256], sizes = [104, 128], strides = [1, 1]} : vector<104x512xf32> to vector<104x128xf32>
    %85 = arith.truncf %84 : vector<104x128xf32> to vector<104x128xbf16>
    %cst_43 = arith.constant dense<0.000000e+00> : vector<104x256xf32>
    %86 = tpu.matmul %85, %28, %cst_43 {dimension_numbers = #tpu.dot_dimension_numbers<[1], [0], [0], [1], [0, 0, 1, 1], [], []>} : vector<104x128xbf16>, vector<128x256xbf16>, vector<104x256xf32> -> vector<104x256xf32>
    %87 = vector.broadcast %29 : vector<1x256xf32> to vector<104x256xf32>
    %88 = arith.addf %86, %87 : vector<104x256xf32>
    %cst_44 = arith.constant 5.000000e-01 : f32
    %89 = vector.broadcast %cst_44 : f32 to vector<104x256xf32>
    %90 = arith.mulf %89, %88 : vector<104x256xf32>
    %91 = math.tanh %90 : vector<104x256xf32>
    %cst_45 = arith.constant 5.000000e-01 : f32
    %92 = vector.broadcast %cst_45 : f32 to vector<104x256xf32>
    %93 = arith.mulf %92, %91 : vector<104x256xf32>
    %cst_46 = arith.constant 5.000000e-01 : f32
    %94 = vector.broadcast %cst_46 : f32 to vector<104x256xf32>
    %95 = arith.addf %93, %94 : vector<104x256xf32>
    %96 = arith.mulf %88, %95 : vector<104x256xf32>
    %97 = arith.truncf %96 : vector<104x256xf32> to vector<104x256xbf16>
    %cst_47 = arith.constant dense<0.000000e+00> : vector<104x192xf32>
    %98 = tpu.matmul %97, %30, %cst_47 {dimension_numbers = #tpu.dot_dimension_numbers<[1], [0], [0], [1], [0, 0, 1, 1], [], []>} : vector<104x256xbf16>, vector<256x192xbf16>, vector<104x192xf32> -> vector<104x192xf32>
    %99 = vector.broadcast %31 : vector<1x192xf32> to vector<104x192xf32>
    %100 = arith.addf %98, %99 : vector<104x192xf32>
    %cst_48 = arith.constant 5.000000e-01 : f32
    %101 = vector.broadcast %cst_48 : f32 to vector<104x192xf32>
    %102 = arith.mulf %101, %100 : vector<104x192xf32>
    %103 = math.tanh %102 : vector<104x192xf32>
    %cst_49 = arith.constant 5.000000e-01 : f32
    %104 = vector.broadcast %cst_49 : f32 to vector<104x192xf32>
    %105 = arith.mulf %104, %103 : vector<104x192xf32>
    %cst_50 = arith.constant 5.000000e-01 : f32
    %106 = vector.broadcast %cst_50 : f32 to vector<104x192xf32>
    %107 = arith.addf %105, %106 : vector<104x192xf32>
    %108 = arith.mulf %100, %107 : vector<104x192xf32>
    %c0_51 = arith.constant 0 : index
    %c384 = arith.constant 384 : index
    %109 = vector.load %arg10[%c0_51, %c384] : memref<104x768xf32, #tpu.memory_space<vmem>>, vector<104x192xf32>
    tpu.vector_store %arg10[%c0_51, %c384], %108 {strides = array<i32>} : memref<104x768xf32, #tpu.memory_space<vmem>>, vector<104x192xf32>,
    %110 = vector.extract_strided_slice %27 {offsets = [0, 384], sizes = [104, 128], strides = [1, 1]} : vector<104x512xf32> to vector<104x128xf32>
    %111 = arith.truncf %110 : vector<104x128xf32> to vector<104x128xbf16>
    %cst_52 = arith.constant dense<0.000000e+00> : vector<104x256xf32>
    %112 = tpu.matmul %111, %28, %cst_52 {dimension_numbers = #tpu.dot_dimension_numbers<[1], [0], [0], [1], [0, 0, 1, 1], [], []>} : vector<104x128xbf16>, vector<128x256xbf16>, vector<104x256xf32> -> vector<104x256xf32>
    %113 = vector.broadcast %29 : vector<1x256xf32> to vector<104x256xf32>
    %114 = arith.addf %112, %113 : vector<104x256xf32>
    %cst_53 = arith.constant 5.000000e-01 : f32
    %115 = vector.broadcast %cst_53 : f32 to vector<104x256xf32>
    %116 = arith.mulf %115, %114 : vector<104x256xf32>
    %117 = math.tanh %116 : vector<104x256xf32>
    %cst_54 = arith.constant 5.000000e-01 : f32
    %118 = vector.broadcast %cst_54 : f32 to vector<104x256xf32>
    %119 = arith.mulf %118, %117 : vector<104x256xf32>
    %cst_55 = arith.constant 5.000000e-01 : f32
    %120 = vector.broadcast %cst_55 : f32 to vector<104x256xf32>
    %121 = arith.addf %119, %120 : vector<104x256xf32>
    %122 = arith.mulf %114, %121 : vector<104x256xf32>
    %123 = arith.truncf %122 : vector<104x256xf32> to vector<104x256xbf16>
    %cst_56 = arith.constant dense<0.000000e+00> : vector<104x192xf32>
    %124 = tpu.matmul %123, %30, %cst_56 {dimension_numbers = #tpu.dot_dimension_numbers<[1], [0], [0], [1], [0, 0, 1, 1], [], []>} : vector<104x256xbf16>, vector<256x192xbf16>, vector<104x192xf32> -> vector<104x192xf32>
    %125 = vector.broadcast %31 : vector<1x192xf32> to vector<104x192xf32>
    %126 = arith.addf %124, %125 : vector<104x192xf32>
    %cst_57 = arith.constant 5.000000e-01 : f32
    %127 = vector.broadcast %cst_57 : f32 to vector<104x192xf32>
    %128 = arith.mulf %127, %126 : vector<104x192xf32>
    %129 = math.tanh %128 : vector<104x192xf32>
    %cst_58 = arith.constant 5.000000e-01 : f32
    %130 = vector.broadcast %cst_58 : f32 to vector<104x192xf32>
    %131 = arith.mulf %130, %129 : vector<104x192xf32>
    %cst_59 = arith.constant 5.000000e-01 : f32
    %132 = vector.broadcast %cst_59 : f32 to vector<104x192xf32>
    %133 = arith.addf %131, %132 : vector<104x192xf32>
    %134 = arith.mulf %126, %133 : vector<104x192xf32>
    %c0_60 = arith.constant 0 : index
    %c576 = arith.constant 576 : index
    %135 = vector.load %arg10[%c0_60, %c576] : memref<104x768xf32, #tpu.memory_space<vmem>>, vector<104x192xf32>
    tpu.vector_store %arg10[%c0_60, %c576], %134 {strides = array<i32>} : memref<104x768xf32, #tpu.memory_space<vmem>>, vector<104x192xf32>,
    return
  }
  func.func @transform_0(%arg0: i32) -> (i32, i32) {
    %c0_i32 = arith.constant 0 : i32
    %c0_i32_0 = arith.constant 0 : i32
    return %arg0, %c0_i32 : i32, i32
  }
  func.func @transform_1(%arg0: i32) -> (i32, i32) {
    %c0_i32 = arith.constant 0 : i32
    %c0_i32_0 = arith.constant 0 : i32
    %c0_i32_1 = arith.constant 0 : i32
    return %c0_i32, %c0_i32_0 : i32, i32
  }
  func.func @transform_2(%arg0: i32) -> (i32, i32) {
    %c0_i32 = arith.constant 0 : i32
    %c0_i32_0 = arith.constant 0 : i32
    %c0_i32_1 = arith.constant 0 : i32
    return %c0_i32, %c0_i32_0 : i32, i32
  }
  func.func @transform_3(%arg0: i32) -> (i32, i32) {
    %c0_i32 = arith.constant 0 : i32
    %c0_i32_0 = arith.constant 0 : i32
    %c0_i32_1 = arith.constant 0 : i32
    return %c0_i32, %c0_i32_0 : i32, i32
  }
  func.func @transform_4(%arg0: i32) -> (i32, i32) {
    %c0_i32 = arith.constant 0 : i32
    %c0_i32_0 = arith.constant 0 : i32
    %c0_i32_1 = arith.constant 0 : i32
    return %c0_i32, %c0_i32_0 : i32, i32
  }
  func.func @transform_5(%arg0: i32) -> (i32, i32) {
    %c0_i32 = arith.constant 0 : i32
    %c0_i32_0 = arith.constant 0 : i32
    %c0_i32_1 = arith.constant 0 : i32
    return %c0_i32, %c0_i32_0 : i32, i32
  }
  func.func @transform_6(%arg0: i32) -> (i32, i32) {
    %c0_i32 = arith.constant 0 : i32
    %c0_i32_0 = arith.constant 0 : i32
    %c0_i32_1 = arith.constant 0 : i32
    return %c0_i32, %c0_i32_0 : i32, i32
  }
  func.func @transform_7(%arg0: i32) -> (i32, i32) {
    %c0_i32 = arith.constant 0 : i32
    %c0_i32_0 = arith.constant 0 : i32
    %c0_i32_1 = arith.constant 0 : i32
    return %c0_i32, %c0_i32_0 : i32, i32
  }
  func.func @transform_8(%arg0: i32) -> (i32, i32) {
    %c0_i32 = arith.constant 0 : i32
    %c0_i32_0 = arith.constant 0 : i32
    %c0_i32_1 = arith.constant 0 : i32
    return %c0_i32, %c0_i32_0 : i32, i32
  }
  func.func @transform_9(%arg0: i32) -> (i32, i32) {
    %c0_i32 = arith.constant 0 : i32
    %c0_i32_0 = arith.constant 0 : i32
    return %arg0, %c0_i32 : i32, i32
  }
}

</mosaic_0001>

<bundles_post_ra>
// kernel: decoder_forward.1
= control target key start
LH: loop header
LB: loop body
LE: loop exit
PB: predicated region body
PF: predicated region fallthrough
CT: control target
= control target key end

     0   :  { %14 = vsyncpa [#allocation3], 0  ;;  %s8423_s0 = inlined_call_operand.vmem [shape: bf16[104,256], index: 0, kind: input, shape index: {}]   ;;  %s8424_s1 = inlined_call_operand.hbm [shape: bf16[256,256], index: 1, kind: input, shape index: {}]   ;;  %s8425_s2 = inlined_call_operand.hbm [shape: bf16[256,512], index: 2, kind: input, shape index: {}]   ;;  %s8426_s3 = inlined_call_operand.hbm [shape: bf16[128,256], index: 3, kind: input, shape index: {}]   ;;  %s8427_s4 = inlined_call_operand.vmem [shape: bf16[256,192], index: 4, kind: input, shape index: {}]   ;;  %s8428_s5 = inlined_call_operand.hbm [shape: f32[1,256], index: 5, kind: input, shape index: {}]   ;;  %s8429_s6 = inlined_call_operand.hbm [shape: f32[1,512], index: 6, kind: input, shape index: {}]   ;;  %s8430_s7 = inlined_call_operand.hbm [shape: f32[1,256], index: 7, kind: input, shape index: {}]   ;;  %s8431_s8 = inlined_call_operand.hbm [shape: f32[1,192], index: 8, kind: input, shape index: {}]   ;;  %s8432_s9 = inlined_call_operand.vmem [shape: f32[104,768], index: 9, kind: output, shape index: {}]  }
   0x1   :  { %15 = vsyncpa [#allocation5], 0 }
   0x2   :  { %16 = vsyncpa [#allocation8], 0 }
   0x3   :  { %17 = vsyncpa [#allocation11], 0  ;;  %s5330_s30 = smov [#allocation4]   ;;  %s5168_s13 = scalar_lea.hbm %s8425_s2, 8192 }
   0x4   :  { %s37_s10 = sshll.u32 %s5330_s30, 4  ;;  %p5169_p0 = scmp.ne.s32.totalorder %s8425_s2, %s5168_s13  ;;  %s38_s10 = int_to_ptr.vmem [resolvable:$true] %s37_s10 }
   0x5   :  { %p5172_p1 = scmp.lt.u32.totalorder %s5168_s13, %s8425_s2 }
   0x7   :  { %p5174_p2 = pnand %p5172_p1, %p5169_p0 }
   0x9   :  { %5177 = shalt.err (!%p5174_p2)
}
   0xa   :  { %s5178_s18 = scalar_lea.vmem %s38_s10, 8192  ;;  %p5183_p4 = scmp.lt.s32.totalorder %s38_s10, %s38_s10 }
   0xb   :  { %p5179_p3 = scmp.ne.s32.totalorder %s38_s10, %s5178_s18  ;;  %p5184_p5 = scmp.lt.s32.totalorder %s5178_s18, %s5178_s18 }
   0xd   :  { %p5185_p6 = por %p5184_p5, %p5183_p4 }
   0xf   :  { %p5186_p7 = pnand %p5185_p6, %p5179_p3 }
  0x11   :  { %5189 = shalt.err (!%p5186_p7)
}
  0x12   :  { %s5331_s19 = smov 256   ;;  %s5332_s20 = smov 16  }
  0x13   :  { %43 = dma.hbm_to_vmem [thread:$0]  %s8425_s2, 8192, %s38_s10, [#allocation5], %s5331_s19, %s5331_s19, %s5332_s20  }
  0x14   :  { %s5333_s23 = smov [#allocation7]   ;;  %s5334_s25 = smov [#allocation10]  }
  0x15   :  { %s64_s24 = sshll.u32 %s5333_s23, 4  ;;  %s84_s26 = sshll.u32 %s5334_s25, 4  ;;  %s65_s24 = int_to_ptr.vmem [resolvable:$true] %s64_s24  ;;  %s85_s26 = int_to_ptr.vmem [resolvable:$true] %s84_s26 }
  0x16   :  { %s5190_s29 = scalar_lea.hbm %s8428_s5, 32 }
  0x17   :  { %p5191_p8 = scmp.ne.s32.totalorder %s8428_s5, %s5190_s29  ;;  %p5194_p9 = scmp.lt.u32.totalorder %s5190_s29, %s8428_s5 }
  0x19   :  { %p5196_p10 = pnand %p5194_p9, %p5191_p8 }
  0x1b   :  { %5199 = shalt.err (!%p5196_p10)
}
  0x1c   :  { %s5200_s2 = scalar_lea.vmem %s65_s24, 32  ;;  %p5205_p12 = scmp.lt.s32.totalorder %s65_s24, %s65_s24 }
  0x1d   :  { %p5201_p11 = scmp.ne.s32.totalorder %s65_s24, %s5200_s2  ;;  %p5206_p13 = scmp.lt.s32.totalorder %s5200_s2, %s5200_s2 }
  0x1f   :  { %p5207_p0 = por %p5206_p13, %p5205_p12 }
  0x21   :  { %p5208_p1 = pnand %p5207_p0, %p5201_p11 }
  0x23   :  { %5211 = shalt.err (!%p5208_p1)
}
  0x24   :  { %67 = dma.hbm_to_vmem [thread:$0]  %s8428_s5, 32, %s65_s24, [#allocation8]  }
  0x25   :  { %s5212_s17 = scalar_lea.hbm %s8430_s7, 32 }
  0x26   :  { %p5213_p2 = scmp.ne.s32.totalorder %s8430_s7, %s5212_s17  ;;  %p5216_p3 = scmp.lt.u32.totalorder %s5212_s17, %s8430_s7 }
  0x28   :  { %p5218_p4 = pnand %p5216_p3, %p5213_p2 }
  0x2a   :  { %5221 = shalt.err (!%p5218_p4)
}
  0x2b   :  { %s5222_s22 = scalar_lea.vmem %s85_s26, 32  ;;  %p5227_p6 = scmp.lt.s32.totalorder %s85_s26, %s85_s26 }
  0x2c   :  { %p5223_p5 = scmp.ne.s32.totalorder %s85_s26, %s5222_s22  ;;  %p5228_p7 = scmp.lt.s32.totalorder %s5222_s22, %s5222_s22 }
  0x2e   :  { %p5229_p8 = por %p5228_p7, %p5227_p6 }
  0x30   :  { %p5230_p9 = pnand %p5229_p8, %p5223_p5 }
  0x32   :  { %5233 = shalt.err (!%p5230_p9)
}
  0x33   :  { %87 = dma.hbm_to_vmem [thread:$0]  %s8430_s7, 32, %s85_s26, [#allocation11]  }
  0x34   :  { %s5335_s24 = smov [#allocation2]   ;;  %s5234_s29 = scalar_lea.hbm %s8424_s1, 4096 }
  0x35   :  { %s25_s25 = sshll.u32 %s5335_s24, 4  ;;  %p5235_p10 = scmp.ne.s32.totalorder %s8424_s1, %s5234_s29  ;;  %s26_s25 = int_to_ptr.vmem [resolvable:$true] %s25_s25 }
  0x36   :  { %p5238_p11 = scmp.lt.u32.totalorder %s5234_s29, %s8424_s1 }
  0x38   :  { %p5240_p12 = pnand %p5238_p11, %p5235_p10 }
  0x3a   :  { %5243 = shalt.err (!%p5240_p12)
}
  0x3b   :  { %s5244_s2 = scalar_lea.vmem %s26_s25, 4096  ;;  %p5249_p0 = scmp.lt.s32.totalorder %s26_s25, %s26_s25 }
  0x3c   :  { %p5245_p13 = scmp.ne.s32.totalorder %s26_s25, %s5244_s2  ;;  %p5250_p1 = scmp.lt.s32.totalorder %s5244_s2, %s5244_s2 }
  0x3e   :  { %p5251_p2 = por %p5250_p1, %p5249_p0 }
  0x40   :  { %p5252_p3 = pnand %p5251_p2, %p5245_p13 }
  0x42   :  { %5255 = shalt.err (!%p5252_p3)
}
  0x43   :  { %s5336_s7 = smov 128   ;;  %s5337_s26 = smov 8  }
  0x44   :  { %31 = dma.hbm_to_vmem [thread:$0]  %s8424_s1, 4096, %s26_s25, [#allocation3], %s5336_s7, %s5336_s7, %s5337_s26  }
  0x45   :  { %s5338_s15 = smov [#allocation6]   ;;  %s5339_s17 = smov [#allocation9]  }
  0x46   :  { %s49_s16 = sshll.u32 %s5338_s15, 4  ;;  %s74_s18 = sshll.u32 %s5339_s17, 4  ;;  %s50_s16 = int_to_ptr.vmem [resolvable:$true] %s49_s16  ;;  %s75_s18 = int_to_ptr.vmem [resolvable:$true] %s74_s18 }
  0x47   :  { %s5256_s21 = scalar_lea.hbm %s8426_s3, 2048 }
  0x48   :  { %p5257_p4 = scmp.ne.s32.totalorder %s8426_s3, %s5256_s21  ;;  %p5260_p5 = scmp.lt.u32.totalorder %s5256_s21, %s8426_s3 }
  0x4a   :  { %p5262_p6 = pnand %p5260_p5, %p5257_p4 }
  0x4c   :  { %5265 = shalt.err (!%p5262_p6)
}
  0x4d   :  { %s5266_s1 = scalar_lea.vmem %s50_s16, 2048  ;;  %p5271_p8 = scmp.lt.s32.totalorder %s50_s16, %s50_s16 }
  0x4e   :  { %p5267_p7 = scmp.ne.s32.totalorder %s50_s16, %s5266_s1  ;;  %p5272_p9 = scmp.lt.s32.totalorder %s5266_s1, %s5266_s1 }
  0x50   :  { %p5273_p10 = por %p5272_p9, %p5271_p8 }
  0x52   :  { %p5274_p11 = pnand %p5273_p10, %p5267_p7 }
  0x54   :  { %5277 = shalt.err (!%p5274_p11)
}
  0x55   :  { %55 = dma.hbm_to_vmem [thread:$0]  %s8426_s3, 2048, %s50_s16, [#allocation5], %s5336_s7, %s5336_s7, %s5337_s26  }
  0x56   :  { %s5278_s30 = scalar_lea.hbm %s8429_s6, 64 }
  0x57   :  { %p5279_p12 = scmp.ne.s32.totalorder %s8429_s6, %s5278_s30  ;;  %p5282_p13 = scmp.lt.u32.totalorder %s5278_s30, %s8429_s6 }
  0x59   :  { %p5284_p0 = pnand %p5282_p13, %p5279_p12 }
  0x5b   :  { %5287 = shalt.err (!%p5284_p0)
}
  0x5c   :  { %s5288_s10 = scalar_lea.vmem %s75_s18, 64  ;;  %p5293_p2 = scmp.lt.s32.totalorder %s75_s18, %s75_s18 }
  0x5d   :  { %p5289_p1 = scmp.ne.s32.totalorder %s75_s18, %s5288_s10  ;;  %p5294_p3 = scmp.lt.s32.totalorder %s5288_s10, %s5288_s10 }
  0x5f   :  { %p5295_p4 = por %p5294_p3, %p5293_p2 }
  0x61   :  { %p5296_p5 = pnand %p5295_p4, %p5289_p1 }
  0x63   :  { %5299 = shalt.err (!%p5296_p5)
}
  0x64   :  { %77 = dma.hbm_to_vmem [thread:$0]  %s8429_s6, 64, %s75_s18, [#allocation8]  }
  0x65   :  { %s5340_s26 = smov [#allocation12]   ;;  %s5300_s17 = scalar_lea.hbm %s8431_s8, 32 }
  0x66   :  { %s94_s14 = sshll.u32 %s5340_s26, 4  ;;  %p5301_p6 = scmp.ne.s32.totalorder %s8431_s8, %s5300_s17  ;;  %s95_s14 = int_to_ptr.vmem [resolvable:$true] %s94_s14 }
  0x67   :  { %p5304_p7 = scmp.lt.u32.totalorder %s5300_s17, %s8431_s8 }
  0x69   :  { %p5306_p8 = pnand %p5304_p7, %p5301_p6 }
  0x6b   :  { %5309 = shalt.err (!%p5306_p8)
}
  0x6c   :  { %s5310_s5 = scalar_lea.vmem %s95_s14, 32  ;;  %p5315_p10 = scmp.lt.s32.totalorder %s95_s14, %s95_s14 }
  0x6d   :  { %p5311_p9 = scmp.ne.s32.totalorder %s95_s14, %s5310_s5  ;;  %p5316_p11 = scmp.lt.s32.totalorder %s5310_s5, %s5310_s5 }
  0x6f   :  { %p5317_p12 = por %p5316_p11, %p5315_p10 }
  0x71   :  { %p5318_p13 = pnand %p5317_p12, %p5311_p9 }
  0x73   :  { %5321 = shalt.err (!%p5318_p13)
}
  0x74   :  { %97 = dma.hbm_to_vmem [thread:$0]  %s8431_s8, 32, %s95_s14, [#allocation11]  }
  0x75   :  { %5322 = dma.done.wait [#allocation3], 4096  }
  0x76   :  { %5323 = vsyncadd [#allocation3], 4294963200 }
  0x77   :  { %5324 = dma.done.wait [#allocation5], 10240  }
  0x78   :  { %5325 = vsyncadd [#allocation5], 4294957056 }
  0x79   :  { %5326 = dma.done.wait [#allocation8], 96  }
  0x7a   :  { %5327 = vsyncadd [#allocation8], 4294967200 }
  0x7b   :  { %5328 = dma.done.wait [#allocation11], 64  }
  0x7c   :  { %5329 = vsyncadd [#allocation11], 4294967232  ;;  %v4312_v0 = vld [vmem:[#allocation2 + $0x4] ss:$8 sps:$4 sm:$0xff]   ;;  %v4314_v1 = vld [vmem:[#allocation2] ss:$8 sps:$4 sm:$0xff]  }
  0x7d   :  { %404 = vmatprep.subr.bf16.mxu0 %v4312_v0  ;;  %v4315_v2 = vld [vmem:[#allocation2 + $0x14] ss:$8 sps:$4 sm:$0xff]   ;;  %v4317_v3 = vld [vmem:[#allocation2 + $0x10] ss:$8 sps:$4 sm:$0xff]   ;;  %v4318_v4 = vld [vmem:[#allocation2 + $0x24] ss:$8 sps:$4 sm:$0xff]  }
  0x7e   :  { %405 = vmatpush1.bf16.msra.mxu0 %v4314_v1  ;;  %v4320_v5 = vld [vmem:[#allocation2 + $0x20] ss:$8 sps:$4 sm:$0xff]   ;;  %v4321_v6 = vld [vmem:[#allocation2 + $0x34] ss:$8 sps:$4 sm:$0xff]   ;;  %v4323_v7 = vld [vmem:[#allocation2 + $0x30] ss:$8 sps:$4 sm:$0xff]  }
  0x7f   :  { %406 = vmatprep.subr.bf16.mxu0 %v4315_v2  ;;  %v4324_v8 = vld [vmem:[#allocation2 + $0x44] ss:$8 sps:$4 sm:$0xff]   ;;  %v4326_v9 = vld [vmem:[#allocation2 + $0x40] ss:$8 sps:$4 sm:$0xff]   ;;  %v4327_v10 = vld [vmem:[#allocation2 + $0x54] ss:$8 sps:$4 sm:$0xff]  }
  0x80   :  { %v4329_v11 = vld [vmem:[#allocation2 + $0x50] ss:$8 sps:$4 sm:$0xff]   ;;  %v4330_v12 = vld [vmem:[#allocation2 + $0x64] ss:$8 sps:$4 sm:$0xff]   ;;  %v4332_v14 = vld [vmem:[#allocation2 + $0x60] ss:$8 sps:$4 sm:$0xff]  }
  0x81   :  { %v4362_v13 = vld [vmem:[%s8423_s0 + $0x4] ss:$8 sps:$4 sm:$0xff]   ;;  %v4333_v15 = vld [vmem:[#allocation2 + $0x74] ss:$8 sps:$4 sm:$0xff]   ;;  %v4335_v16 = vld [vmem:[#allocation2 + $0x70] ss:$8 sps:$4 sm:$0xff]  }
  0x82   :  { %407 = vmatpush1.bf16.msra.mxu0 %v4317_v3  ;;  %436 = vmatprep.mubr.bf16.mxu0 %v4362_v13  ;;  %v4336_v17 = vld [vmem:[#allocation2 + $0x84] ss:$8 sps:$4 sm:$0xff]   ;;  %v4382_v19 = vld [vmem:[#allocation4] ss:$16 sps:$4 sm:$0xff]   ;;  %v4339_v21 = vld [vmem:[#allocation2 + $0x94] ss:$8 sps:$4 sm:$0xff]  }
  0x83   :  { %408 = vmatprep.subr.bf16.mxu0 %v4318_v4  ;;  %v4380_v18 = vld [vmem:[#allocation4 + $0x4] ss:$16 sps:$4 sm:$0xff]   ;;  %v4338_v20 = vld [vmem:[#allocation2 + $0x80] ss:$8 sps:$4 sm:$0xff]   ;;  %v4341_v24 = vld [vmem:[#allocation2 + $0x90] ss:$8 sps:$4 sm:$0xff]  }
  0x84   :  { %1055 = vmatprep.subr.bf16.mxu1 %v4380_v18  ;;  %v4386_v22 = vld [vmem:[#allocation4 + $0x24] ss:$16 sps:$4 sm:$0xff]   ;;  %v4388_v23 = vld [vmem:[#allocation4 + $0x20] ss:$16 sps:$4 sm:$0xff]   ;;  %v5480_v50 = vld [vmem:[#allocation4 + $0xc] ss:$16 sps:$4 sm:$0xff]  }
  0x85   :  { %1056 = vmatpush1.bf16.msra.mxu1 %v4382_v19  ;;  %v4392_v25 = vld [vmem:[#allocation4 + $0x44] ss:$16 sps:$4 sm:$0xff]   ;;  %v4394_v27 = vld [vmem:[#allocation4 + $0x40] ss:$16 sps:$4 sm:$0xff]   ;;  %v5488_v55 = vld [vmem:[#allocation4 + $0x8] ss:$16 sps:$4 sm:$0xff]  }
  0x86   :  { %409 = vmatpush1.bf16.msra.mxu0 %v4320_v5  ;;  %1057 = vmatprep.subr.bf16.mxu1 %v4386_v22  ;;  %v4342_v26 = vld [vmem:[#allocation2 + $0xa4] ss:$8 sps:$4 sm:$0xff]   ;;  %v4344_v29 = vld [vmem:[#allocation2 + $0xa0] ss:$8 sps:$4 sm:$0xff]   ;;  %v4345_v30 = vld [vmem:[#allocation2 + $0xb4] ss:$8 sps:$4 sm:$0xff]  }
  0x87   :  { %410 = vmatprep.subr.bf16.mxu0 %v4321_v6  ;;  %v4398_v28 = vld [vmem:[#allocation4 + $0x64] ss:$16 sps:$4 sm:$0xff]   ;;  %v4400_v31 = vld [vmem:[#allocation4 + $0x60] ss:$16 sps:$4 sm:$0xff]   ;;  %v5490_v56 = vld [vmem:[#allocation4 + $0x2c] ss:$16 sps:$4 sm:$0xff]  }
  0x88   :  { %v4404_v32 = vld [vmem:[#allocation4 + $0x84] ss:$16 sps:$4 sm:$0xff]   ;;  %v4347_v33 = vld [vmem:[#allocation2 + $0xb0] ss:$8 sps:$4 sm:$0xff]   ;;  %v4350_v37 = vld [vmem:[#allocation2 + $0xc0] ss:$8 sps:$4 sm:$0xff]  }
  0x89   :  { %1058 = vmatpush1.bf16.msra.mxu1 %v4388_v23  ;;  %v4348_v34 = vld [vmem:[#allocation2 + $0xc4] ss:$8 sps:$4 sm:$0xff]   ;;  %v4406_v35 = vld [vmem:[#allocation4 + $0x80] ss:$16 sps:$4 sm:$0xff]   ;;  %v4351_v38 = vld [vmem:[#allocation2 + $0xd4] ss:$8 sps:$4 sm:$0xff]  }
  0x8a   :  { %411 = vmatpush1.bf16.msra.mxu0 %v4323_v7  ;;  %1059 = vmatprep.subr.bf16.mxu1 %v4392_v25  ;;  %v4410_v36 = vld [vmem:[#allocation4 + $0xa4] ss:$16 sps:$4 sm:$0xff]   ;;  %v4412_v39 = vld [vmem:[#allocation4 + $0xa0] ss:$16 sps:$4 sm:$0xff]   ;;  %v5493_v57 = vld [vmem:[#allocation4 + $0x28] ss:$16 sps:$4 sm:$0xff]  }
  0x8b   :  { %412 = vmatprep.subr.bf16.mxu0 %v4324_v8  ;;  %v4416_v40 = vld [vmem:[#allocation4 + $0xc4] ss:$16 sps:$4 sm:$0xff]   ;;  %v4353_v41 = vld [vmem:[#allocation2 + $0xd0] ss:$8 sps:$4 sm:$0xff]   ;;  %v4356_v43 = vld [vmem:[#allocation2 + $0xe0] ss:$8 sps:$4 sm:$0xff]  }
  0x8c   :  { %v4354_v42 = vld [vmem:[#allocation2 + $0xe4] ss:$8 sps:$4 sm:$0xff]   ;;  %v4418_v44 = vld [vmem:[#allocation4 + $0xc0] ss:$16 sps:$4 sm:$0xff]   ;;  %v4357_v45 = vld [vmem:[#allocation2 + $0xf4] ss:$8 sps:$4 sm:$0xff]  }
  0x8d   :  { %1060 = vmatpush1.bf16.msra.mxu1 %v4394_v27  ;;  %v4422_v46 = vld [vmem:[#allocation4 + $0xe4] ss:$16 sps:$4 sm:$0xff]   ;;  %v4424_v47 = vld [vmem:[#allocation4 + $0xe0] ss:$16 sps:$4 sm:$0xff]   ;;  %v5495_v58 = vld [vmem:[#allocation4 + $0x4c] ss:$16 sps:$4 sm:$0xff]  }
  0x8e   :  { %413 = vmatpush1.bf16.msra.mxu0 %v4326_v9  ;;  %1061 = vmatprep.subr.bf16.mxu1 %v4398_v28  ;;  %v4428_v48 = vld [vmem:[#allocation4 + $0x104] ss:$16 sps:$4 sm:$0xff]   ;;  %v4359_v49 = vld [vmem:[#allocation2 + $0xf0] ss:$8 sps:$4 sm:$0xff]   ;;  %v4360_v52 = vld [vmem:[%s8423_s0] ss:$8 sps:$4 sm:$0xff]  }
  0x8f   :  { %414 = vmatprep.subr.bf16.mxu0 %v4327_v10  ;;  %v4430_v51 = vld [vmem:[#allocation4 + $0x100] ss:$16 sps:$4 sm:$0xff]   ;;  %v4434_v53 = vld [vmem:[#allocation4 + $0x124] ss:$16 sps:$4 sm:$0xff]   ;;  %v5505_v61 = vld [vmem:[#allocation4 + $0x48] ss:$16 sps:$4 sm:$0xff]  }
  0x90   :  { %v4363_v54 = vld [vmem:[%s8423_s0 + $0x14] ss:$8 sps:$4 sm:$0xff]   ;;  %v4365_v59 = vld [vmem:[%s8423_s0 + $0x10] ss:$8 sps:$4 sm:$0xff]   ;;  %v4366_v60 = vld [vmem:[%s8423_s0 + $0x24] ss:$8 sps:$4 sm:$0xff]  }
  0x91   :  { %1062 = vmatpush1.bf16.msra.mxu1 %v4400_v31  ;;  %v5507_v62 = vld [vmem:[#allocation4 + $0x6c] ss:$16 sps:$4 sm:$0xff]   ;;  %v5511_v63 = vld [vmem:[#allocation4 + $0x68] ss:$16 sps:$4 sm:$0xff]   ;;  %v4440_v23 = vld [vmem:[#allocation4 + $0x144] ss:$16 sps:$4 sm:$0xff]  }
  0x92   :  { %415 = vmatpush1.bf16.msra.mxu0 %v4329_v11  ;;  %1063 = vmatprep.subr.bf16.mxu1 %v4404_v32  ;;  %v5513_v0 = vld [vmem:[#allocation4 + $0x8c] ss:$16 sps:$4 sm:$0xff]   ;;  %v4368_v1 = vld [vmem:[%s8423_s0 + $0x20] ss:$8 sps:$4 sm:$0xff]   ;;  %v4371_v7 = vld [vmem:[%s8423_s0 + $0x30] ss:$8 sps:$4 sm:$0xff]  }
  0x93   :  { %416 = vmatprep.subr.bf16.mxu0 %v4330_v12  ;;  %v4369_v2 = vld [vmem:[%s8423_s0 + $0x34] ss:$8 sps:$4 sm:$0xff]   ;;  %v5524_v3 = vld [vmem:[#allocation4 + $0x88] ss:$16 sps:$4 sm:$0xff]   ;;  %v4372_v8 = vld [vmem:[%s8423_s0 + $0x44] ss:$8 sps:$4 sm:$0xff]  }
  0x94   :  { %v5527_v4 = vld [vmem:[#allocation4 + $0xac] ss:$16 sps:$4 sm:$0xff]   ;;  %v5530_v5 = vld [vmem:[#allocation4 + $0xa8] ss:$16 sps:$4 sm:$0xff]   ;;  %v4446_v27 = vld [vmem:[#allocation4 + $0x164] ss:$16 sps:$4 sm:$0xff]  }
  0x95   :  { %1064 = vmatpush1.bf16.msra.mxu1 %v4406_v35  ;;  %v5533_v6 = vld [vmem:[#allocation4 + $0xcc] ss:$16 sps:$4 sm:$0xff]   ;;  %v5542_v9 = vld [vmem:[#allocation4 + $0xc8] ss:$16 sps:$4 sm:$0xff]   ;;  %v4448_v28 = vld [vmem:[#allocation4 + $0x160] ss:$16 sps:$4 sm:$0xff]  }
  0x96   :  { %417 = vmatpush1.bf16.msra.mxu0 %v4332_v14  ;;  %1065 = vmatprep.subr.bf16.mxu1 %v4410_v36  ;;  %v5545_v10 = vld [vmem:[#allocation4 + $0xec] ss:$16 sps:$4 sm:$0xff]   ;;  %v5548_v11 = vld [vmem:[#allocation4 + $0xe8] ss:$16 sps:$4 sm:$0xff]   ;;  %v4452_v31 = vld [vmem:[#allocation4 + $0x184] ss:$16 sps:$4 sm:$0xff]  }
  0x97   :  { %418 = vmatprep.subr.bf16.mxu0 %v4333_v15  ;;  %v5551_v12 = vld [vmem:[#allocation4 + $0x10c] ss:$16 sps:$4 sm:$0xff]   ;;  %v4374_v13 = vld [vmem:[%s8423_s0 + $0x40] ss:$8 sps:$4 sm:$0xff]   ;;  %v4458_v35 = vld [vmem:[#allocation4 + $0x1a4] ss:$16 sps:$4 sm:$0xff]  }
  0x98   :  { %v4375_v14 = vld [vmem:[%s8423_s0 + $0x54] ss:$8 sps:$4 sm:$0xff]   ;;  %v5560_v15 = vld [vmem:[#allocation4 + $0x108] ss:$16 sps:$4 sm:$0xff]   ;;  %v4454_v32 = vld [vmem:[#allocation4 + $0x180] ss:$16 sps:$4 sm:$0xff]  }
  0x99   :  { %1066 = vmatpush1.bf16.msra.mxu1 %v4412_v39  ;;  %v5572_v22 = vld [vmem:[#allocation4 + $0x128] ss:$16 sps:$4 sm:$0xff]   ;;  %v5576_v25 = vld [vmem:[#allocation4 + $0x14c] ss:$16 sps:$4 sm:$0xff]   ;;  %v4460_v36 = vld [vmem:[#allocation4 + $0x1a0] ss:$16 sps:$4 sm:$0xff]  }
  0x9a   :  { %419 = vmatpush1.bf16.msra.mxu0 %v4335_v16  ;;  %1067 = vmatprep.subr.bf16.mxu1 %v4416_v40  ;;  %v132_v16 = vld [vmem:[%s8423_s0 + $0x60] sm:$0xff]  ;;  %vm2313_vm0 = vcmask 523264   ;;  %s5342_s2 = smov 64   ;;  %vm2939_vm1 = vcmask 1048064  }
  0x9b   :  { %420 = vmatprep.subr.bf16.mxu0 %v4336_v17  ;;  %v4377_v17 = vld [vmem:[%s8423_s0 + $0x50] ss:$8 sps:$4 sm:$0xff]   ;;  %v4122_v18 = vcombine.high %v132_v16, %v132_v16  ;;  %v4121_v19 = vcombine.low %v132_v16, %v132_v16  ;;  %v4464_v39 = vld [vmem:[#allocation4 + $0x1c4] ss:$16 sps:$4 sm:$0xff]  }
  0x9c   :  { %v4466_v40 = vld [vmem:[#allocation4 + $0x1c0] ss:$16 sps:$4 sm:$0xff]  }
  0x9d   :  { %1068 = vmatpush1.bf16.msra.mxu1 %v4418_v44  ;;  %v4472_v44 = vld [vmem:[#allocation4 + $0x1e0] ss:$16 sps:$4 sm:$0xff]  }
  0x9e   :  { %421 = vmatpush1.bf16.msra.mxu0 %v4338_v20  ;;  %1069 = vmatprep.subr.bf16.mxu1 %v4422_v46  ;;  %v4436_v20 = vld [vmem:[#allocation4 + $0x120] ss:$16 sps:$4 sm:$0xff]   ;;  %v5608_v46 = vld [vmem:[#allocation4 + $0x1e8] ss:$16 sps:$4 sm:$0xff]  }
  0x9f   :  { %422 = vmatprep.subr.bf16.mxu0 %v4339_v21  ;;  %v5570_v21 = vld [vmem:[#allocation4 + $0x12c] ss:$16 sps:$4 sm:$0xff]   ;;  %8472 = vst [vmem:[#allocation17_spill] sm:$0xff] %v5608_v46 }
  0xa1   :  { %1070 = vmatpush1.bf16.msra.mxu1 %v4424_v47  ;;  %v5613_v47 = vld [vmem:[#allocation6 + $0x4] ss:$8 sps:$4 sm:$0xff]  }
  0xa2   :  { %423 = vmatpush1.bf16.msra.mxu0 %v4341_v24  ;;  %1071 = vmatprep.subr.bf16.mxu1 %v4428_v48  ;;  %v4442_v24 = vld [vmem:[#allocation4 + $0x140] ss:$16 sps:$4 sm:$0xff]   ;;  %8473 = vst [vmem:[#allocation18_spill] sm:$0xff] %v5613_v47  ;;  %v167_v48 = vlaneseq }
  0xa3   :  { %424 = vmatprep.subr.bf16.mxu0 %v4342_v26  ;;  %v5578_v26 = vld [vmem:[#allocation4 + $0x148] ss:$16 sps:$4 sm:$0xff]  }
  0xa5   :  { %1072 = vmatpush1.bf16.msra.mxu1 %v4430_v51 }
  0xa6   :  { %425 = vmatpush1.bf16.msra.mxu0 %v4344_v29  ;;  %1073 = vmatprep.subr.bf16.mxu1 %v4434_v53  ;;  %v5582_v29 = vld [vmem:[#allocation4 + $0x16c] ss:$16 sps:$4 sm:$0xff]  }
  0xa7   :  { %426 = vmatprep.subr.bf16.mxu0 %v4345_v30  ;;  %v5584_v30 = vld [vmem:[#allocation4 + $0x168] ss:$16 sps:$4 sm:$0xff]  }
  0xa9   :  { %1074 = vmatpush1.bf16.msra.mxu1 %v4436_v20 }
  0xaa   :  { %427 = vmatpush1.bf16.msra.mxu0 %v4347_v33  ;;  %1075 = vmatprep.subr.bf16.mxu1 %v4440_v23  ;;  %v5588_v33 = vld [vmem:[#allocation4 + $0x18c] ss:$16 sps:$4 sm:$0xff]  }
  0xab   :  { %428 = vmatprep.subr.bf16.mxu0 %v4348_v34  ;;  %v5590_v34 = vld [vmem:[#allocation4 + $0x188] ss:$16 sps:$4 sm:$0xff]  }
  0xad   :  { %1076 = vmatpush1.bf16.msra.mxu1 %v4442_v24 }
  0xae   :  { %429 = vmatpush1.bf16.msra.mxu0 %v4350_v37  ;;  %1077 = vmatprep.subr.bf16.mxu1 %v4446_v27  ;;  %v5594_v37 = vld [vmem:[#allocation4 + $0x1ac] ss:$16 sps:$4 sm:$0xff]  }
  0xaf   :  { %430 = vmatprep.subr.bf16.mxu0 %v4351_v38  ;;  %v5596_v38 = vld [vmem:[#allocation4 + $0x1a8] ss:$16 sps:$4 sm:$0xff]  }
  0xb1   :  { %1078 = vmatpush1.bf16.msra.mxu1 %v4448_v28 }
  0xb2   :  { %431 = vmatpush1.bf16.msra.mxu0 %v4353_v41  ;;  %1079 = vmatprep.subr.bf16.mxu1 %v4452_v31  ;;  %v5600_v41 = vld [vmem:[#allocation4 + $0x1cc] ss:$16 sps:$4 sm:$0xff]  }
  0xb3   :  { %432 = vmatprep.subr.bf16.mxu0 %v4354_v42  ;;  %v5602_v42 = vld [vmem:[#allocation4 + $0x1c8] ss:$16 sps:$4 sm:$0xff]  }
  0xb5   :  { %1080 = vmatpush1.bf16.msra.mxu1 %v4454_v32 }
  0xb6   :  { %433 = vmatpush1.bf16.msra.mxu0 %v4356_v43  ;;  %1081 = vmatprep.subr.bf16.mxu1 %v4458_v35  ;;  %v4470_v43 = vld [vmem:[#allocation4 + $0x1e4] ss:$16 sps:$4 sm:$0xff]  }
  0xb7   :  { %434 = vmatprep.subr.bf16.mxu0 %v4357_v45  ;;  %v5606_v45 = vld [vmem:[#allocation4 + $0x1ec] ss:$16 sps:$4 sm:$0xff]  }
  0xb9   :  { %1082 = vmatpush1.bf16.msra.mxu1 %v4460_v36 }
  0xba   :  { %435 = vmatpush1.bf16.msra.mxu0 %v4359_v49  ;;  %1083 = vmatprep.subr.bf16.mxu1 %v4464_v39  ;;  %v5616_v49 = vshrl.u32 %v167_v48, 7 }
  0xbb   :  { %1156 = vmatprep.subr.bf16.mxu0 %v5480_v50 }
  0xbc   :  { %8474 = vst [vmem:[#allocation19_spill] sm:$0xff] %v5616_v49  ;;  %v5619_v51 = vsub.s32 0, %v5616_v49  ;;  %v5622_v53 = vsub.s32 1, %v5616_v49 }
  0xbd   :  { %437 = vmatmul.mubr.bf16.vlgmr.msra.gmra.mrb[0].mxu0 %v4360_v52  ;;  %1084 = vmatpush1.bf16.msra.mxu1 %v4466_v40  ;;  %v165_v52 = vld [vmem:[#allocation7] sm:$0x3] }
  0xbe   :  { %446 = vmatprep.mubr.bf16.mxu0 %v4363_v54  ;;  %1157 = vmatpush1.bf16.msra.mxu0 %v5488_v55  ;;  %8475 = vst [vmem:[#allocation20_spill] sm:$0xff] %v5619_v51  ;;  %8476 = vst [vmem:[#allocation21_spill] sm:$0xff] %v5622_v53  ;;  %v5625_v54 = vrot.slane %v165_v52, %v5619_v51 }
  0xbf   :  { %1158 = vmatprep.subr.bf16.mxu0 %v5490_v56  ;;  %1085 = vmatprep.subr.bf16.mxu1 %v4470_v43 }
  0xc1   :  { %1086 = vmatpush1.bf16.msra.mxu1 %v4472_v44 }
  0xc2   :  { %1159 = vmatpush1.bf16.msra.mxu0 %v5493_v57  ;;  %4267 = vmatprep.subr.bf16.mxu1 %v5480_v50 }
  0xc3   :  { %1160 = vmatprep.subr.bf16.mxu0 %v5495_v58 }
  0xc5   :  { %447 = vmatmul.mubr.bf16.gmra.mrb[4].mxu0 %v4365_v59  ;;  %v5628_v59 = vrot.slane %v165_v52, %v5622_v53 }
  0xc6   :  { %456 = vmatprep.mubr.bf16.mxu0 %v4366_v60  ;;  %1161 = vmatpush1.bf16.msra.mxu0 %v5505_v61 }
  0xc7   :  { %1162 = vmatprep.subr.bf16.mxu0 %v5507_v62 }
  0xca   :  { %1163 = vmatpush1.bf16.msra.mxu0 %v5511_v63 }
  0xcb   :  { %1164 = vmatprep.subr.bf16.mxu0 %v5513_v0 }
  0xcd   :  { %457 = vmatmul.mubr.bf16.gmra.mrb[8].mxu0 %v4368_v1 }
  0xce   :  { %466 = vmatprep.mubr.bf16.mxu0 %v4369_v2  ;;  %1165 = vmatpush1.bf16.msra.mxu0 %v5524_v3 }
  0xcf   :  { %1166 = vmatprep.subr.bf16.mxu0 %v5527_v4 }
  0xd2   :  { %1167 = vmatpush1.bf16.msra.mxu0 %v5530_v5 }
  0xd3   :  { %1168 = vmatprep.subr.bf16.mxu0 %v5533_v6 }
  0xd5   :  { %467 = vmatmul.mubr.bf16.gmra.mrb[12].mxu0 %v4371_v7 }
  0xd6   :  { %476 = vmatprep.mubr.bf16.mxu0 %v4372_v8  ;;  %1169 = vmatpush1.bf16.msra.mxu0 %v5542_v9 }
  0xd7   :  { %1170 = vmatprep.subr.bf16.mxu0 %v5545_v10 }
  0xda   :  { %1171 = vmatpush1.bf16.msra.mxu0 %v5548_v11 }
  0xdb   :  { %1172 = vmatprep.subr.bf16.mxu0 %v5551_v12 }
  0xdd   :  { %477 = vmatmul.mubr.bf16.gmra.mrb[16].mxu0 %v4374_v13 }
  0xde   :  { %486 = vmatprep.mubr.bf16.mxu0 %v4375_v14  ;;  %1173 = vmatpush1.bf16.msra.mxu0 %v5560_v15 }
  0xdf   :  { %1174 = vmatprep.subr.bf16.mxu0 %v5570_v21 }
  0xe2   :  { %1175 = vmatpush1.bf16.msra.mxu0 %v5572_v22 }
  0xe3   :  { %1176 = vmatprep.subr.bf16.mxu0 %v5576_v25 }
  0xe5   :  { %487 = vmatmul.mubr.bf16.gmra.mrb[20].mxu0 %v4377_v17 }
  0xe6   :  { %496 = vmatprep.mubr.bf16.mxu0 %v4122_v18  ;;  %1177 = vmatpush1.bf16.msra.mxu0 %v5578_v26 }
  0xe7   :  { %1178 = vmatprep.subr.bf16.mxu0 %v5582_v29 }
  0xea   :  { %1179 = vmatpush1.bf16.msra.mxu0 %v5584_v30 }
  0xeb   :  { %1180 = vmatprep.subr.bf16.mxu0 %v5588_v33 }
  0xed   :  { %497 = vmatmul.mubr.bf16.gmra.mrb[24].mxu0 %v4121_v19 }
  0xee   :  { %1181 = vmatpush1.bf16.msra.mxu0 %v5590_v34 }
  0xef   :  { %1182 = vmatprep.subr.bf16.mxu0 %v5594_v37 }
  0xf2   :  { %1183 = vmatpush1.bf16.msra.mxu0 %v5596_v38 }
  0xf3   :  { %1184 = vmatprep.subr.bf16.mxu0 %v5600_v41 }
  0xf6   :  { %1185 = vmatpush1.bf16.msra.mxu0 %v5602_v42 }
  0xf7   :  { %1186 = vmatprep.subr.bf16.mxu0 %v5606_v45 }
  0xfa   :  { %1187 = vmatpush1.bf16.msra.mxu0 %v5608_v46 }
  0xfb   :  { %2346 = vmatprep.subr.bf16.mxu0 %v5613_v47 }
 0x190   :  { %v438_v50 = vpop.f32.mrb[0].mxu0 }
 0x191   :  { %v439_v60 = vadd.f32 %v438_v50, %v5625_v54  ;;  %v440_v1 = vpop.f32.mrb[1].mxu0 }
 0x192   :  { %v441_v2 = vadd.f32 %v440_v1, %v5628_v59  ;;  %v442_v7 = vpop.f32.mrb[2].mxu0 }
 0x193   :  { %v505_v8 = vmul.f32 0.5, %v439_v60  ;;  %v443_v13 = vadd.f32 %v442_v7, %v5625_v54  ;;  %v444_v14 = vpop.f32.mrb[3].mxu0 }
 0x194   :  { %v506_v16 = vmul.f32 0.5, %v441_v2  ;;  %v445_v17 = vadd.f32 %v444_v14, %v5628_v59 }
 0x195   :  { %4548 = vtanh.f32 %v505_v8  ;;  %v507_v18 = vmul.f32 0.5, %v443_v13 }
 0x196   :  { %4550 = vtanh.f32 %v506_v16  ;;  %v508_v19 = vmul.f32 0.5, %v445_v17 }
 0x197   :  { %4552 = vtanh.f32 %v507_v18 }
 0x198   :  { %4554 = vtanh.f32 %v508_v19  ;;  %v448_v20 = vpop.f32.mrb[4].mxu0 }
 0x199   :  { %v5635_v23 = vadd.f32 %v448_v20, %v5625_v54  ;;  %v450_v24 = vpop.f32.mrb[5].mxu0 }
 0x19a   :  { %v5638_v27 = vadd.f32 %v450_v24, %v5628_v59  ;;  %v452_v28 = vpop.f32.mrb[6].mxu0 }
 0x19b   :  { %v509_v31 = vmul.f32 0.5, %v5635_v23  ;;  %v5642_v32 = vadd.f32 %v452_v28, %v5625_v54  ;;  %v454_v35 = vpop.f32.mrb[7].mxu0 }
 0x19c   :  { %v510_v36 = vmul.f32 0.5, %v5638_v27  ;;  %v5646_v39 = vadd.f32 %v454_v35, %v5628_v59 }
 0x19d   :  { %4556 = vtanh.f32 %v509_v31  ;;  %v511_v40 = vmul.f32 0.5, %v5642_v32 }
 0x19e   :  { %4558 = vtanh.f32 %v510_v36  ;;  %v512_v43 = vmul.f32 0.5, %v5646_v39 }
 0x19f   :  { %v4549_v44 = vpop.eup %4548  ;;  %4560 = vtanh.f32 %v511_v40 }
 0x1a0   :  { %v4551_v48 = vpop.eup %4550  ;;  %v557_v52 = vmul.f32 0.5, %v4549_v44  ;;  %4562 = vtanh.f32 %v512_v43  ;;  %v458_v50 = vpop.f32.mrb[8].mxu0 }
 0x1a1   :  { %v4553_v1 = vpop.eup %4552  ;;  %v558_v7 = vmul.f32 0.5, %v4551_v48  ;;  %v5651_v8 = vadd.f32 %v458_v50, %v5625_v54  ;;  %v460_v14 = vpop.f32.mrb[9].mxu0 }
 0x1a2   :  { %v4555_v16 = vpop.eup %4554  ;;  %v583_v18 = vadd.f32 0.5, %v557_v52  ;;  %v559_v19 = vmul.f32 0.5, %v4553_v1  ;;  %v5654_v20 = vadd.f32 %v460_v14, %v5628_v59  ;;  %v462_v24 = vpop.f32.mrb[10].mxu0 }
 0x1a3   :  { %v584_v28 = vadd.f32 0.5, %v558_v7  ;;  %v560_v31 = vmul.f32 0.5, %v4555_v16  ;;  %v513_v35 = vmul.f32 0.5, %v5651_v8  ;;  %v5658_v36 = vadd.f32 %v462_v24, %v5625_v54  ;;  %v464_v40 = vpop.f32.mrb[11].mxu0 }
 0x1a4   :  { %v585_v43 = vadd.f32 0.5, %v559_v19  ;;  %v514_v44 = vmul.f32 0.5, %v5654_v20  ;;  %v5662_v48 = vadd.f32 %v464_v40, %v5628_v59  ;;  %v609_v1 = vmul.f32 %v583_v18, %v439_v60 }
 0x1a5   :  { %v586_v52 = vadd.f32 0.5, %v560_v31  ;;  %4564 = vtanh.f32 %v513_v35  ;;  %v515_v50 = vmul.f32 0.5, %v5658_v36  ;;  %v610_v53 = vmul.f32 %v584_v28, %v441_v2  ;;  %v5674_v28 = vld [vmem:[#allocation6 + $0x14] ss:$8 sps:$4 sm:$0xff]  }
 0x1a6   :  { %v611_v14 = vmul.f32 %v585_v43, %v443_v13  ;;  %4566 = vtanh.f32 %v514_v44  ;;  %v516_v7 = vmul.f32 0.5, %v5662_v48  ;;  %v5669_v13 = vld [vmem:[#allocation6] ss:$8 sps:$4 sm:$0xff]  }
 0x1a7   :  { %v4557_v16 = vpop.eup %4556  ;;  %v612_v24 = vmul.f32 %v586_v52, %v445_v17  ;;  %4568 = vtanh.f32 %v515_v50 }
 0x1a8   :  { %v4559_v51 = vpop.eup %4558  ;;  %v561_v19 = vmul.f32 0.5, %v4557_v16  ;;  %4570 = vtanh.f32 %v516_v7  ;;  %v468_v49 = vpop.f32.mrb[12].mxu0  ;;  %v700_v47 = vpack.c.bf16 %v611_v14, %v609_v1 }
 0x1a9   :  { %v4561_v40 = vpop.eup %4560  ;;  %v562_v46 = vmul.f32 0.5, %v4559_v51  ;;  %v5667_v31 = vadd.f32 %v468_v49, %v5625_v54  ;;  %v470_v35 = vpop.f32.mrb[13].mxu0  ;;  %v701_v60 = vpack.c.bf16 %v612_v24, %v610_v53  ;;  %v5687_v24 = vld [vmem:[#allocation6 + $0x10] ss:$8 sps:$4 sm:$0xff]  }
 0x1aa   :  { %v4563_v18 = vpop.eup %4562  ;;  %v587_v43 = vadd.f32 0.5, %v561_v19  ;;  %v563_v44 = vmul.f32 0.5, %v4561_v40  ;;  %v5672_v2 = vadd.f32 %v470_v35, %v5628_v59  ;;  %v472_v17 = vpop.f32.mrb[14].mxu0 }
 0x1ab   :  { %v588_v52 = vadd.f32 0.5, %v562_v46  ;;  %v564_v50 = vmul.f32 0.5, %v4563_v18  ;;  %v517_v51 = vmul.f32 0.5, %v5667_v31  ;;  %v5678_v49 = vadd.f32 %v472_v17, %v5625_v54  ;;  %v474_v1 = vpop.f32.mrb[15].mxu0  ;;  %1087 = vmatprep.mubr.bf16.mxu1 %v701_v60  ;;  %1188 = vmatprep.mubr.bf16.mxu0 %v701_v60 }
 0x1ac   :  { %v589_v53 = vadd.f32 0.5, %v563_v44  ;;  %v518_v14 = vmul.f32 0.5, %v5672_v2  ;;  %v5682_v7 = vadd.f32 %v474_v1, %v5628_v59  ;;  %1088 = vmatmul.mubr.bf16.vlgmr.msra.gmra.mrb[0].mxu1 %v700_v47  ;;  %1189 = vmatmul.mubr.bf16.vlgmr.msra.gmra.mrb[28].mxu0 %v700_v47  ;;  %v613_v19 = vmul.f32 %v587_v43, %v5635_v23 }
 0x1ad   :  { %v590_v16 = vadd.f32 0.5, %v564_v50  ;;  %4572 = vtanh.f32 %v517_v51  ;;  %v519_v46 = vmul.f32 0.5, %v5678_v49  ;;  %4283 = vmatpush1.bf16.msra.mxu1 %v5488_v55  ;;  %2347 = vmatpush1.bf16.msra.mxu0 %v5669_v13  ;;  %v614_v60 = vmul.f32 %v588_v52, %v5638_v27 }
 0x1ae   :  { %v615_v40 = vmul.f32 %v589_v53, %v5642_v32  ;;  %4574 = vtanh.f32 %v518_v14  ;;  %v520_v35 = vmul.f32 0.5, %v5682_v7  ;;  %4268 = vmatprep.subr.bf16.mxu1 %v5490_v56  ;;  %2348 = vmatprep.subr.bf16.mxu0 %v5674_v28 }
 0x1af   :  { %v4565_v47 = vpop.eup %4564  ;;  %v616_v55 = vmul.f32 %v590_v16, %v5646_v39  ;;  %4576 = vtanh.f32 %v519_v46 }
 0x1b0   :  { %v4567_v18 = vpop.eup %4566  ;;  %v565_v44 = vmul.f32 0.5, %v4565_v47  ;;  %4578 = vtanh.f32 %v520_v35  ;;  %v478_v17 = vpop.f32.mrb[16].mxu0  ;;  %v702_v23 = vpack.c.bf16 %v615_v40, %v613_v19 }
 0x1b1   :  { %v4569_v43 = vpop.eup %4568  ;;  %v566_v32 = vmul.f32 0.5, %v4567_v18  ;;  %v5697_v50 = vadd.f32 %v478_v17, %v5625_v54  ;;  %4284 = vmatpush1.bf16.msra.mxu1 %v5493_v57  ;;  %v480_v56 = vpop.f32.mrb[17].mxu0  ;;  %v703_v51 = vpack.c.bf16 %v616_v55, %v614_v60  ;;  %2349 = vmatpush1.bf16.msra.mxu0 %v5687_v24 }
 0x1b2   :  { %v4571_v27 = vpop.eup %4570  ;;  %v591_v52 = vadd.f32 0.5, %v565_v44  ;;  %v567_v39 = vmul.f32 0.5, %v4569_v43  ;;  %v5702_v1 = vadd.f32 %v480_v56, %v5628_v59  ;;  %v482_v53 = vpop.f32.mrb[18].mxu0  ;;  %4269 = vmatprep.subr.bf16.mxu1 %v5495_v58 }
 0x1b3   :  { %v592_v14 = vadd.f32 0.5, %v566_v32  ;;  %v568_v16 = vmul.f32 0.5, %v4571_v27  ;;  %v521_v46 = vmul.f32 0.5, %v5697_v50  ;;  %v5707_v19 = vadd.f32 %v482_v53, %v5625_v54  ;;  %v484_v57 = vpop.f32.mrb[19].mxu0  ;;  %1097 = vmatprep.mubr.bf16.mxu1 %v703_v51  ;;  %1198 = vmatprep.mubr.bf16.mxu0 %v703_v51 }
 0x1b4   :  { %v593_v40 = vadd.f32 0.5, %v567_v39  ;;  %v522_v35 = vmul.f32 0.5, %v5702_v1  ;;  %v5711_v47 = vadd.f32 %v484_v57, %v5628_v59  ;;  %1098 = vmatmul.mubr.bf16.gmra.mrb[4].mxu1 %v702_v23  ;;  %1199 = vmatmul.mubr.bf16.gmra.mrb[32].mxu0 %v702_v23  ;;  %v617_v55 = vmul.f32 %v591_v52, %v5651_v8 }
 0x1b5   :  { %v594_v60 = vadd.f32 0.5, %v568_v16  ;;  %4580 = vtanh.f32 %v521_v46  ;;  %v523_v58 = vmul.f32 0.5, %v5707_v19  ;;  %4285 = vmatpush1.bf16.msra.mxu1 %v5505_v61  ;;  %v618_v43 = vmul.f32 %v592_v14, %v5654_v20 }
 0x1b6   :  { %v619_v18 = vmul.f32 %v593_v40, %v5658_v36  ;;  %4582 = vtanh.f32 %v522_v35  ;;  %v524_v44 = vmul.f32 0.5, %v5711_v47  ;;  %4270 = vmatprep.subr.bf16.mxu1 %v5507_v62 }
 0x1b7   :  { %v4573_v17 = vpop.eup %4572  ;;  %v620_v23 = vmul.f32 %v594_v60, %v5662_v48  ;;  %4584 = vtanh.f32 %v523_v58 }
 0x1b8   :  { %v4575_v32 = vpop.eup %4574  ;;  %v569_v56 = vmul.f32 0.5, %v4573_v17  ;;  %4586 = vtanh.f32 %v524_v44  ;;  %v488_v51 = vpop.f32.mrb[20].mxu0  ;;  %v704_v61 = vpack.c.bf16 %v619_v18, %v617_v55 }
 0x1b9   :  { %v4577_v27 = vpop.eup %4576  ;;  %v570_v8 = vmul.f32 0.5, %v4575_v32  ;;  %v5722_v36 = vadd.f32 %v488_v51, %v5625_v54  ;;  %4286 = vmatpush1.bf16.msra.mxu1 %v5511_v63  ;;  %v490_v52 = vpop.f32.mrb[21].mxu0  ;;  %v705_v62 = vpack.c.bf16 %v620_v23, %v618_v43 }
 0x1ba   :  { %v4579_v39 = vpop.eup %4578  ;;  %v595_v53 = vadd.f32 0.5, %v569_v56  ;;  %v571_v20 = vmul.f32 0.5, %v4577_v27  ;;  %v5726_v48 = vadd.f32 %v490_v52, %v5628_v59  ;;  %v492_v14 = vpop.f32.mrb[22].mxu0  ;;  %4271 = vmatprep.subr.bf16.mxu1 %v5513_v0 }
 0x1bb   :  { %v596_v16 = vadd.f32 0.5, %v570_v8  ;;  %v572_v46 = vmul.f32 0.5, %v4579_v39  ;;  %v525_v57 = vmul.f32 0.5, %v5722_v36  ;;  %v5731_v40 = vadd.f32 %v492_v14, %v5625_v54  ;;  %v494_v35 = vpop.f32.mrb[23].mxu0  ;;  %1107 = vmatprep.mubr.bf16.mxu1 %v705_v62  ;;  %1208 = vmatprep.mubr.bf16.mxu0 %v705_v62 }
 0x1bc   :  { %v597_v63 = vadd.f32 0.5, %v571_v20  ;;  %v526_v60 = vmul.f32 0.5, %v5726_v48  ;;  %v5735_v58 = vadd.f32 %v494_v35, %v5628_v59  ;;  %1108 = vmatmul.mubr.bf16.gmra.mrb[8].mxu1 %v704_v61  ;;  %1209 = vmatmul.mubr.bf16.gmra.mrb[36].mxu0 %v704_v61  ;;  %v621_v18 = vmul.f32 %v595_v53, %v5667_v31 }
 0x1bd   :  { %v598_v55 = vadd.f32 0.5, %v572_v46  ;;  %4588 = vtanh.f32 %v525_v57  ;;  %v527_v0 = vmul.f32 0.5, %v5731_v40  ;;  %4287 = vmatpush1.bf16.msra.mxu1 %v5524_v3  ;;  %v622_v23 = vmul.f32 %v596_v16, %v5672_v2 }
 0x1be   :  { %v623_v44 = vmul.f32 %v597_v63, %v5678_v49  ;;  %4590 = vtanh.f32 %v526_v60  ;;  %v528_v17 = vmul.f32 0.5, %v5735_v58  ;;  %4272 = vmatprep.subr.bf16.mxu1 %v5527_v4 }
 0x1bf   :  { %v4581_v43 = vpop.eup %4580  ;;  %v624_v32 = vmul.f32 %v598_v55, %v5682_v7  ;;  %4592 = vtanh.f32 %v527_v0 }
 0x1c0   :  { %v4583_v56 = vpop.eup %4582  ;;  %v573_v51 = vmul.f32 0.5, %v4581_v43  ;;  %4594 = vtanh.f32 %v528_v17  ;;  %v498_v61 = vpop.f32.mrb[24].mxu0  ;;  %v706_v3 = vpack.c.bf16 %v623_v44, %v621_v18 }
 0x1c1   :  { %v4585_v27 = vpop.eup %4584  ;;  %v574_v31 = vmul.f32 0.5, %v4583_v56  ;;  %v5746_v49 = vadd.f32 %v498_v61, %v5625_v54  ;;  %4288 = vmatpush1.bf16.msra.mxu1 %v5530_v5  ;;  %v500_v8 = vpop.f32.mrb[25].mxu0  ;;  %v707_v4 = vpack.c.bf16 %v624_v32, %v622_v23 }
 0x1c2   :  { %v4587_v52 = vpop.eup %4586  ;;  %v599_v62 = vadd.f32 0.5, %v573_v51  ;;  %v575_v2 = vmul.f32 0.5, %v4585_v27  ;;  %v501_v7 = vadd.f32 %v500_v8, %v5628_v59  ;;  %4273 = vmatprep.subr.bf16.mxu1 %v5533_v6  ;;  %v502_v39 = vpop.f32.mrb[26].mxu0 }
 0x1c3   :  { %v600_v53 = vadd.f32 0.5, %v574_v31  ;;  %v576_v20 = vmul.f32 0.5, %v4587_v52  ;;  %v529_v14 = vmul.f32 0.5, %v5746_v49  ;;  %1117 = vmatprep.mubr.bf16.mxu1 %v707_v4  ;;  %1218 = vmatprep.mubr.bf16.mxu0 %v707_v4  ;;  %v503_v54 = vpop.f32.mrb[27].mxu0  ;;  %v699_v52 = vld [vmem:[#allocation9] sm:$0xf] }
 0x1c4   :  { %v601_v16 = vadd.f32 0.5, %v575_v2  ;;  %v530_v46 = vmul.f32 0.5, %v501_v7  ;;  %1118 = vmatmul.mubr.bf16.gmra.mrb[12].mxu1 %v706_v3  ;;  %1219 = vmatmul.mubr.bf16.gmra.mrb[40].mxu0 %v706_v3  ;;  %v625_v59 = vmul.f32 %v599_v62, %v5697_v50  ;;  %v8480_v2 = vld [vmem:[#allocation20_spill] sm:$0xff] }
 0x1c5   :  { %v602_v5 = vadd.f32 0.5, %v576_v20  ;;  %4596 = vtanh.f32 %v529_v14  ;;  %4289 = vmatpush1.bf16.msra.mxu1 %v5542_v9  ;;  %v626_v35 = vmul.f32 %v600_v53, %v5702_v1  ;;  %v8482_v53 = vld [vmem:[#allocation21_spill] sm:$0xff] }
 0x1c6   :  { %v627_v6 = vmul.f32 %v601_v16, %v5707_v19  ;;  %4598 = vtanh.f32 %v530_v46  ;;  %4274 = vmatprep.subr.bf16.mxu1 %v5545_v10  ;;  %v5797_v20 = vrot.slane %v699_v52, %v8482_v53 }
 0x1c7   :  { %v4589_v57 = vpop.eup %4588  ;;  %v628_v63 = vmul.f32 %v602_v5, %v5711_v47 }
 0x1c8   :  { %v4591_v60 = vpop.eup %4590  ;;  %v577_v55 = vmul.f32 0.5, %v4589_v57  ;;  %v708_v0 = vpack.c.bf16 %v627_v6, %v625_v59 }
 0x1c9   :  { %v4593_v18 = vpop.eup %4592  ;;  %v578_v44 = vmul.f32 0.5, %v4591_v60  ;;  %4290 = vmatpush1.bf16.msra.mxu1 %v5548_v11  ;;  %v709_v9 = vpack.c.bf16 %v628_v63, %v626_v35 }
 0x1ca   :  { %v4595_v17 = vpop.eup %4594  ;;  %v603_v50 = vadd.f32 0.5, %v577_v55  ;;  %v579_v43 = vmul.f32 0.5, %v4593_v18  ;;  %4275 = vmatprep.subr.bf16.mxu1 %v5551_v12 }
 0x1cb   :  { %v604_v19 = vadd.f32 0.5, %v578_v44  ;;  %v580_v10 = vmul.f32 0.5, %v4595_v17  ;;  %1127 = vmatprep.mubr.bf16.mxu1 %v709_v9 }
 0x1cc   :  { %v605_v23 = vadd.f32 0.5, %v579_v43  ;;  %1128 = vmatmul.mubr.bf16.gmra.mrb[16].mxu1 %v708_v0  ;;  %v629_v47 = vmul.f32 %v603_v50, %v5722_v36 }
 0x1cd   :  { %v606_v1 = vadd.f32 0.5, %v580_v10  ;;  %4291 = vmatpush1.bf16.msra.mxu1 %v5560_v15  ;;  %v630_v56 = vmul.f32 %v604_v19, %v5726_v48 }
 0x1ce   :  { %v631_v32 = vmul.f32 %v605_v23, %v5731_v40  ;;  %4276 = vmatprep.subr.bf16.mxu1 %v5570_v21 }
 0x1cf   :  { %v4597_v11 = vpop.eup %4596  ;;  %v632_v51 = vmul.f32 %v606_v1, %v5735_v58  ;;  %v4500_v58 = vld [vmem:[%s8427_s4 + $0x4] ss:$8 sps:$4 sm:$0xff]  }
 0x1d0   :  { %v4599_v12 = vpop.eup %4598  ;;  %v581_v61 = vmul.f32 0.5, %v4597_v11  ;;  %v710_v3 = vpack.c.bf16 %v631_v32, %v629_v47 }
 0x1d1   :  { %v582_v27 = vmul.f32 0.5, %v4599_v12  ;;  %4292 = vmatpush1.bf16.msra.mxu1 %v5572_v22  ;;  %v711_v31 = vpack.c.bf16 %v632_v51, %v630_v56  ;;  %v8477_v22 = vld [vmem:[#allocation17_spill] sm:$0xff] }
 0x1d2   :  { %v607_v8 = vadd.f32 0.5, %v581_v61  ;;  %4277 = vmatprep.subr.bf16.mxu1 %v5576_v25  ;;  %v8478_v25 = vld [vmem:[#allocation18_spill] sm:$0xff] }
 0x1d3   :  { %v608_v15 = vadd.f32 0.5, %v582_v27  ;;  %1137 = vmatprep.mubr.bf16.mxu1 %v711_v31 }
 0x1d4   :  { %1138 = vmatmul.mubr.bf16.gmra.mrb[20].mxu1 %v710_v3  ;;  %v633_v21 = vmul.f32 %v607_v8, %v5746_v49  ;;  %v8479_v49 = vld [vmem:[#allocation19_spill] sm:$0xff] }
 0x1d5   :  { %v634_v36 = vmul.f32 %v608_v15, %v501_v7  ;;  %4293 = vmatpush1.bf16.msra.mxu1 %v5578_v26  ;;  %v4482_v26 = vld [vmem:[#allocation6 + $0x24] ss:$8 sps:$4 sm:$0xff]   ;;  %v725_v4 = vsub.s32 2, %v8479_v49  ;;  %v729_v62 = vsub.s32 3, %v8479_v49  ;;  %v5792_v7 = vrot.slane %v699_v52, %v8480_v2 }
 0x1d6   :  { %4278 = vmatprep.subr.bf16.mxu1 %v5582_v29  ;;  %v712_v40 = vpack.c.bf16 %v633_v21, %v633_v21  ;;  %2350 = vmatprep.subr.bf16.mxu0 %v4482_v26  ;;  %v4484_v29 = vld [vmem:[#allocation6 + $0x20] ss:$8 sps:$4 sm:$0xff]  }
 0x1d7   :  { %v713_v48 = vpack.c.bf16 %v634_v36, %v634_v36  ;;  %2351 = vmatpush1.bf16.msra.mxu0 %v4484_v29  ;;  %v5794_v39 = vrot.slane %v699_v52, %v725_v4  ;;  %v5799_v14 = vrot.slane %v699_v52, %v729_v62 }
 0x1d9   :  { %4294 = vmatpush1.bf16.msra.mxu1 %v5584_v30  ;;  %1147 = vmatprep.mubr.bf16.mxu1 %v713_v48  ;;  %v4485_v30 = vld [vmem:[#allocation6 + $0x34] ss:$8 sps:$4 sm:$0xff]   ;;  %8481 = vst [vmem:[#allocation17_spill] sm:$0xff] %v5794_v39  ;;  %8483 = vst [vmem:[#allocation18_spill] sm:$0xff] %v5799_v14 }
 0x1da   :  { %4279 = vmatprep.subr.bf16.mxu1 %v5588_v33  ;;  %v4487_v33 = vld [vmem:[#allocation6 + $0x30] ss:$8 sps:$4 sm:$0xff]   ;;  %2352 = vmatprep.subr.bf16.mxu0 %v4485_v30 }
 0x1db   :  { %2353 = vmatpush1.bf16.msra.mxu0 %v4487_v33 }
 0x1dc   :  { %1148 = vmatmul.mubr.bf16.gmra.mrb[24].mxu1 %v712_v40 }
 0x1dd   :  { %4295 = vmatpush1.bf16.msra.mxu1 %v5590_v34  ;;  %1228 = vmatprep.mubr.bf16.mxu1 %v709_v9  ;;  %v4488_v34 = vld [vmem:[#allocation6 + $0x44] ss:$8 sps:$4 sm:$0xff]  }
 0x1de   :  { %4280 = vmatprep.subr.bf16.mxu1 %v5594_v37  ;;  %v4490_v37 = vld [vmem:[#allocation6 + $0x40] ss:$8 sps:$4 sm:$0xff]   ;;  %2354 = vmatprep.subr.bf16.mxu0 %v4488_v34 }
 0x1df   :  { %2355 = vmatpush1.bf16.msra.mxu0 %v4490_v37 }
 0x1e1   :  { %4296 = vmatpush1.bf16.msra.mxu1 %v5596_v38  ;;  %v4491_v38 = vld [vmem:[#allocation6 + $0x54] ss:$8 sps:$4 sm:$0xff]  }
 0x1e2   :  { %4281 = vmatprep.subr.bf16.mxu1 %v5600_v41  ;;  %v4493_v41 = vld [vmem:[#allocation6 + $0x50] ss:$8 sps:$4 sm:$0xff]   ;;  %2356 = vmatprep.subr.bf16.mxu0 %v4491_v38 }
 0x1e3   :  { %2357 = vmatpush1.bf16.msra.mxu0 %v4493_v41 }
 0x1e5   :  { %4297 = vmatpush1.bf16.msra.mxu1 %v5602_v42  ;;  %v4494_v42 = vld [vmem:[#allocation6 + $0x64] ss:$8 sps:$4 sm:$0xff]  }
 0x1e6   :  { %4282 = vmatprep.subr.bf16.mxu1 %v5606_v45  ;;  %2358 = vmatprep.subr.bf16.mxu0 %v4494_v42  ;;  %v4496_v45 = vld [vmem:[#allocation6 + $0x60] ss:$8 sps:$4 sm:$0xff]  }
 0x1e7   :  { %2359 = vmatpush1.bf16.msra.mxu0 %v4496_v45 }
 0x1e9   :  { %4298 = vmatpush1.bf16.msra.mxu1 %v8477_v22 }
 0x1ea   :  { %1665 = vmatprep.subr.bf16.mxu1 %v8478_v25 }
 0x1ec   :  { %1229 = vmatmul.mubr.bf16.vlgmr.msra.gmra.mrb[28].mxu1 %v708_v0 }
 0x1ed   :  { %1238 = vmatprep.mubr.bf16.mxu1 %v711_v31  ;;  %1666 = vmatpush1.bf16.msra.mxu1 %v5669_v13  ;;  %v4497_v13 = vld [vmem:[#allocation6 + $0x74] ss:$8 sps:$4 sm:$0xff]  }
 0x1ee   :  { %1667 = vmatprep.subr.bf16.mxu1 %v5674_v28  ;;  %v4499_v28 = vld [vmem:[#allocation6 + $0x70] ss:$8 sps:$4 sm:$0xff]   ;;  %2360 = vmatprep.subr.bf16.mxu0 %v4497_v13 }
 0x1ef   :  { %2361 = vmatpush1.bf16.msra.mxu0 %v4499_v28 }
 0x1f0   :  { %2591 = vmatprep.subr.bf16.mxu0 %v4500_v58 }
 0x1f1   :  { %1668 = vmatpush1.bf16.msra.mxu1 %v5687_v24  ;;  %v8441_v24 = vmov 0  }
 0x1f2   :  { %1669 = vmatprep.subr.bf16.mxu1 %v4482_v26  ;;  %2378 = vmatprep.mubr.bf16.mxu0 %v8441_v24 }
 0x1f4   :  { %1239 = vmatmul.mubr.bf16.gmra.mrb[32].mxu1 %v710_v3 }
 0x1f5   :  { %1248 = vmatprep.mubr.bf16.mxu1 %v713_v48  ;;  %1670 = vmatpush1.bf16.msra.mxu1 %v4484_v29 }
 0x1f6   :  { %1671 = vmatprep.subr.bf16.mxu1 %v4485_v30 }
 0x1f9   :  { %1672 = vmatpush1.bf16.msra.mxu1 %v4487_v33 }
 0x1fa   :  { %1673 = vmatprep.subr.bf16.mxu1 %v4488_v34 }
 0x1fc   :  { %1249 = vmatmul.mubr.bf16.gmra.mrb[36].mxu1 %v712_v40 }
 0x1fd   :  { %1674 = vmatpush1.bf16.msra.mxu1 %v4490_v37  ;;  %1697 = vmatprep.mubr.bf16.mxu1 %v8441_v24 }
 0x1fe   :  { %1675 = vmatprep.subr.bf16.mxu1 %v4491_v38 }
 0x201   :  { %1676 = vmatpush1.bf16.msra.mxu1 %v4493_v41 }
 0x202   :  { %1677 = vmatprep.subr.bf16.mxu1 %v4494_v42 }
 0x205   :  { %1678 = vmatpush1.bf16.msra.mxu1 %v4496_v45 }
 0x206   :  { %1679 = vmatprep.subr.bf16.mxu1 %v4497_v13 }
 0x209   :  { %1680 = vmatpush1.bf16.msra.mxu1 %v4499_v28 }
 0x20a   :  { %2081 = vmatprep.subr.bf16.mxu1 %v4500_v58 }
 0x27f   :  { %v1089_v54 = vpop.f32.mrb[0].mxu1  ;;  %v1190_v16 = vpop.f32.mrb[28].mxu0 }
 0x280   :  { %v5802_v46 = vadd.f32 %v1089_v54, %v5792_v7  ;;  %v5805_v5 = vadd.f32 %v1190_v16, %v5794_v39  ;;  %v1091_v59 = vpop.f32.mrb[1].mxu1  ;;  %v1192_v6 = vpop.f32.mrb[29].mxu0 }
 0x281   :  { %v5808_v57 = vadd.f32 %v1091_v59, %v5797_v20  ;;  %v5811_v35 = vadd.f32 %v1192_v6, %v5799_v14  ;;  %v1093_v63 = vpop.f32.mrb[2].mxu1  ;;  %v1194_v60 = vpop.f32.mrb[30].mxu0 }
 0x282   :  { %v1257_v55 = vmul.f32 0.5, %v5802_v46  ;;  %v1259_v0 = vmul.f32 0.5, %v5805_v5  ;;  %v5816_v18 = vadd.f32 %v1093_v63, %v5792_v7  ;;  %v5819_v44 = vadd.f32 %v1194_v60, %v5794_v39  ;;  %v1095_v9 = vpop.f32.mrb[3].mxu1  ;;  %v1196_v17 = vpop.f32.mrb[31].mxu0 }
 0x283   :  { %v1258_v50 = vmul.f32 0.5, %v5808_v57  ;;  %v1260_v43 = vmul.f32 0.5, %v5811_v35  ;;  %v5824_v19 = vadd.f32 %v1095_v9, %v5797_v20  ;;  %v5827_v10 = vadd.f32 %v1196_v17, %v5799_v14 }
 0x284   :  { %4600 = vtanh.f32 %v1257_v55  ;;  %v1261_v23 = vmul.f32 0.5, %v5816_v18  ;;  %v1263_v1 = vmul.f32 0.5, %v5819_v44 }
 0x285   :  { %4602 = vtanh.f32 %v1259_v0  ;;  %v1262_v47 = vmul.f32 0.5, %v5824_v19  ;;  %v1264_v32 = vmul.f32 0.5, %v5827_v10 }
 0x286   :  { %4604 = vtanh.f32 %v1258_v50 }
 0x287   :  { %4606 = vtanh.f32 %v1260_v43  ;;  %v1099_v11 = vpop.f32.mrb[4].mxu1  ;;  %v1200_v56 = vpop.f32.mrb[32].mxu0 }
 0x288   :  { %4608 = vtanh.f32 %v1261_v23  ;;  %v5834_v51 = vadd.f32 %v1099_v11, %v5792_v7  ;;  %v5837_v12 = vadd.f32 %v1200_v56, %v5794_v39  ;;  %v1101_v61 = vpop.f32.mrb[5].mxu1  ;;  %v1202_v3 = vpop.f32.mrb[33].mxu0 }
 0x289   :  { %4610 = vtanh.f32 %v1263_v1  ;;  %v5840_v27 = vadd.f32 %v1101_v61, %v5797_v20  ;;  %v5843_v31 = vadd.f32 %v1202_v3, %v5799_v14  ;;  %v1103_v8 = vpop.f32.mrb[6].mxu1  ;;  %v1204_v15 = vpop.f32.mrb[34].mxu0 }
 0x28a   :  { %4612 = vtanh.f32 %v1262_v47  ;;  %v1265_v36 = vmul.f32 0.5, %v5834_v51  ;;  %v1267_v21 = vmul.f32 0.5, %v5837_v12  ;;  %v5848_v48 = vadd.f32 %v1103_v8, %v5792_v7  ;;  %v1105_v40 = vpop.f32.mrb[7].mxu1  ;;  %v1206_v22 = vpop.f32.mrb[35].mxu0 }
 0x28b   :  { %4614 = vtanh.f32 %v1264_v32  ;;  %v1266_v25 = vmul.f32 0.5, %v5840_v27  ;;  %v1268_v26 = vmul.f32 0.5, %v5843_v31  ;;  %v5853_v29 = vadd.f32 %v1204_v15, %v5794_v39 }
 0x28c   :  { %4616 = vtanh.f32 %v1265_v36  ;;  %v1269_v30 = vmul.f32 0.5, %v5848_v48  ;;  %v5857_v33 = vadd.f32 %v1105_v40, %v5797_v20  ;;  %v5860_v34 = vadd.f32 %v1206_v22, %v5799_v14 }
 0x28d   :  { %4618 = vtanh.f32 %v1267_v21  ;;  %v1271_v37 = vmul.f32 0.5, %v5853_v29 }
 0x28e   :  { %v4601_v38 = vpop.eup %4600  ;;  %4620 = vtanh.f32 %v1266_v25  ;;  %v1270_v41 = vmul.f32 0.5, %v5857_v33  ;;  %v1272_v13 = vmul.f32 0.5, %v5860_v34 }
 0x28f   :  { %v4603_v42 = vpop.eup %4602  ;;  %v1361_v45 = vmul.f32 0.5, %v4601_v38  ;;  %4622 = vtanh.f32 %v1268_v26  ;;  %v1109_v28 = vpop.f32.mrb[8].mxu1 }
 0x290   :  { %v1210_v58 = vpop.f32.mrb[36].mxu0  ;;  %v4605_v49 = vpop.eup %4604  ;;  %v1363_v4 = vmul.f32 0.5, %v4603_v42  ;;  %4624 = vtanh.f32 %v1269_v30  ;;  %v5866_v52 = vadd.f32 %v1109_v28, %v5792_v7 }
 0x291   :  { %v5869_v62 = vadd.f32 %v1210_v58, %v5794_v39  ;;  %v1111_v54 = vpop.f32.mrb[9].mxu1  ;;  %v5871_v16 = vpop.f32.mrb[37].mxu0  ;;  %v1413_v6 = vadd.f32 0.5, %v1361_v45  ;;  %v1362_v63 = vmul.f32 0.5, %v4605_v49  ;;  %4626 = vtanh.f32 %v1271_v37 }
 0x292   :  { %v4607_v59 = vpop.eup %4606  ;;  %v5874_v60 = vadd.f32 %v1111_v54, %v5797_v20  ;;  %v5876_v55 = vpop.f32.mrb[10].mxu1  ;;  %v1415_v17 = vadd.f32 0.5, %v1363_v4  ;;  %4628 = vtanh.f32 %v1270_v41  ;;  %v1273_v43 = vmul.f32 0.5, %v5866_v52 }
 0x293   :  { %v5878_v0 = vpop.f32.mrb[38].mxu0  ;;  %v4609_v9 = vpop.eup %4608  ;;  %v1364_v50 = vmul.f32 0.5, %v4607_v59  ;;  %v1465_v32 = vmul.f32 %v1413_v6, %v5802_v46  ;;  %v1414_v11 = vadd.f32 0.5, %v1362_v63  ;;  %4630 = vtanh.f32 %v1272_v13 }
 0x294   :  { %v5881_v23 = vpop.f32.mrb[11].mxu1  ;;  %v5883_v1 = vpop.f32.mrb[39].mxu0  ;;  %v1365_v56 = vmul.f32 0.5, %v4609_v9  ;;  %v5887_v3 = vmul.f32 %v1415_v17, %v5805_v5  ;;  %4632 = vtanh.f32 %v1273_v43  ;;  %v1275_v25 = vmul.f32 0.5, %v5869_v62  ;;  %v4503_v43 = vld [vmem:[%s8427_s4 + $0x14] ss:$8 sps:$4 sm:$0xff]  }
 0x295   :  { %v4611_v47 = vpop.eup %4610  ;;  %v1416_v8 = vadd.f32 0.5, %v1364_v50  ;;  %v1466_v21 = vmul.f32 %v1414_v11, %v5808_v57  ;;  %v1274_v38 = vmul.f32 0.5, %v5874_v60 }
 0x296   :  { %v4613_v61 = vpop.eup %4612  ;;  %v1367_v15 = vmul.f32 0.5, %v4611_v47  ;;  %v1417_v40 = vadd.f32 0.5, %v1365_v56  ;;  %4634 = vtanh.f32 %v1275_v25 }
 0x297   :  { %v4615_v36 = vpop.eup %4614  ;;  %v1366_v22 = vmul.f32 0.5, %v4613_v61  ;;  %v5892_v46 = vmul.f32 %v1416_v8, %v5811_v35  ;;  %v5896_v13 = vpop.f32.mrb[12].mxu1  ;;  %4636 = vtanh.f32 %v1274_v38 }
 0x298   :  { %v4617_v26 = vpop.eup %4616  ;;  %v1419_v30 = vadd.f32 0.5, %v1367_v15  ;;  %v1368_v37 = vmul.f32 0.5, %v4615_v36  ;;  %v1469_v41 = vmul.f32 %v1417_v40, %v5816_v18  ;;  %v5898_v57 = vpop.f32.mrb[40].mxu0  ;;  %v4502_v18 = vld [vmem:[%s8427_s4] ss:$8 sps:$4 sm:$0xff]  }
 0x299   :  { %8484 = vst [vmem:[#allocation19_spill] sm:$0xff] %v5892_v46  ;;  %v4619_v5 = vpop.eup %4618  ;;  %v1418_v42 = vadd.f32 0.5, %v1366_v22  ;;  %v1369_v45 = vmul.f32 0.5, %v4617_v26  ;;  %v5903_v4 = vpop.f32.mrb[13].mxu1 }
 0x29a   :  { %v4621_v28 = vpop.eup %4620  ;;  %v5901_v58 = vmul.f32 %v1419_v30, %v5819_v44  ;;  %v1420_v35 = vadd.f32 0.5, %v1368_v37  ;;  %v1371_v49 = vmul.f32 0.5, %v4619_v5  ;;  %v5905_v54 = vpop.f32.mrb[41].mxu0  ;;  %v1567_v6 = vpack.c.bf16 %v1469_v41, %v1465_v32 }
 0x29b   :  { %v4623_v59 = vpop.eup %4622  ;;  %v1470_v63 = vmul.f32 %v1418_v42, %v5824_v19  ;;  %v1421_v9 = vadd.f32 0.5, %v1369_v45  ;;  %v1370_v17 = vmul.f32 0.5, %v4621_v28  ;;  %v5911_v50 = vpop.f32.mrb[14].mxu1  ;;  %v5944_v45 = vadd.f32 %v5871_v16, %v5799_v14 }
 0x29c   :  { %v5913_v44 = vpop.f32.mrb[42].mxu0  ;;  %v4625_v47 = vpop.eup %4624  ;;  %v5921_v56 = vmul.f32 %v1420_v35, %v5827_v10  ;;  %v1423_v32 = vadd.f32 0.5, %v1371_v49  ;;  %v1372_v61 = vmul.f32 0.5, %v4623_v59  ;;  %1698 = vmatmul.mubr.bf16.vlgmr.msra.gmra.mrb[40].mxu1 %v1567_v6 }
 0x29d   :  { %v5923_v19 = vpop.f32.mrb[15].mxu1  ;;  %v5925_v8 = vpop.f32.mrb[43].mxu0  ;;  %v2339_v36 = vpack.c.bf16 %v1470_v63, %v1466_v21  ;;  %v5928_v40 = vmul.f32 %v1421_v9, %v5834_v51  ;;  %v1422_v22 = vadd.f32 0.5, %v1370_v17  ;;  %v1373_v25 = vmul.f32 0.5, %v4625_v47  ;;  %1707 = vmatprep.mubr.bf16.mxu1 %v8441_v24  ;;  %2082 = vmatpush1.bf16.msra.mxu1 %v4502_v18  ;;  %v4505_v51 = vld [vmem:[%s8427_s4 + $0x10] ss:$8 sps:$4 sm:$0xff]  }
 0x29e   :  { %v4627_v15 = vpop.eup %4626  ;;  %v5933_v10 = vmul.f32 %v1423_v32, %v5837_v12  ;;  %v1424_v37 = vadd.f32 0.5, %v1372_v61  ;;  %2083 = vmatprep.subr.bf16.mxu1 %v4503_v43  ;;  %v4506_v12 = vld [vmem:[%s8427_s4 + $0x24] ss:$8 sps:$4 sm:$0xff]   ;;  %v1276_v9 = vmul.f32 0.5, %v5944_v45 }
 0x29f   :  { %v4629_v26 = vpop.eup %4628  ;;  %v1375_v38 = vmul.f32 0.5, %v4627_v15  ;;  %v5940_v5 = vmul.f32 %v1422_v22, %v5840_v27  ;;  %v1425_v41 = vadd.f32 0.5, %v1373_v25  ;;  %2379 = vmatmul.mubr.bf16.vlgmr.msra.gmra.mrb[44].mxu0 %v2339_v36  ;;  %v5954_v27 = vadd.f32 %v5876_v55, %v5792_v7  ;;  %v1129_v17 = vpop.f32.mrb[16].mxu1 }
 0x2a0   :  { %8485 = vst [vmem:[#allocation22_spill] sm:$0xff] %v5933_v10  ;;  %v4631_v21 = vpop.eup %4630  ;;  %v1374_v42 = vmul.f32 0.5, %v4629_v26  ;;  %v5950_v35 = vmul.f32 %v1424_v37, %v5843_v31  ;;  %2388 = vmatprep.mubr.bf16.mxu0 %v8441_v24  ;;  %2592 = vmatpush1.bf16.msra.mxu0 %v4502_v18  ;;  %v5967_v55 = vadd.f32 %v5878_v0, %v5794_v39  ;;  %v5969_v18 = vpop.f32.mrb[17].mxu1  ;;  %4638 = vtanh.f32 %v1276_v9  ;;  %v4509_v0 = vld [vmem:[%s8427_s4 + $0x34] ss:$8 sps:$4 sm:$0xff]  }
 0x2a1   :  { %v4633_v28 = vpop.eup %4632  ;;  %v1427_v49 = vadd.f32 0.5, %v1375_v38  ;;  %v1376_v59 = vmul.f32 0.5, %v4631_v21  ;;  %v5958_v16 = vmul.f32 %v1425_v41, %v5848_v48  ;;  %2593 = vmatprep.subr.bf16.mxu0 %v4503_v43  ;;  %v1277_v32 = vmul.f32 0.5, %v5954_v27  ;;  %2084 = vmatpush1.bf16.msra.mxu1 %v4505_v51  ;;  %v4508_v48 = vld [vmem:[%s8427_s4 + $0x20] ss:$8 sps:$4 sm:$0xff]   ;;  %v1133_v36 = vpop.f32.mrb[18].mxu1 }
 0x2a2   :  { %8486 = vst [vmem:[#allocation23_spill] sm:$0xff] %v5950_v35  ;;  %v1426_v6 = vadd.f32 0.5, %v1374_v42  ;;  %v1377_v63 = vmul.f32 0.5, %v4633_v28  ;;  %v4635_v61 = vpop.eup %4634  ;;  %v5979_v15 = vadd.f32 %v5881_v23, %v5797_v20  ;;  %2085 = vmatprep.subr.bf16.mxu1 %v4506_v12  ;;  %v5988_v37 = vpop.f32.mrb[19].mxu1  ;;  %v5996_v41 = vadd.f32 %v5883_v1, %v5799_v14 }
 0x2a3   :  { %v5962_v31 = vmul.f32 %v1427_v49, %v5853_v29  ;;  %v1428_v47 = vadd.f32 0.5, %v1376_v59  ;;  %v4637_v22 = vpop.eup %4636  ;;  %v1379_v26 = vmul.f32 0.5, %v4635_v61  ;;  %4640 = vtanh.f32 %v1277_v32 }
 0x2a4   :  { %v5975_v43 = vmul.f32 %v1426_v6, %v5857_v33  ;;  %v1429_v29 = vadd.f32 0.5, %v1377_v63  ;;  %v1279_v33 = vmul.f32 0.5, %v5967_v55  ;;  %2594 = vmatpush1.bf16.msra.mxu0 %v4505_v51  ;;  %v1378_v38 = vmul.f32 0.5, %v4637_v22 }
 0x2a5   :  { %8487 = vst [vmem:[#allocation24_spill] sm:$0xff] %v5962_v31  ;;  %v5985_v25 = vmul.f32 %v1428_v47, %v5860_v34  ;;  %v1278_v21 = vmul.f32 0.5, %v5979_v15  ;;  %2595 = vmatprep.subr.bf16.mxu0 %v4506_v12  ;;  %v1431_v34 = vadd.f32 0.5, %v1379_v26  ;;  %v6000_v42 = vadd.f32 %v5896_v13, %v5792_v7  ;;  %2086 = vmatpush1.bf16.msra.mxu1 %v4508_v48  ;;  %v4512_v13 = vld [vmem:[%s8427_s4 + $0x44] ss:$8 sps:$4 sm:$0xff]  }
 0x2a6   :  { %v5991_v23 = vmul.f32 %v1429_v29, %v5866_v52  ;;  %4642 = vtanh.f32 %v1279_v33  ;;  %v6004_v51 = vadd.f32 %v5898_v57, %v5794_v39  ;;  %v4511_v52 = vld [vmem:[%s8427_s4 + $0x30] ss:$8 sps:$4 sm:$0xff]   ;;  %v1430_v28 = vadd.f32 0.5, %v1378_v38  ;;  %2087 = vmatprep.subr.bf16.mxu1 %v4509_v0 }
 0x2a7   :  { %8488 = vst [vmem:[#allocation25_spill] sm:$0xff] %v5985_v25  ;;  %4644 = vtanh.f32 %v1278_v21  ;;  %v1280_v1 = vmul.f32 0.5, %v5996_v41  ;;  %v6012_v12 = vadd.f32 %v5903_v4, %v5797_v20  ;;  %v6018_v57 = vmul.f32 %v1431_v34, %v5869_v62  ;;  %v1139_v62 = vpop.f32.mrb[20].mxu1 }
 0x2a8   :  { %v1281_v49 = vmul.f32 0.5, %v6000_v42  ;;  %v1283_v59 = vmul.f32 0.5, %v6004_v51  ;;  %v6024_v6 = vadd.f32 %v5905_v54, %v5799_v14  ;;  %2596 = vmatpush1.bf16.msra.mxu0 %v4508_v48  ;;  %v6027_v4 = vmul.f32 %v1430_v28, %v5874_v60  ;;  %v1141_v32 = vpop.f32.mrb[21].mxu1 }
 0x2a9   :  { %8489 = vst [vmem:[#allocation26_spill] sm:$0xff] %v6018_v57  ;;  %4646 = vtanh.f32 %v1280_v1  ;;  %v1282_v63 = vmul.f32 0.5, %v6012_v12  ;;  %v6032_v9 = vadd.f32 %v5911_v50, %v5792_v7  ;;  %2597 = vmatprep.subr.bf16.mxu0 %v4509_v0  ;;  %v6037_v54 = vadd.f32 %v5913_v44, %v5794_v39  ;;  %2088 = vmatpush1.bf16.msra.mxu1 %v4511_v52  ;;  %v4514_v50 = vld [vmem:[%s8427_s4 + $0x40] ss:$8 sps:$4 sm:$0xff]   ;;  %v6054_v29 = vpop.f32.mrb[22].mxu1 }
 0x2aa   :  { %4648 = vtanh.f32 %v1281_v49  ;;  %v1284_v47 = vmul.f32 0.5, %v6024_v6  ;;  %v6041_v60 = vadd.f32 %v5923_v19, %v5797_v20  ;;  %v6049_v61 = vadd.f32 %v5925_v8, %v5799_v14  ;;  %2089 = vmatprep.subr.bf16.mxu1 %v4512_v13  ;;  %v4515_v19 = vld [vmem:[%s8427_s4 + $0x54] ss:$8 sps:$4 sm:$0xff]   ;;  %v6065_v8 = vpop.f32.mrb[23].mxu1 }
 0x2ab   :  { %4650 = vtanh.f32 %v1283_v59  ;;  %v1285_v48 = vmul.f32 0.5, %v6032_v9  ;;  %v6052_v44 = vadd.f32 %v1129_v17, %v5792_v7  ;;  %v1287_v0 = vmul.f32 0.5, %v6037_v54  ;;  %v4639_v17 = vpop.eup %4638 }
 0x2ac   :  { %4652 = vtanh.f32 %v1282_v63  ;;  %v1286_v22 = vmul.f32 0.5, %v6041_v60  ;;  %v6063_v26 = vadd.f32 %v5969_v18, %v5797_v20  ;;  %2598 = vmatpush1.bf16.msra.mxu0 %v4511_v52  ;;  %v1288_v33 = vmul.f32 0.5, %v6049_v61  ;;  %v4517_v52 = vld [vmem:[%s8427_s4 + $0x50] ss:$8 sps:$4 sm:$0xff]  }
 0x2ad   :  { %4654 = vtanh.f32 %v1284_v47  ;;  %v1289_v38 = vmul.f32 0.5, %v6052_v44  ;;  %v6070_v21 = vadd.f32 %v1133_v36, %v5792_v7  ;;  %2599 = vmatprep.subr.bf16.mxu0 %v4512_v13  ;;  %v4641_v34 = vpop.eup %4640  ;;  %v1380_v28 = vmul.f32 0.5, %v4639_v17  ;;  %2090 = vmatpush1.bf16.msra.mxu1 %v4514_v50  ;;  %v4518_v13 = vld [vmem:[%s8427_s4 + $0x64] ss:$8 sps:$4 sm:$0xff]  }
 0x2ae   :  { %4656 = vtanh.f32 %v1285_v48  ;;  %v1290_v1 = vmul.f32 0.5, %v6063_v26  ;;  %v1568_v18 = vpack.c.bf16 %v5958_v16, %v5928_v40  ;;  %v1381_v49 = vmul.f32 0.5, %v4641_v34  ;;  %2091 = vmatprep.subr.bf16.mxu1 %v4515_v19 }
 0x2af   :  { %4658 = vtanh.f32 %v1287_v0  ;;  %v1293_v59 = vmul.f32 0.5, %v6070_v21  ;;  %v6081_v36 = vadd.f32 %v5988_v37, %v5797_v20  ;;  %v1432_v40 = vadd.f32 0.5, %v1380_v28  ;;  %v6093_v34 = vpop.f32.mrb[24].mxu1 }
 0x2b0   :  { %v4643_v63 = vpop.eup %4642  ;;  %4660 = vtanh.f32 %v1286_v22  ;;  %1708 = vmatmul.mubr.bf16.gmra.mrb[44].mxu1 %v1568_v18  ;;  %v2340_v16 = vpack.c.bf16 %v5975_v43, %v5940_v5  ;;  %v6089_v47 = vadd.f32 %v1139_v62, %v5792_v7  ;;  %2600 = vmatpush1.bf16.msra.mxu0 %v4514_v50  ;;  %v1433_v0 = vadd.f32 0.5, %v1381_v49  ;;  %v6099_v43 = vpop.f32.mrb[25].mxu1  ;;  %v4520_v62 = vld [vmem:[%s8427_s4 + $0x60] ss:$8 sps:$4 sm:$0xff]  }
 0x2b1   :  { %v4645_v48 = vpop.eup %4644  ;;  %v1383_v37 = vmul.f32 0.5, %v4643_v63  ;;  %4662 = vtanh.f32 %v1288_v33  ;;  %v1294_v17 = vmul.f32 0.5, %v6081_v36  ;;  %1717 = vmatprep.mubr.bf16.mxu1 %v8441_v24  ;;  %2601 = vmatprep.subr.bf16.mxu0 %v4515_v19  ;;  %v6096_v22 = vmul.f32 %v1432_v40, %v5944_v45  ;;  %v1153_v19 = vpop.f32.mrb[26].mxu1 }
 0x2b2   :  { %v1382_v28 = vmul.f32 0.5, %v4645_v48  ;;  %4664 = vtanh.f32 %v1289_v38  ;;  %2389 = vmatmul.mubr.bf16.gmra.mrb[48].mxu0 %v2340_v16  ;;  %v1297_v5 = vmul.f32 0.5, %v6089_v47  ;;  %2092 = vmatpush1.bf16.msra.mxu1 %v4517_v52  ;;  %v1485_v33 = vmul.f32 %v1433_v0, %v5954_v27  ;;  %v4521_v38 = vld [vmem:[%s8427_s4 + $0x74] ss:$8 sps:$4 sm:$0xff]  }
 0x2b3   :  { %8490 = vst [vmem:[#allocation27_spill] sm:$0xff] %v6096_v22  ;;  %v4647_v50 = vpop.eup %4646  ;;  %v1435_v18 = vadd.f32 0.5, %v1383_v37  ;;  %4666 = vtanh.f32 %v1290_v1  ;;  %v6106_v45 = vadd.f32 %v1141_v32, %v5797_v20  ;;  %2398 = vmatprep.mubr.bf16.mxu0 %v8441_v24  ;;  %2093 = vmatprep.subr.bf16.mxu1 %v4518_v13  ;;  %v6114_v27 = vadd.f32 %v6054_v29, %v5792_v7  ;;  %v1154_v1 = vpop.f32.mrb[27].mxu1 }
 0x2b4   :  { %v4649_v49 = vpop.eup %4648  ;;  %v1434_v63 = vadd.f32 0.5, %v1382_v28  ;;  %v1384_v40 = vmul.f32 0.5, %v4647_v50  ;;  %4668 = vtanh.f32 %v1293_v59  ;;  %2602 = vmatpush1.bf16.msra.mxu0 %v4517_v52 }
 0x2b5   :  { %v4651_v32 = vpop.eup %4650  ;;  %v6117_v16 = vmul.f32 %v1435_v18, %v5967_v55  ;;  %v1385_v48 = vmul.f32 0.5, %v4649_v49  ;;  %4670 = vtanh.f32 %v1294_v17  ;;  %v1298_v0 = vmul.f32 0.5, %v6106_v45  ;;  %2603 = vmatprep.subr.bf16.mxu0 %v4518_v13  ;;  %v4523_v55 = vld [vmem:[%s8427_s4 + $0x70] ss:$8 sps:$4 sm:$0xff]   ;;  %v4524_v49 = vld [vmem:[%s8427_s4 + $0x84] ss:$8 sps:$4 sm:$0xff]  }
 0x2b6   :  { %v4653_v37 = vpop.eup %4652  ;;  %v1486_v28 = vmul.f32 %v1434_v63, %v5979_v15  ;;  %v1436_v50 = vadd.f32 0.5, %v1384_v40  ;;  %v1387_v59 = vmul.f32 0.5, %v4651_v32  ;;  %4672 = vtanh.f32 %v1297_v5  ;;  %2094 = vmatpush1.bf16.msra.mxu1 %v4520_v62 }
 0x2b7   :  { %8491 = vst [vmem:[#allocation28_spill] sm:$0xff] %v6117_v16  ;;  %v4655_v29 = vpop.eup %4654  ;;  %v1437_v19 = vadd.f32 0.5, %v1385_v48  ;;  %v1386_v1 = vmul.f32 0.5, %v4653_v37  ;;  %4674 = vtanh.f32 %v1298_v0  ;;  %v1301_v52 = vmul.f32 0.5, %v6114_v27  ;;  %2095 = vmatprep.subr.bf16.mxu1 %v4521_v38 }
 0x2b8   :  { %v4657_v17 = vpop.eup %4656  ;;  %v6126_v13 = vmul.f32 %v1436_v50, %v5996_v41  ;;  %v1439_v15 = vadd.f32 0.5, %v1387_v59  ;;  %v1388_v18 = vmul.f32 0.5, %v4655_v29  ;;  %v1569_v5 = vpack.c.bf16 %v1485_v33, %v5991_v23  ;;  %2604 = vmatpush1.bf16.msra.mxu0 %v4520_v62 }
 0x2b9   :  { %v4659_v63 = vpop.eup %4658  ;;  %v6133_v40 = vmul.f32 %v1437_v19, %v6000_v42  ;;  %v1438_v32 = vadd.f32 0.5, %v1386_v1  ;;  %v1389_v48 = vmul.f32 0.5, %v4657_v17  ;;  %4676 = vtanh.f32 %v1301_v52  ;;  %2605 = vmatprep.subr.bf16.mxu0 %v4521_v38 }
 0x2ba   :  { %8492 = vst [vmem:[#allocation29_spill] sm:$0xff] %v6126_v13  ;;  %v4661_v0 = vpop.eup %4660  ;;  %v6136_v41 = vmul.f32 %v1439_v15, %v6004_v51  ;;  %v1440_v37 = vadd.f32 0.5, %v1388_v18  ;;  %v1391_v50 = vmul.f32 0.5, %v4659_v63  ;;  %1718 = vmatmul.mubr.bf16.gmra.mrb[48].mxu1 %v1569_v5  ;;  %v6140_v23 = vadd.f32 %v6065_v8, %v5797_v20  ;;  %v4526_v51 = vld [vmem:[%s8427_s4 + $0x80] ss:$8 sps:$4 sm:$0xff]  }
 0x2bb   :  { %v4663_v62 = vpop.eup %4662  ;;  %v6143_v33 = vmul.f32 %v1438_v32, %v6012_v12  ;;  %v1441_v42 = vadd.f32 0.5, %v1389_v48  ;;  %v1390_v59 = vmul.f32 0.5, %v4661_v0  ;;  %v2341_v29 = vpack.c.bf16 %v1486_v28, %v6027_v4  ;;  %1727 = vmatprep.mubr.bf16.mxu1 %v8441_v24  ;;  %2096 = vmatpush1.bf16.msra.mxu1 %v4523_v55 }
 0x2bc   :  { %8493 = vst [vmem:[#allocation30_spill] sm:$0xff] %v6136_v41  ;;  %v4665_v38 = vpop.eup %4664  ;;  %v6151_v19 = vmul.f32 %v1440_v37, %v6024_v6  ;;  %v1443_v8 = vadd.f32 0.5, %v1391_v50  ;;  %v1392_v1 = vmul.f32 0.5, %v4663_v62  ;;  %v1302_v12 = vmul.f32 0.5, %v6140_v23  ;;  %2606 = vmatpush1.bf16.msra.mxu0 %v4523_v55  ;;  %2097 = vmatprep.subr.bf16.mxu1 %v4524_v49 }
 0x2bd   :  { %v4667_v52 = vpop.eup %4666  ;;  %v1493_v4 = vmul.f32 %v1441_v42, %v6032_v9  ;;  %v1442_v28 = vadd.f32 0.5, %v1390_v59  ;;  %v1393_v17 = vmul.f32 0.5, %v4665_v38  ;;  %2399 = vmatmul.mubr.bf16.gmra.mrb[52].mxu0 %v2341_v29  ;;  %v6157_v15 = vadd.f32 %v6093_v34, %v5792_v7  ;;  %2607 = vmatprep.subr.bf16.mxu0 %v4524_v49 }
 0x2be   :  { %8494 = vst [vmem:[#allocation31_spill] sm:$0xff] %v6151_v19  ;;  %v4669_v18 = vpop.eup %4668  ;;  %v6160_v6 = vmul.f32 %v1443_v8, %v6037_v54  ;;  %v1444_v5 = vadd.f32 0.5, %v1392_v1  ;;  %v1394_v63 = vmul.f32 0.5, %v4667_v52  ;;  %4678 = vtanh.f32 %v1302_v12  ;;  %2408 = vmatprep.mubr.bf16.mxu0 %v8441_v24  ;;  %v5127_v19 = vld [vmem:[#allocation6 + $0x30] ss:$8 sps:$4 sm:$0xff]  }
 0x2bf   :  { %v4671_v55 = vpop.eup %4670  ;;  %v1494_v9 = vmul.f32 %v1442_v28, %v6041_v60  ;;  %v1445_v32 = vadd.f32 0.5, %v1393_v17  ;;  %v1397_v48 = vmul.f32 0.5, %v4669_v18  ;;  %v1305_v0 = vmul.f32 0.5, %v6157_v15  ;;  %2098 = vmatpush1.bf16.msra.mxu1 %v4526_v51  ;;  %v1230_v59 = vpop.f32.mrb[28].mxu1 }
 0x2c0   :  { %8495 = vst [vmem:[#allocation32_spill] sm:$0xff] %v6160_v6  ;;  %v4673_v7 = vpop.eup %4672  ;;  %v6166_v34 = vmul.f32 %v1444_v5, %v6049_v61  ;;  %v1446_v49 = vadd.f32 0.5, %v1394_v63  ;;  %v1398_v54 = vmul.f32 0.5, %v4671_v55  ;;  %v6170_v37 = vadd.f32 %v6099_v43, %v5797_v20  ;;  %2608 = vmatpush1.bf16.msra.mxu0 %v4526_v51  ;;  %v1232_v1 = vpop.f32.mrb[29].mxu1 }
 0x2c1   :  { %v4675_v50 = vpop.eup %4674  ;;  %v6173_v62 = vmul.f32 %v1445_v32, %v6052_v44  ;;  %v1449_v60 = vadd.f32 0.5, %v1397_v48  ;;  %v1401_v42 = vmul.f32 0.5, %v4673_v7  ;;  %4680 = vtanh.f32 %v1305_v0  ;;  %v1234_v52 = vpop.f32.mrb[30].mxu1 }
 0x2c2   :  { %8496 = vst [vmem:[#allocation33_spill] sm:$0xff] %v6166_v34  ;;  %v1498_v29 = vmul.f32 %v1446_v49, %v6063_v26  ;;  %v1450_v38 = vadd.f32 0.5, %v1398_v54  ;;  %v1402_v61 = vmul.f32 0.5, %v4675_v50  ;;  %v1306_v8 = vmul.f32 0.5, %v6170_v37  ;;  %v1236_v26 = vpop.f32.mrb[31].mxu1 }
 0x2c3   :  { %v4677_v12 = vpop.eup %4676  ;;  %v1501_v20 = vmul.f32 %v1449_v60, %v6070_v21  ;;  %v1453_v43 = vadd.f32 0.5, %v1401_v42  ;;  %v1570_v51 = vpack.c.bf16 %v1493_v4, %v6133_v40  ;;  %v2342_v44 = vpack.c.bf16 %v1494_v9, %v6143_v33 }
 0x2c4   :  { %v1502_v28 = vmul.f32 %v1450_v38, %v6081_v36  ;;  %v1454_v17 = vadd.f32 0.5, %v1402_v61  ;;  %v1405_v18 = vmul.f32 0.5, %v4677_v12  ;;  %4682 = vtanh.f32 %v1306_v8 }
 0x2c5   :  { %v6182_v5 = vmul.f32 %v1453_v43, %v6089_v47  ;;  %1728 = vmatmul.mubr.bf16.gmra.mrb[52].mxu1 %v1570_v51  ;;  %2409 = vmatmul.mubr.bf16.gmra.mrb[56].mxu0 %v2342_v44  ;;  %v1571_v63 = vpack.c.bf16 %v1501_v20, %v6173_v62  ;;  %v6186_v21 = vadd.f32 %v1230_v59, %v5794_v39 }
 0x2c6   :  { %v6189_v40 = vmul.f32 %v1454_v17, %v6106_v45  ;;  %v1457_v33 = vadd.f32 0.5, %v1405_v18  ;;  %1737 = vmatprep.mubr.bf16.mxu1 %v8441_v24  ;;  %2418 = vmatprep.mubr.bf16.mxu0 %v8441_v24  ;;  %v2343_v36 = vpack.c.bf16 %v1502_v28, %v1498_v29  ;;  %v6194_v4 = vadd.f32 %v1232_v1, %v5799_v14 }
 0x2c7   :  { %v1291_v47 = vmul.f32 0.5, %v6186_v21  ;;  %v6198_v55 = vadd.f32 %v1234_v52, %v5794_v39  ;;  %v6201_v9 = vadd.f32 %v1236_v26, %v5799_v14  ;;  %v1240_v60 = vpop.f32.mrb[32].mxu1 }
 0x2c8   :  { %v4679_v32 = vpop.eup %4678  ;;  %v1509_v48 = vmul.f32 %v1457_v33, %v6114_v27  ;;  %v1292_v0 = vmul.f32 0.5, %v6194_v4  ;;  %v6215_v27 = vadd.f32 %v1240_v60, %v5794_v39  ;;  %v1242_v59 = vpop.f32.mrb[33].mxu1 }
 0x2c9   :  { %v1406_v54 = vmul.f32 0.5, %v4679_v32  ;;  %4684 = vtanh.f32 %v1291_v47  ;;  %v1295_v50 = vmul.f32 0.5, %v6198_v55  ;;  %v1296_v62 = vmul.f32 0.5, %v6201_v9  ;;  %v1244_v1 = vpop.f32.mrb[34].mxu1 }
 0x2ca   :  { %4686 = vtanh.f32 %v1292_v0  ;;  %v1572_v42 = vpack.c.bf16 %v1509_v48, %v6182_v5  ;;  %v6220_v8 = vadd.f32 %v1242_v59, %v5799_v14  ;;  %v1299_v43 = vmul.f32 0.5, %v6215_v27  ;;  %v1246_v44 = vpop.f32.mrb[35].mxu1 }
 0x2cb   :  { %v4681_v38 = vpop.eup %4680  ;;  %v1458_v61 = vadd.f32 0.5, %v1406_v54  ;;  %4688 = vtanh.f32 %v1295_v50  ;;  %v6226_v51 = vadd.f32 %v1244_v1, %v5794_v39  ;;  %v1247_v17 = vadd.f32 %v1246_v44, %v5799_v14 }
 0x2cc   :  { %v1409_v20 = vmul.f32 0.5, %v4681_v38  ;;  %4690 = vtanh.f32 %v1296_v62  ;;  %v1300_v28 = vmul.f32 0.5, %v6220_v8 }
 0x2cd   :  { %v1510_v52 = vmul.f32 %v1458_v61, %v6140_v23  ;;  %1738 = vmatmul.mubr.bf16.gmra.mrb[56].mxu1 %v1571_v63  ;;  %2419 = vmatmul.mubr.bf16.gmra.mrb[60].mxu0 %v2343_v36  ;;  %4692 = vtanh.f32 %v1299_v43  ;;  %v1303_v5 = vmul.f32 0.5, %v6226_v51  ;;  %v1304_v63 = vmul.f32 0.5, %v1247_v17 }
 0x2ce   :  { %v4683_v26 = vpop.eup %4682  ;;  %1747 = vmatprep.mubr.bf16.mxu1 %v8441_v24  ;;  %2428 = vmatprep.mubr.bf16.mxu0 %v8441_v24  ;;  %4694 = vtanh.f32 %v1300_v28  ;;  %v1461_v36 = vadd.f32 0.5, %v1409_v20 }
 0x2cf   :  { %v1410_v33 = vmul.f32 0.5, %v4683_v26  ;;  %v2344_v23 = vpack.c.bf16 %v1510_v52, %v6189_v40  ;;  %4696 = vtanh.f32 %v1303_v5  ;;  %v6237_v47 = vpop.f32.mrb[36].mxu1 }
 0x2d0   :  { %4698 = vtanh.f32 %v1304_v63  ;;  %8497 = vst [vmem:[#allocation34_spill] sm:$0xff] %v6237_v47  ;;  %v6239_v48 = vpop.f32.mrb[37].mxu1  ;;  %v1513_v38 = vmul.f32 %v1461_v36, %v6157_v15 }
 0x2d1   :  { %v1462_v32 = vadd.f32 0.5, %v1410_v33  ;;  %8498 = vst [vmem:[#allocation35_spill] sm:$0xff] %v6239_v48  ;;  %v1254_v54 = vpop.f32.mrb[38].mxu1 }
 0x2d2   :  { %v1255_v60 = vpop.f32.mrb[39].mxu1  ;;  %v1573_v33 = vpack.c.bf16 %v1513_v38, %v1513_v38 }
 0x2d3   :  { %v4685_v0 = vpop.eup %4684  ;;  %v1514_v1 = vmul.f32 %v1462_v32, %v6170_v37 }
 0x2d4   :  { %v4687_v50 = vpop.eup %4686  ;;  %v1395_v62 = vmul.f32 0.5, %v4685_v0 }
 0x2d5   :  { %v4689_v59 = vpop.eup %4688  ;;  %v1396_v61 = vmul.f32 0.5, %v4687_v50  ;;  %1748 = vmatmul.mubr.bf16.gmra.mrb[60].mxu1 %v1572_v42  ;;  %2429 = vmatmul.mubr.bf16.gmra.mrb[64].mxu0 %v2344_v23  ;;  %v2345_v42 = vpack.c.bf16 %v1514_v1, %v1514_v1 }
 0x2d6   :  { %v4691_v40 = vpop.eup %4690  ;;  %v1447_v20 = vadd.f32 0.5, %v1395_v62  ;;  %v1399_v43 = vmul.f32 0.5, %v4689_v59  ;;  %1757 = vmatprep.mubr.bf16.mxu1 %v8441_v24  ;;  %2438 = vmatprep.mubr.bf16.mxu0 %v8441_v24 }
 0x2d7   :  { %v1448_v44 = vadd.f32 0.5, %v1396_v61  ;;  %v1400_v52 = vmul.f32 0.5, %v4691_v40  ;;  %v4693_v28 = vpop.eup %4692 }
 0x2d8   :  { %v1451_v26 = vadd.f32 0.5, %v1399_v43  ;;  %v4695_v5 = vpop.eup %4694  ;;  %v1403_v15 = vmul.f32 0.5, %v4693_v28  ;;  %v6246_v23 = vmul.f32 %v1447_v20, %v6186_v21  ;;  %v4535_v28 = vld [vmem:[%s8427_s4 + $0xb0] ss:$8 sps:$4 sm:$0xff]  }
 0x2d9   :  { %v1452_v63 = vadd.f32 0.5, %v1400_v52  ;;  %v4697_v36 = vpop.eup %4696  ;;  %v1404_v32 = vmul.f32 0.5, %v4695_v5  ;;  %v6252_v54 = vmul.f32 %v1448_v44, %v6194_v4  ;;  %v4527_v52 = vld [vmem:[%s8427_s4 + $0x94] ss:$8 sps:$4 sm:$0xff]   ;;  %v4538_v5 = vld [vmem:[%s8427_s4 + $0xc0] ss:$8 sps:$4 sm:$0xff]  }
 0x2da   :  { %8499 = vst [vmem:[#allocation36_spill] sm:$0xff] %v6246_v23  ;;  %v6249_v37 = vmul.f32 %v1451_v26, %v6198_v55  ;;  %v4699_v0 = vpop.eup %4698  ;;  %v1455_v62 = vadd.f32 0.5, %v1403_v15  ;;  %v1407_v60 = vmul.f32 0.5, %v4697_v36  ;;  %2099 = vmatprep.subr.bf16.mxu1 %v4527_v52  ;;  %2609 = vmatprep.subr.bf16.mxu0 %v4527_v52  ;;  %v4536_v26 = vld [vmem:[%s8427_s4 + $0xc4] ss:$8 sps:$4 sm:$0xff]  }
 0x2db   :  { %8501 = vst [vmem:[#allocation38_spill] sm:$0xff] %v6252_v54  ;;  %v6255_v50 = vmul.f32 %v1452_v63, %v6201_v9  ;;  %v1456_v59 = vadd.f32 0.5, %v1404_v32  ;;  %v1408_v38 = vmul.f32 0.5, %v4699_v0  ;;  %v4541_v63 = vld [vmem:[%s8427_s4 + $0xd0] ss:$8 sps:$4 sm:$0xff]  }
 0x2dc   :  { %8500 = vst [vmem:[#allocation37_spill] sm:$0xff] %v6249_v37  ;;  %v1459_v21 = vadd.f32 0.5, %v1407_v60  ;;  %v6262_v4 = vmul.f32 %v1455_v62, %v6215_v27  ;;  %v4529_v27 = vld [vmem:[%s8427_s4 + $0x90] ss:$8 sps:$4 sm:$0xff]   ;;  %v4542_v15 = vld [vmem:[%s8427_s4 + $0xe4] ss:$8 sps:$4 sm:$0xff]  }
 0x2dd   :  { %8502 = vst [vmem:[#allocation39_spill] sm:$0xff] %v6255_v50  ;;  %1758 = vmatmul.mubr.bf16.gmra.mrb[64].mxu1 %v1573_v33  ;;  %2439 = vmatmul.mubr.bf16.gmra.mrb[68].mxu0 %v2345_v42  ;;  %v1460_v40 = vadd.f32 0.5, %v1408_v38  ;;  %v6268_v1 = vmul.f32 %v1456_v59, %v6220_v8  ;;  %v4530_v8 = vld [vmem:[%s8427_s4 + $0xa4] ss:$8 sps:$4 sm:$0xff]   ;;  %v4539_v33 = vld [vmem:[%s8427_s4 + $0xd4] ss:$8 sps:$4 sm:$0xff]  }
 0x2de   :  { %8503 = vst [vmem:[#allocation40_spill] sm:$0xff] %v6262_v4  ;;  %v6265_v9 = vmul.f32 %v1459_v21, %v6226_v51  ;;  %2100 = vmatpush1.bf16.msra.mxu1 %v4529_v27  ;;  %2610 = vmatpush1.bf16.msra.mxu0 %v4529_v27  ;;  %v4532_v51 = vld [vmem:[%s8427_s4 + $0xa0] ss:$8 sps:$4 sm:$0xff]   ;;  %v4545_v42 = vld [vmem:[%s8427_s4 + $0xf4] ss:$8 sps:$4 sm:$0xff]  }
 0x2df   :  { %8505 = vst [vmem:[#allocation42_spill] sm:$0xff] %v6268_v1  ;;  %v6270_v20 = vmul.f32 %v1460_v40, %v1247_v17  ;;  %2101 = vmatprep.subr.bf16.mxu1 %v4530_v8  ;;  %2611 = vmatprep.subr.bf16.mxu0 %v4530_v8  ;;  %v4533_v17 = vld [vmem:[%s8427_s4 + $0xb4] ss:$8 sps:$4 sm:$0xff]   ;;  %v4544_v36 = vld [vmem:[%s8427_s4 + $0xe0] ss:$8 sps:$4 sm:$0xff]  }
 0x2e0   :  { %8504 = vst [vmem:[#allocation41_spill] sm:$0xff] %v6265_v9  ;;  %v4547_v32 = vld [vmem:[%s8427_s4 + $0xf0] ss:$8 sps:$4 sm:$0xff]   ;;  %v5120_v0 = vld [vmem:[#allocation6 + $0x4] ss:$8 sps:$4 sm:$0xff]  }
 0x2e1   :  { %8506 = vst [vmem:[#allocation43_spill] sm:$0xff] %v6270_v20  ;;  %v1533_v62 = vld [vmem:[#allocation10] sm:$0x3]  ;;  %v5125_v20 = vld [vmem:[#allocation6 + $0x20] ss:$8 sps:$4 sm:$0xff]  }
 0x2e2   :  { %2102 = vmatpush1.bf16.msra.mxu1 %v4532_v51  ;;  %2612 = vmatpush1.bf16.msra.mxu0 %v4532_v51  ;;  %v6319_v60 = vrot.slane %v1533_v62, %v8480_v2  ;;  %v6322_v59 = vrot.slane %v1533_v62, %v8482_v53 }
 0x2e3   :  { %2103 = vmatprep.subr.bf16.mxu1 %v4533_v17  ;;  %2613 = vmatprep.subr.bf16.mxu0 %v4533_v17 }
 0x2e6   :  { %2104 = vmatpush1.bf16.msra.mxu1 %v4535_v28  ;;  %2614 = vmatpush1.bf16.msra.mxu0 %v4535_v28 }
 0x2e7   :  { %2105 = vmatprep.subr.bf16.mxu1 %v4536_v26  ;;  %2615 = vmatprep.subr.bf16.mxu0 %v4536_v26 }
 0x2ea   :  { %2106 = vmatpush1.bf16.msra.mxu1 %v4538_v5  ;;  %2616 = vmatpush1.bf16.msra.mxu0 %v4538_v5 }
 0x2eb   :  { %2107 = vmatprep.subr.bf16.mxu1 %v4539_v33  ;;  %2617 = vmatprep.subr.bf16.mxu0 %v4539_v33 }
 0x2ee   :  { %2108 = vmatpush1.bf16.msra.mxu1 %v4541_v63  ;;  %2618 = vmatpush1.bf16.msra.mxu0 %v4541_v63 }
 0x2ef   :  { %2109 = vmatprep.subr.bf16.mxu1 %v4542_v15  ;;  %2619 = vmatprep.subr.bf16.mxu0 %v4542_v15 }
 0x2f2   :  { %2110 = vmatpush1.bf16.msra.mxu1 %v4544_v36  ;;  %2620 = vmatpush1.bf16.msra.mxu0 %v4544_v36 }
 0x2f3   :  { %2111 = vmatprep.subr.bf16.mxu1 %v4545_v42  ;;  %2621 = vmatprep.subr.bf16.mxu0 %v4545_v42 }
 0x2f6   :  { %2112 = vmatpush1.bf16.msra.mxu1 %v4547_v32  ;;  %2622 = vmatpush1.bf16.msra.mxu0 %v4547_v32 }
 0x2f7   :  { %3482 = vmatprep.subr.bf16.mxu0 %v5120_v0  ;;  %2973 = vmatprep.subr.bf16.mxu1 %v5120_v0 }
 0x36f   :  { %v1699_v38 = vpop.f32.mrb[40].mxu1 }
 0x370   :  { %v1700_v21 = vadd.f32 %v1699_v38, %v6319_v60  ;;  %v1701_v40 = vpop.f32.mrb[41].mxu1 }
 0x371   :  { %v1702_v52 = vadd.f32 %v1701_v40, %v6322_v59  ;;  %v1703_v8 = vpop.f32.mrb[42].mxu1 }
 0x372   :  { %v2380_v27 = vpop.f32.mrb[44].mxu0  ;;  %v1766_v51 = vmul.f32 0.5, %v1700_v21  ;;  %v1704_v28 = vadd.f32 %v1703_v8, %v6319_v60  ;;  %v1705_v5 = vpop.f32.mrb[43].mxu1 }
 0x373   :  { %v2381_v17 = vadd.f32 %v2380_v27, %v6319_v60  ;;  %v2382_v26 = vpop.f32.mrb[45].mxu0  ;;  %v1767_v33 = vmul.f32 0.5, %v1702_v52  ;;  %v1706_v15 = vadd.f32 %v1705_v5, %v6322_v59 }
 0x374   :  { %v2383_v63 = vadd.f32 %v2382_v26, %v6322_v59  ;;  %v2384_v36 = vpop.f32.mrb[46].mxu0  ;;  %4700 = vtanh.f32 %v1766_v51  ;;  %v1768_v32 = vmul.f32 0.5, %v1704_v28 }
 0x375   :  { %v2447_v42 = vmul.f32 0.5, %v2381_v17  ;;  %v2385_v0 = vadd.f32 %v2384_v36, %v6319_v60  ;;  %v2386_v62 = vpop.f32.mrb[47].mxu0  ;;  %4702 = vtanh.f32 %v1767_v33  ;;  %v1769_v40 = vmul.f32 0.5, %v1706_v15 }
 0x376   :  { %v2448_v38 = vmul.f32 0.5, %v2383_v63  ;;  %v2387_v27 = vadd.f32 %v2386_v62, %v6322_v59 }
 0x377   :  { %4704 = vtanh.f32 %v2447_v42  ;;  %v2449_v8 = vmul.f32 0.5, %v2385_v0 }
 0x378   :  { %4706 = vtanh.f32 %v1768_v32  ;;  %v2450_v44 = vmul.f32 0.5, %v2387_v27 }
 0x379   :  { %4708 = vtanh.f32 %v2448_v38 }
 0x37a   :  { %4710 = vtanh.f32 %v1769_v40 }
 0x37b   :  { %4712 = vtanh.f32 %v2449_v8 }
 0x37c   :  { %4714 = vtanh.f32 %v2450_v44 }
 0x37e   :  { %v4701_v26 = vpop.eup %4700 }
 0x37f   :  { %v4703_v51 = vpop.eup %4702  ;;  %v1818_v5 = vmul.f32 0.5, %v4701_v26 }
 0x380   :  { %v1819_v55 = vmul.f32 0.5, %v4703_v51 }
 0x381   :  { %v4705_v43 = vpop.eup %4704  ;;  %v1844_v61 = vadd.f32 0.5, %v1818_v5 }
 0x382   :  { %v4707_v36 = vpop.eup %4706  ;;  %v2499_v33 = vmul.f32 0.5, %v4705_v43  ;;  %v1845_v12 = vadd.f32 0.5, %v1819_v55 }
 0x383   :  { %v4709_v18 = vpop.eup %4708  ;;  %v1820_v29 = vmul.f32 0.5, %v4707_v36  ;;  %v1709_v62 = vpop.f32.mrb[44].mxu1  ;;  %v6332_v49 = vmul.f32 %v1844_v61, %v1700_v21 }
 0x384   :  { %v4711_v42 = vpop.eup %4710  ;;  %v2525_v32 = vadd.f32 0.5, %v2499_v33  ;;  %v2500_v38 = vmul.f32 0.5, %v4709_v18  ;;  %v6335_v40 = vadd.f32 %v1709_v62, %v6319_v60  ;;  %v1711_v44 = vpop.f32.mrb[45].mxu1  ;;  %v1871_v26 = vmul.f32 %v1845_v12, %v1702_v52 }
 0x385   :  { %v4713_v8 = vpop.eup %4712  ;;  %v1846_v7 = vadd.f32 0.5, %v1820_v29  ;;  %v1821_v51 = vmul.f32 0.5, %v4711_v42  ;;  %v6338_v5 = vadd.f32 %v1711_v44, %v6322_v59  ;;  %v2390_v43 = vpop.f32.mrb[48].mxu0 }
 0x386   :  { %v1713_v55 = vpop.f32.mrb[46].mxu1  ;;  %v4715_v36 = vpop.eup %4714  ;;  %v2551_v45 = vmul.f32 %v2525_v32, %v2381_v17  ;;  %v2526_v30 = vadd.f32 0.5, %v2500_v38  ;;  %v2501_v61 = vmul.f32 0.5, %v4713_v8  ;;  %v1770_v21 = vmul.f32 0.5, %v6335_v40 }
 0x387   :  { %v2392_v18 = vpop.f32.mrb[49].mxu0  ;;  %v1715_v33 = vpop.f32.mrb[47].mxu1  ;;  %v1872_v62 = vmul.f32 %v1846_v7, %v1704_v28  ;;  %v1847_v11 = vadd.f32 0.5, %v1821_v51  ;;  %v2502_v24 = vmul.f32 0.5, %v4715_v36  ;;  %v1771_v12 = vmul.f32 0.5, %v6338_v5 }
 0x388   :  { %v2394_v29 = vpop.f32.mrb[50].mxu0  ;;  %v2552_v52 = vmul.f32 %v2526_v30, %v2383_v63  ;;  %v2527_v42 = vadd.f32 0.5, %v2501_v61  ;;  %4716 = vtanh.f32 %v1770_v21  ;;  %v6343_v44 = vadd.f32 %v2390_v43, %v6319_v60 }
 0x389   :  { %v2396_v53 = vpop.f32.mrb[51].mxu0  ;;  %v1896_v17 = vpack.c.bf16 %v1872_v62, %v6332_v49  ;;  %v1873_v32 = vmul.f32 %v1847_v11, %v1706_v15  ;;  %v2528_v38 = vadd.f32 0.5, %v2502_v24  ;;  %4718 = vtanh.f32 %v1771_v12 }
 0x38a   :  { %v2553_v8 = vmul.f32 %v2527_v42, %v2385_v0  ;;  %v2451_v7 = vmul.f32 0.5, %v6343_v44  ;;  %v6348_v28 = vadd.f32 %v1713_v55, %v6319_v60  ;;  %v6351_v51 = vadd.f32 %v2392_v18, %v6322_v59 }
 0x38b   :  { %v2554_v30 = vmul.f32 %v2528_v38, %v2387_v27  ;;  %v6354_v63 = vadd.f32 %v1715_v33, %v6322_v59  ;;  %v6357_v43 = vadd.f32 %v2394_v29, %v6319_v60  ;;  %v6360_v11 = vadd.f32 %v2396_v53, %v6322_v59 }
 0x38c   :  { %v2577_v24 = vpack.c.bf16 %v2553_v8, %v2551_v45  ;;  %4720 = vtanh.f32 %v2451_v7  ;;  %v1772_v49 = vmul.f32 0.5, %v6348_v28  ;;  %v2452_v15 = vmul.f32 0.5, %v6351_v51  ;;  %v5121_v8 = vld [vmem:[#allocation6] ss:$8 sps:$4 sm:$0xff]  }
 0x38d   :  { %v1773_v0 = vmul.f32 0.5, %v6354_v63  ;;  %v2453_v55 = vmul.f32 0.5, %v6357_v43  ;;  %v1719_v27 = vpop.f32.mrb[48].mxu1  ;;  %v1897_v36 = vpack.c.bf16 %v1873_v32, %v1871_v26  ;;  %v2454_v61 = vmul.f32 0.5, %v6360_v11 }
 0x38e   :  { %4722 = vtanh.f32 %v1772_v49  ;;  %v6368_v21 = vadd.f32 %v1719_v27, %v6319_v60  ;;  %v1721_v53 = vpop.f32.mrb[49].mxu1  ;;  %v2578_v18 = vpack.c.bf16 %v2554_v30, %v2552_v52 }
 0x38f   :  { %4724 = vtanh.f32 %v2452_v15  ;;  %v6371_v45 = vadd.f32 %v1721_v53, %v6322_v59  ;;  %v1723_v33 = vpop.f32.mrb[50].mxu1  ;;  %2113 = vmatprep.mubr.bf16.mxu1 %v1897_v36  ;;  %v5122_v15 = vld [vmem:[#allocation6 + $0x14] ss:$8 sps:$4 sm:$0xff]  }
 0x390   :  { %4726 = vtanh.f32 %v1773_v0  ;;  %v1774_v62 = vmul.f32 0.5, %v6368_v21  ;;  %v2400_v12 = vpop.f32.mrb[52].mxu0  ;;  %v6375_v26 = vadd.f32 %v1723_v33, %v6319_v60  ;;  %v1725_v29 = vpop.f32.mrb[51].mxu1  ;;  %2114 = vmatmul.mubr.bf16.vlgmr.msra.gmra.mrb[68].mxu1 %v1896_v17  ;;  %2623 = vmatprep.mubr.bf16.mxu0 %v2578_v18 }
 0x391   :  { %4728 = vtanh.f32 %v2453_v55  ;;  %v1775_v42 = vmul.f32 0.5, %v6371_v45  ;;  %v6379_v52 = vadd.f32 %v2400_v12, %v6319_v60  ;;  %v2402_v32 = vpop.f32.mrb[53].mxu0  ;;  %v6382_v38 = vadd.f32 %v1725_v29, %v6322_v59  ;;  %2624 = vmatmul.mubr.bf16.vlgmr.msra.gmra.mrb[72].mxu0 %v2577_v24  ;;  %2974 = vmatpush1.bf16.msra.mxu1 %v5121_v8  ;;  %v5123_v12 = vld [vmem:[#allocation6 + $0x10] ss:$8 sps:$4 sm:$0xff]  }
 0x392   :  { %v4717_v7 = vpop.eup %4716  ;;  %4730 = vtanh.f32 %v2454_v61  ;;  %v1776_v30 = vmul.f32 0.5, %v6375_v26  ;;  %v6386_v17 = vadd.f32 %v2402_v32, %v6322_v59  ;;  %v2404_v49 = vpop.f32.mrb[54].mxu0  ;;  %3483 = vmatpush1.bf16.msra.mxu0 %v5121_v8  ;;  %2975 = vmatprep.subr.bf16.mxu1 %v5122_v15 }
 0x393   :  { %v4719_v0 = vpop.eup %4718  ;;  %v1822_v55 = vmul.f32 0.5, %v4717_v7  ;;  %4732 = vtanh.f32 %v1774_v62  ;;  %v2455_v27 = vmul.f32 0.5, %v6379_v52  ;;  %v2406_v36 = vpop.f32.mrb[55].mxu0  ;;  %3484 = vmatprep.subr.bf16.mxu0 %v5122_v15  ;;  %v1777_v61 = vmul.f32 0.5, %v6382_v38 }
 0x394   :  { %4734 = vtanh.f32 %v1775_v42  ;;  %v2456_v24 = vmul.f32 0.5, %v6386_v17  ;;  %v6392_v53 = vadd.f32 %v2404_v49, %v6319_v60  ;;  %v1823_v18 = vmul.f32 0.5, %v4719_v0  ;;  %v5124_v42 = vld [vmem:[#allocation6 + $0x24] ss:$8 sps:$4 sm:$0xff]  }
 0x395   :  { %4736 = vtanh.f32 %v2455_v27  ;;  %v6395_v33 = vadd.f32 %v2406_v36, %v6322_v59  ;;  %2976 = vmatpush1.bf16.msra.mxu1 %v5123_v12  ;;  %v1848_v49 = vadd.f32 0.5, %v1822_v55 }
 0x396   :  { %v4721_v62 = vpop.eup %4720  ;;  %4738 = vtanh.f32 %v1776_v30  ;;  %v2457_v29 = vmul.f32 0.5, %v6392_v53  ;;  %3485 = vmatpush1.bf16.msra.mxu0 %v5123_v12  ;;  %2977 = vmatprep.subr.bf16.mxu1 %v5124_v42  ;;  %v1849_v36 = vadd.f32 0.5, %v1823_v18 }
 0x397   :  { %v2503_v32 = vmul.f32 0.5, %v4721_v62  ;;  %4740 = vtanh.f32 %v2456_v24  ;;  %v2458_v8 = vmul.f32 0.5, %v6395_v33  ;;  %3486 = vmatprep.subr.bf16.mxu0 %v5124_v42 }
 0x398   :  { %v4723_v7 = vpop.eup %4722  ;;  %4742 = vtanh.f32 %v1777_v61  ;;  %v1729_v15 = vpop.f32.mrb[52].mxu1  ;;  %v6421_v41 = vmul.f32 %v1849_v36, %v6338_v5 }
 0x399   :  { %v2410_v0 = vpop.f32.mrb[56].mxu0  ;;  %v4725_v27 = vpop.eup %4724  ;;  %v1824_v2 = vmul.f32 0.5, %v4723_v7  ;;  %4744 = vtanh.f32 %v2457_v29  ;;  %v6400_v30 = vadd.f32 %v1729_v15, %v6319_v60  ;;  %2978 = vmatpush1.bf16.msra.mxu1 %v5125_v20  ;;  %v5126_v29 = vld [vmem:[#allocation6 + $0x34] ss:$8 sps:$4 sm:$0xff]   ;;  %v2529_v15 = vadd.f32 0.5, %v2503_v32 }
 0x39a   :  { %v1731_v12 = vpop.f32.mrb[53].mxu1  ;;  %v2412_v1 = vpop.f32.mrb[57].mxu0  ;;  %v2504_v62 = vmul.f32 0.5, %v4725_v27  ;;  %4746 = vtanh.f32 %v2458_v8  ;;  %v6406_v55 = vadd.f32 %v2410_v0, %v6319_v60  ;;  %3487 = vmatpush1.bf16.msra.mxu0 %v5125_v20  ;;  %2979 = vmatprep.subr.bf16.mxu1 %v5126_v29  ;;  %v6416_v0 = vmul.f32 %v1848_v49, %v6335_v40  ;;  %v5128_v40 = vld [vmem:[#allocation6 + $0x44] ss:$8 sps:$4 sm:$0xff]  }
 0x39b   :  { %v4727_v24 = vpop.eup %4726  ;;  %v6403_v42 = vadd.f32 %v1731_v12, %v6322_v59  ;;  %v1733_v61 = vpop.f32.mrb[54].mxu1  ;;  %v1778_v9 = vmul.f32 0.5, %v6400_v30  ;;  %3488 = vmatprep.subr.bf16.mxu0 %v5126_v29  ;;  %v1850_v37 = vadd.f32 0.5, %v1824_v2 }
 0x39c   :  { %v6408_v18 = vpop.f32.mrb[58].mxu0  ;;  %v4729_v7 = vpop.eup %4728  ;;  %v1825_v4 = vmul.f32 0.5, %v4727_v24  ;;  %v2459_v20 = vmul.f32 0.5, %v6406_v55  ;;  %v2530_v32 = vadd.f32 0.5, %v2504_v62  ;;  %v6427_v5 = vadd.f32 %v1733_v61, %v6319_v60  ;;  %v5129_v61 = vld [vmem:[#allocation6 + $0x40] ss:$8 sps:$4 sm:$0xff]  }
 0x39d   :  { %v6411_v54 = vpop.f32.mrb[55].mxu1  ;;  %v6413_v8 = vpop.f32.mrb[59].mxu0  ;;  %v2505_v12 = vmul.f32 0.5, %v4729_v7  ;;  %v1779_v50 = vmul.f32 0.5, %v6403_v42  ;;  %4748 = vtanh.f32 %v1778_v9  ;;  %2980 = vmatpush1.bf16.msra.mxu1 %v5127_v19  ;;  %v6424_v7 = vmul.f32 %v2529_v15, %v6343_v44 }
 0x39e   :  { %v4731_v27 = vpop.eup %4730  ;;  %v1851_v29 = vadd.f32 0.5, %v1825_v4  ;;  %3489 = vmatpush1.bf16.msra.mxu0 %v5127_v19  ;;  %2981 = vmatprep.subr.bf16.mxu1 %v5128_v40  ;;  %v6432_v4 = vmul.f32 %v1850_v37, %v6348_v28  ;;  %v6435_v44 = vmul.f32 %v2530_v32, %v6351_v51  ;;  %v1780_v28 = vmul.f32 0.5, %v6427_v5 }
 0x39f   :  { %v4733_v23 = vpop.eup %4732  ;;  %v2506_v24 = vmul.f32 0.5, %v4731_v27  ;;  %4750 = vtanh.f32 %v1779_v50  ;;  %v2531_v2 = vadd.f32 0.5, %v2505_v12  ;;  %3490 = vmatprep.subr.bf16.mxu0 %v5128_v40 }
 0x3a0   :  { %v4735_v34 = vpop.eup %4734  ;;  %v1826_v6 = vmul.f32 0.5, %v4733_v23  ;;  %4752 = vtanh.f32 %v2459_v20  ;;  %v1739_v23 = vpop.f32.mrb[56].mxu1  ;;  %v6445_v20 = vmul.f32 %v1851_v29, %v6354_v63 }
 0x3a1   :  { %v4737_v49 = vpop.eup %4736  ;;  %v2532_v62 = vadd.f32 0.5, %v2506_v24  ;;  %v1827_v27 = vmul.f32 0.5, %v4735_v34  ;;  %v6429_v50 = vpop.f32.mrb[60].mxu0  ;;  %v6438_v34 = vadd.f32 %v2412_v1, %v6322_v59  ;;  %2982 = vmatpush1.bf16.msra.mxu1 %v5129_v61  ;;  %v5130_v1 = vld [vmem:[#allocation6 + $0x54] ss:$8 sps:$4 sm:$0xff]   ;;  %4754 = vtanh.f32 %v1780_v28 }
 0x3a2   :  { %v4739_v9 = vpop.eup %4738  ;;  %v1852_v22 = vadd.f32 0.5, %v1826_v6  ;;  %v2507_v13 = vmul.f32 0.5, %v4737_v49  ;;  %v6440_v6 = vpop.f32.mrb[57].mxu1  ;;  %3491 = vmatpush1.bf16.msra.mxu0 %v5129_v61  ;;  %2983 = vmatprep.subr.bf16.mxu1 %v5130_v1  ;;  %v6453_v49 = vmul.f32 %v2531_v2, %v6357_v43 }
 0x3a3   :  { %v4741_v19 = vpop.eup %4740  ;;  %v1828_v36 = vmul.f32 0.5, %v4739_v9  ;;  %v6442_v15 = vpop.f32.mrb[61].mxu0  ;;  %v1853_v24 = vadd.f32 0.5, %v1827_v27  ;;  %v2460_v63 = vmul.f32 0.5, %v6438_v34  ;;  %3492 = vmatprep.subr.bf16.mxu0 %v5130_v1  ;;  %v6461_v16 = vmul.f32 %v2532_v62, %v6360_v11  ;;  %v5132_v11 = vld [vmem:[#allocation6 + $0x64] ss:$8 sps:$4 sm:$0xff]  }
 0x3a4   :  { %v4743_v12 = vpop.eup %4742  ;;  %v2508_v37 = vmul.f32 0.5, %v4741_v19  ;;  %v6448_v51 = vpop.f32.mrb[58].mxu1  ;;  %v2533_v9 = vadd.f32 0.5, %v2507_v13  ;;  %v6464_v61 = vmul.f32 %v1852_v22, %v6368_v21  ;;  %v6471_v1 = vadd.f32 %v6411_v54, %v6322_v59 }
 0x3a5   :  { %v6450_v32 = vpop.f32.mrb[62].mxu0  ;;  %v4745_v40 = vpop.eup %4744  ;;  %v1829_v57 = vmul.f32 0.5, %v4743_v12  ;;  %v1854_v43 = vadd.f32 0.5, %v1828_v36  ;;  %4756 = vtanh.f32 %v2460_v63  ;;  %v5131_v12 = vld [vmem:[#allocation6 + $0x50] ss:$8 sps:$4 sm:$0xff]   ;;  %v6467_v14 = vmul.f32 %v1853_v24, %v6371_v45 }
 0x3a6   :  { %v6456_v29 = vpop.f32.mrb[59].mxu1  ;;  %v6458_v27 = vpop.f32.mrb[63].mxu0  ;;  %v2509_v48 = vmul.f32 0.5, %v4745_v40  ;;  %v2534_v2 = vadd.f32 0.5, %v2508_v37  ;;  %2984 = vmatpush1.bf16.msra.mxu1 %v5131_v12  ;;  %v6475_v22 = vadd.f32 %v6408_v18, %v6319_v60  ;;  %3493 = vmatpush1.bf16.msra.mxu0 %v5131_v12  ;;  %v6478_v62 = vmul.f32 %v2533_v9, %v6379_v52 }
 0x3a7   :  { %v4747_v19 = vpop.eup %4746  ;;  %v1855_v47 = vadd.f32 0.5, %v1829_v57  ;;  %2985 = vmatprep.subr.bf16.mxu1 %v5132_v11  ;;  %v6482_v45 = vadd.f32 %v6413_v8, %v6322_v59  ;;  %v6485_v57 = vadd.f32 %v1739_v23, %v6319_v60  ;;  %3494 = vmatprep.subr.bf16.mxu0 %v5132_v11  ;;  %v1781_v37 = vmul.f32 0.5, %v6471_v1 }
 0x3a8   :  { %v2510_v13 = vmul.f32 0.5, %v4747_v19  ;;  %v4749_v21 = vpop.eup %4748  ;;  %v2535_v36 = vadd.f32 0.5, %v2509_v48  ;;  %v2461_v28 = vmul.f32 0.5, %v6475_v22  ;;  %v6489_v40 = vpop.f32.mrb[60].mxu1  ;;  %v6494_v48 = vmul.f32 %v1854_v43, %v6375_v26 }
 0x3a9   :  { %v4751_v54 = vpop.eup %4750  ;;  %v1830_v18 = vmul.f32 0.5, %v4749_v21  ;;  %v6491_v52 = vpop.f32.mrb[64].mxu0  ;;  %v6497_v8 = vmul.f32 %v2534_v2, %v6386_v17  ;;  %v2462_v23 = vmul.f32 0.5, %v6482_v45  ;;  %v1782_v9 = vmul.f32 0.5, %v6485_v57  ;;  %v5134_v2 = vld [vmem:[#allocation6 + $0x74] ss:$8 sps:$4 sm:$0xff]  }
 0x3aa   :  { %v2536_v24 = vadd.f32 0.5, %v2510_v13  ;;  %v6501_v63 = vpop.f32.mrb[61].mxu1  ;;  %v6503_v19 = vpop.f32.mrb[65].mxu0  ;;  %v5133_v13 = vld [vmem:[#allocation6 + $0x60] ss:$8 sps:$4 sm:$0xff]   ;;  %v6506_v11 = vmul.f32 %v1855_v47, %v6382_v38  ;;  %v1831_v21 = vmul.f32 0.5, %v4751_v54  ;;  %4758 = vtanh.f32 %v1781_v37 }
 0x3ab   :  { %2986 = vmatpush1.bf16.msra.mxu1 %v5133_v13  ;;  %v4753_v12 = vpop.eup %4752  ;;  %v6510_v26 = vadd.f32 %v6440_v6, %v6322_v59  ;;  %v6512_v17 = vpop.f32.mrb[62].mxu1  ;;  %3495 = vmatpush1.bf16.msra.mxu0 %v5133_v13  ;;  %v6517_v39 = vmul.f32 %v2535_v36, %v6392_v53  ;;  %4760 = vtanh.f32 %v2461_v28  ;;  %v6521_v47 = vadd.f32 %v6429_v50, %v6319_v60 }
 0x3ac   :  { %v6514_v43 = vpop.f32.mrb[66].mxu0  ;;  %2987 = vmatprep.subr.bf16.mxu1 %v5134_v2  ;;  %v6525_v38 = vadd.f32 %v6448_v51, %v6319_v60  ;;  %v6527_v6 = vpop.f32.mrb[63].mxu1  ;;  %3496 = vmatprep.subr.bf16.mxu0 %v5134_v2  ;;  %v6532_v37 = vmul.f32 %v2536_v24, %v6395_v33  ;;  %v1856_v13 = vadd.f32 0.5, %v1830_v18  ;;  %4762 = vtanh.f32 %v2462_v23  ;;  %v5135_v51 = vld [vmem:[#allocation6 + $0x70] ss:$8 sps:$4 sm:$0xff]  }
 0x3ad   :  { %v6529_v54 = vpop.f32.mrb[67].mxu0  ;;  %v1783_v53 = vmul.f32 0.5, %v6510_v26  ;;  %v2511_v36 = vmul.f32 0.5, %v4753_v12  ;;  %4764 = vtanh.f32 %v1782_v9  ;;  %v2463_v50 = vmul.f32 0.5, %v6521_v47  ;;  %v4755_v35 = vpop.eup %4754  ;;  %v5136_v24 = vld [vmem:[%s8427_s4 + $0x4] ss:$8 sps:$4 sm:$0xff]  }
 0x3ae   :  { %v1784_v28 = vmul.f32 0.5, %v6525_v38  ;;  %v1857_v25 = vadd.f32 0.5, %v1831_v21  ;;  %v6539_v2 = vadd.f32 %v6442_v15, %v6322_v59  ;;  %v6543_v33 = vadd.f32 %v6456_v29, %v6322_v59 }
 0x3af   :  { %2988 = vmatpush1.bf16.msra.mxu1 %v5135_v51  ;;  %4766 = vtanh.f32 %v1783_v53  ;;  %3497 = vmatpush1.bf16.msra.mxu0 %v5135_v51  ;;  %v4757_v18 = vpop.eup %4756  ;;  %v1832_v23 = vmul.f32 0.5, %v4755_v35  ;;  %v1899_v9 = vpack.c.bf16 %v6445_v20, %v6421_v41  ;;  %v6552_v15 = vadd.f32 %v6450_v32, %v6319_v60 }
 0x3b0   :  { %3218 = vmatprep.subr.bf16.mxu1 %v5136_v24  ;;  %4768 = vtanh.f32 %v2463_v50  ;;  %3727 = vmatprep.subr.bf16.mxu0 %v5136_v24  ;;  %v2512_v12 = vmul.f32 0.5, %v4757_v18  ;;  %v2464_v29 = vmul.f32 0.5, %v6539_v2  ;;  %v1785_v21 = vmul.f32 0.5, %v6543_v33  ;;  %v6556_v53 = vpop.f32.mrb[64].mxu1  ;;  %v6558_v51 = vpop.f32.mrb[68].mxu0 }
 0x3b1   :  { %4770 = vtanh.f32 %v1784_v28  ;;  %v6561_v35 = vmul.f32 %v1856_v13, %v6400_v30  ;;  %2123 = vmatprep.mubr.bf16.mxu1 %v1899_v9  ;;  %v2465_v41 = vmul.f32 0.5, %v6552_v15  ;;  %v1898_v20 = vpack.c.bf16 %v6432_v4, %v6416_v0  ;;  %v6570_v50 = vpop.f32.mrb[65].mxu1  ;;  %v6572_v28 = vpop.f32.mrb[69].mxu0 }
 0x3b2   :  { %v6568_v32 = vadd.f32 %v6458_v27, %v6322_v59  ;;  %v2537_v24 = vadd.f32 0.5, %v2511_v36  ;;  %4772 = vtanh.f32 %v2464_v29  ;;  %v2580_v30 = vpack.c.bf16 %v6461_v16, %v6435_v44  ;;  %v1763_v18 = vpop.f32.mrb[66].mxu1  ;;  %v2444_v9 = vpop.f32.mrb[70].mxu0 }
 0x3b3   :  { %v2579_v13 = vpack.c.bf16 %v6453_v49, %v6424_v7  ;;  %v1858_v10 = vadd.f32 0.5, %v1832_v23  ;;  %4774 = vtanh.f32 %v1785_v21  ;;  %2124 = vmatmul.mubr.bf16.gmra.mrb[72].mxu1 %v1898_v20  ;;  %v6581_v4 = vadd.f32 %v6489_v40, %v6319_v60  ;;  %v1764_v27 = vpop.f32.mrb[67].mxu1  ;;  %v2445_v36 = vpop.f32.mrb[71].mxu0 }
 0x3b4   :  { %v2466_v0 = vmul.f32 0.5, %v6568_v32  ;;  %v4759_v29 = vpop.eup %4758  ;;  %v2538_v31 = vadd.f32 0.5, %v2512_v12  ;;  %4776 = vtanh.f32 %v2465_v41  ;;  %2633 = vmatprep.mubr.bf16.mxu0 %v2580_v30  ;;  %v6585_v16 = vadd.f32 %v6501_v63, %v6322_v59 }
 0x3b5   :  { %v6589_v7 = vadd.f32 %v6491_v52, %v6319_v60  ;;  %v4761_v44 = vpop.eup %4760  ;;  %v1833_v49 = vmul.f32 0.5, %v4759_v29  ;;  %2634 = vmatmul.mubr.bf16.gmra.mrb[76].mxu0 %v2579_v13  ;;  %v1786_v40 = vmul.f32 0.5, %v6581_v4  ;;  %v6594_v23 = vadd.f32 %v6512_v17, %v6319_v60 }
 0x3b6   :  { %4778 = vtanh.f32 %v2466_v0  ;;  %v4763_v12 = vpop.eup %4762  ;;  %v2513_v21 = vmul.f32 0.5, %v4761_v44  ;;  %v1787_v41 = vmul.f32 0.5, %v6585_v16  ;;  %v6600_v52 = vadd.f32 %v6503_v19, %v6322_v59 }
 0x3b7   :  { %v2467_v63 = vmul.f32 0.5, %v6589_v7  ;;  %v4765_v20 = vpop.eup %4764  ;;  %v1859_v30 = vadd.f32 0.5, %v1833_v49  ;;  %v2514_v18 = vmul.f32 0.5, %v4763_v12  ;;  %4780 = vtanh.f32 %v1786_v40 }
 0x3b8   :  { %v1788_v13 = vmul.f32 0.5, %v6594_v23  ;;  %v6604_v17 = vmul.f32 %v1857_v25, %v6403_v42  ;;  %v2539_v0 = vadd.f32 0.5, %v2513_v21  ;;  %v1834_v27 = vmul.f32 0.5, %v4765_v20 }
 0x3b9   :  { %v4767_v9 = vpop.eup %4766  ;;  %4782 = vtanh.f32 %v1787_v41  ;;  %v2540_v29 = vadd.f32 0.5, %v2514_v18  ;;  %v2468_v19 = vmul.f32 0.5, %v6600_v52  ;;  %v6608_v49 = vmul.f32 %v2537_v24, %v6406_v55 }
 0x3ba   :  { %v4769_v36 = vpop.eup %4768  ;;  %v1835_v44 = vmul.f32 0.5, %v4767_v9  ;;  %4784 = vtanh.f32 %v2467_v63  ;;  %v6611_v40 = vmul.f32 %v1858_v10, %v6427_v5  ;;  %v1860_v12 = vadd.f32 0.5, %v1834_v27 }
 0x3bb   :  { %v4771_v46 = vpop.eup %4770  ;;  %4786 = vtanh.f32 %v1788_v13  ;;  %v6614_v25 = vmul.f32 %v2538_v31, %v6438_v34  ;;  %v6617_v42 = vmul.f32 %v1859_v30, %v6471_v1  ;;  %v2515_v41 = vmul.f32 0.5, %v4769_v36 }
 0x3bc   :  { %v1861_v21 = vadd.f32 0.5, %v1835_v44  ;;  %v4773_v63 = vpop.eup %4772  ;;  %v6620_v20 = vmul.f32 %v2539_v0, %v6475_v22  ;;  %v1836_v18 = vmul.f32 0.5, %v4771_v46  ;;  %v6624_v55 = vadd.f32 %v6527_v6, %v6322_v59 }
 0x3bd   :  { %v1901_v10 = vpack.c.bf16 %v6506_v11, %v6467_v14  ;;  %v4775_v5 = vpop.eup %4774  ;;  %v6629_v31 = vmul.f32 %v2540_v29, %v6482_v45  ;;  %v2516_v34 = vmul.f32 0.5, %v4773_v63  ;;  %4788 = vtanh.f32 %v2468_v19 }
 0x3be   :  { %v6633_v1 = vadd.f32 %v6514_v43, %v6319_v60  ;;  %v4777_v22 = vpop.eup %4776  ;;  %v6636_v46 = vmul.f32 %v1860_v12, %v6485_v57  ;;  %v1837_v24 = vmul.f32 0.5, %v4775_v5  ;;  %v1789_v6 = vmul.f32 0.5, %v6624_v55 }
 0x3bf   :  { %2133 = vmatprep.mubr.bf16.mxu1 %v1901_v10  ;;  %v1900_v14 = vpack.c.bf16 %v6494_v48, %v6464_v61  ;;  %v6642_v45 = vmul.f32 %v1861_v21, %v6510_v26  ;;  %v2541_v30 = vadd.f32 0.5, %v2515_v41  ;;  %v2517_v13 = vmul.f32 0.5, %v4777_v22 }
 0x3c0   :  { %v4779_v11 = vpop.eup %4778  ;;  %v2469_v43 = vmul.f32 0.5, %v6633_v1  ;;  %v1862_v9 = vadd.f32 0.5, %v1836_v18  ;;  %4790 = vtanh.f32 %v1789_v6  ;;  %v6647_v57 = vadd.f32 %v6529_v54, %v6322_v59 }
 0x3c1   :  { %v2518_v0 = vmul.f32 0.5, %v4779_v11  ;;  %2134 = vmatmul.mubr.bf16.gmra.mrb[76].mxu1 %v1900_v14  ;;  %v4781_v27 = vpop.eup %4780  ;;  %v2542_v36 = vadd.f32 0.5, %v2516_v34  ;;  %v1863_v29 = vadd.f32 0.5, %v1837_v24  ;;  %v2582_v61 = vpack.c.bf16 %v6532_v37, %v6497_v8 }
 0x3c2   :  { %4792 = vtanh.f32 %v2469_v43  ;;  %v2543_v26 = vadd.f32 0.5, %v2517_v13  ;;  %v1838_v19 = vmul.f32 0.5, %v4781_v27  ;;  %v2470_v12 = vmul.f32 0.5, %v6647_v57 }
 0x3c3   :  { %v4783_v48 = vpop.eup %4782  ;;  %v2544_v44 = vadd.f32 0.5, %v2518_v0  ;;  %v6653_v41 = vmul.f32 %v2541_v30, %v6521_v47  ;;  %2643 = vmatprep.mubr.bf16.mxu0 %v2582_v61  ;;  %v2581_v54 = vpack.c.bf16 %v6517_v39, %v6478_v62  ;;  %v6659_v18 = vadd.f32 %v6556_v53, %v6319_v60 }
 0x3c4   :  { %v4785_v21 = vpop.eup %4784  ;;  %v1839_v63 = vmul.f32 0.5, %v4783_v48  ;;  %v6662_v37 = vmul.f32 %v1862_v9, %v6525_v38  ;;  %v1864_v10 = vadd.f32 0.5, %v1838_v19  ;;  %4794 = vtanh.f32 %v2470_v12 }
 0x3c5   :  { %v4787_v8 = vpop.eup %4786  ;;  %v2519_v5 = vmul.f32 0.5, %v4785_v21  ;;  %v2568_v34 = vmul.f32 %v2542_v36, %v6539_v2  ;;  %2644 = vmatmul.mubr.bf16.gmra.mrb[80].mxu0 %v2581_v54  ;;  %v1790_v22 = vmul.f32 0.5, %v6659_v18  ;;  %v6668_v39 = vadd.f32 %v6570_v50, %v6322_v59 }
 0x3c6   :  { %v1840_v47 = vmul.f32 0.5, %v4787_v8  ;;  %v1889_v62 = vmul.f32 %v1863_v29, %v6543_v33  ;;  %v2569_v53 = vmul.f32 %v2543_v26, %v6552_v15  ;;  %v2570_v38 = vmul.f32 %v2544_v44, %v6568_v32 }
 0x3c7   :  { %v6675_v24 = vadd.f32 %v6558_v51, %v6319_v60  ;;  %v4789_v6 = vpop.eup %4788  ;;  %v6678_v2 = vmul.f32 %v1864_v10, %v6581_v4  ;;  %v1865_v14 = vadd.f32 0.5, %v1839_v63  ;;  %v1791_v30 = vmul.f32 0.5, %v6668_v39 }
 0x3c8   :  { %v1866_v11 = vadd.f32 0.5, %v1840_v47  ;;  %v2545_v50 = vadd.f32 0.5, %v2519_v5  ;;  %4796 = vtanh.f32 %v1790_v22  ;;  %v2443_v15 = vadd.f32 %v6572_v28, %v6322_v59 }
 0x3c9   :  { %v2471_v33 = vmul.f32 0.5, %v6675_v24  ;;  %4798 = vtanh.f32 %v1791_v30  ;;  %v1903_v51 = vpack.c.bf16 %v6617_v42, %v6604_v17  ;;  %v1902_v4 = vpack.c.bf16 %v6611_v40, %v6561_v35  ;;  %v8509_v30 = vld [vmem:[#allocation19_spill] sm:$0xff] }
 0x3ca   :  { %v1892_v32 = vmul.f32 %v1866_v11, %v6594_v23  ;;  %v4791_v13 = vpop.eup %4790  ;;  %v2520_v43 = vmul.f32 0.5, %v4789_v6  ;;  %v2472_v9 = vmul.f32 0.5, %v2443_v15  ;;  %v2584_v0 = vpack.c.bf16 %v6629_v31, %v6614_v25 }
 0x3cb   :  { %4800 = vtanh.f32 %v2471_v33  ;;  %v1841_v36 = vmul.f32 0.5, %v4791_v13  ;;  %2143 = vmatprep.mubr.bf16.mxu1 %v1903_v51  ;;  %v2583_v28 = vpack.c.bf16 %v6620_v20, %v6608_v49  ;;  %v1905_v23 = vpack.c.bf16 %v1889_v62, %v6642_v45  ;;  %v8512_v33 = vld [vmem:[#allocation22_spill] sm:$0xff]  ;;  %v8515_v51 = vld [vmem:[#allocation23_spill] sm:$0xff] }
 0x3cc   :  { %v4793_v27 = vpop.eup %4792  ;;  %v1904_v17 = vpack.c.bf16 %v6662_v37, %v6636_v46  ;;  %4802 = vtanh.f32 %v2472_v9  ;;  %2144 = vmatmul.mubr.bf16.gmra.mrb[80].mxu1 %v1902_v4  ;;  %2653 = vmatprep.mubr.bf16.mxu0 %v2584_v0  ;;  %v2586_v35 = vpack.c.bf16 %v2570_v38, %v2568_v34  ;;  %v2585_v40 = vpack.c.bf16 %v2569_v53, %v6653_v41  ;;  %v5141_v13 = vld [vmem:[%s8427_s4 + $0x20] ss:$8 sps:$4 sm:$0xff]   ;;  %v8518_v0 = vld [vmem:[#allocation34_spill] sm:$0xff] }
 0x3cd   :  { %v2521_v42 = vmul.f32 0.5, %v4793_v27  ;;  %v1867_v29 = vadd.f32 0.5, %v1841_v36  ;;  %2654 = vmatmul.mubr.bf16.gmra.mrb[84].mxu0 %v2583_v28  ;;  %2153 = vmatprep.mubr.bf16.mxu1 %v1905_v23  ;;  %v1906_v25 = vpack.c.bf16 %v1892_v32, %v6678_v2  ;;  %v1891_v49 = vmul.f32 %v1865_v14, %v6585_v16  ;;  %v8514_v32 = vld [vmem:[#allocation25_spill] sm:$0xff]  ;;  %v8519_v36 = vld [vmem:[#allocation18_spill] sm:$0xff]  ;;  %v8520_v28 = vld [vmem:[#allocation35_spill] sm:$0xff] }
 0x3ce   :  { %v4795_v31 = vpop.eup %4794  ;;  %2663 = vmatprep.mubr.bf16.mxu0 %v2586_v35  ;;  %v2546_v20 = vadd.f32 0.5, %v2520_v43  ;;  %v2571_v48 = vmul.f32 %v2545_v50, %v6589_v7  ;;  %v8507_v11 = vmov 0   ;;  %v8510_v50 = vpack.c.bf16 %v5921_v56, %v8509_v30  ;;  %v8511_v56 = vld [vmem:[#allocation24_spill] sm:$0xff]  ;;  %v5142_v43 = vld [vmem:[%s8427_s4 + $0x34] ss:$8 sps:$4 sm:$0xff]   ;;  %v8517_v9 = vld [vmem:[#allocation17_spill] sm:$0xff] }
 0x3cf   :  { %v2547_v61 = vadd.f32 0.5, %v2521_v42  ;;  %v1893_v46 = vmul.f32 %v1867_v29, %v6624_v55  ;;  %v2522_v45 = vmul.f32 0.5, %v4795_v31  ;;  %v8516_v4 = vpack.c.bf16 %v8514_v32, %v8515_v51  ;;  %v5144_v42 = vld [vmem:[%s8427_s4 + $0x44] ss:$8 sps:$4 sm:$0xff]   ;;  %v5159_v51 = vld [vmem:[%s8427_s4 + $0xb0] ss:$8 sps:$4 sm:$0xff]  }
 0x3d0   :  { %v2572_v63 = vmul.f32 %v2546_v20, %v6600_v52  ;;  %v6745_v27 = vadd.f32 %v8518_v0, %v8517_v9  ;;  %v6749_v23 = vadd.f32 %v8520_v28, %v8519_v36  ;;  %v8521_v35 = vld [vmem:[#allocation28_spill] sm:$0xff]  ;;  %v8524_v31 = vld [vmem:[#allocation29_spill] sm:$0xff]  ;;  %v5166_v36 = vld [vmem:[%s8427_s4 + $0xf4] ss:$8 sps:$4 sm:$0xff]  }
 0x3d1   :  { %v2573_v26 = vmul.f32 %v2547_v61, %v6633_v1  ;;  %v2548_v44 = vadd.f32 0.5, %v2522_v45  ;;  %v1907_v19 = vpack.c.bf16 %v1893_v46, %v1891_v49  ;;  %v8525_v61 = vld [vmem:[#allocation27_spill] sm:$0xff]  ;;  %v8540_v30 = vld [vmem:[#allocation40_spill] sm:$0xff] }
 0x3d2   :  { %v4797_v12 = vpop.eup %4796  ;;  %v8526_v49 = vpack.c.bf16 %v8524_v31, %v8525_v61  ;;  %v1308_v20 = vmul.f32 0.5, %v6749_v23  ;;  %v5145_v46 = vld [vmem:[%s8427_s4 + $0x40] ss:$8 sps:$4 sm:$0xff]   ;;  %v5146_v45 = vld [vmem:[%s8427_s4 + $0x54] ss:$8 sps:$4 sm:$0xff]  }
 0x3d3   :  { %v2587_v21 = vpack.c.bf16 %v2573_v26, %v2571_v48  ;;  %v4799_v41 = vpop.eup %4798  ;;  %v2574_v54 = vmul.f32 %v2548_v44, %v6647_v57  ;;  %v1842_v10 = vmul.f32 0.5, %v4797_v12  ;;  %v5147_v48 = vld [vmem:[%s8427_s4 + $0x50] ss:$8 sps:$4 sm:$0xff]   ;;  %v5148_v26 = vld [vmem:[%s8427_s4 + $0x64] ss:$8 sps:$4 sm:$0xff]  }
 0x3d4   :  { %v1843_v37 = vmul.f32 0.5, %v4799_v41  ;;  %2154 = vmatmul.mubr.bf16.gmra.mrb[84].mxu1 %v1904_v17  ;;  %v5143_v17 = vld [vmem:[%s8427_s4 + $0x30] ss:$8 sps:$4 sm:$0xff]   ;;  %v8527_v44 = vld [vmem:[#allocation32_spill] sm:$0xff] }
 0x3d5   :  { %v4801_v8 = vpop.eup %4800  ;;  %2664 = vmatmul.mubr.bf16.gmra.mrb[88].mxu0 %v2585_v40  ;;  %2163 = vmatprep.mubr.bf16.mxu1 %v1907_v19  ;;  %v2588_v16 = vpack.c.bf16 %v2574_v54, %v2572_v63  ;;  %v1868_v22 = vadd.f32 0.5, %v1842_v10  ;;  %v8522_v40 = vld [vmem:[#allocation26_spill] sm:$0xff]  ;;  %v8531_v41 = vld [vmem:[#allocation31_spill] sm:$0xff]  ;;  %v5164_v0 = vld [vmem:[%s8427_s4 + $0xe4] ss:$8 sps:$4 sm:$0xff]  }
 0x3d6   :  { %v4803_v55 = vpop.eup %4802  ;;  %v1869_v7 = vadd.f32 0.5, %v1843_v37  ;;  %v2523_v5 = vmul.f32 0.5, %v4801_v8  ;;  %v8523_v29 = vpack.c.bf16 %v8521_v35, %v8522_v40  ;;  %v8528_v19 = vld [vmem:[#allocation30_spill] sm:$0xff]  ;;  %v5149_v54 = vld [vmem:[%s8427_s4 + $0x60] ss:$8 sps:$4 sm:$0xff]  }
 0x3d7   :  { %v2524_v1 = vmul.f32 0.5, %v4803_v55  ;;  %2673 = vmatprep.mubr.bf16.mxu0 %v2588_v16  ;;  %v1894_v38 = vmul.f32 %v1868_v22, %v6659_v18  ;;  %v5137_v18 = vld [vmem:[%s8427_s4] ss:$8 sps:$4 sm:$0xff]   ;;  %v8529_v12 = vpack.c.bf16 %v8527_v44, %v8528_v19  ;;  %v5150_v8 = vld [vmem:[%s8427_s4 + $0x74] ss:$8 sps:$4 sm:$0xff]  }
 0x3d8   :  { %v1895_v34 = vmul.f32 %v1869_v7, %v6668_v39  ;;  %v2549_v52 = vadd.f32 0.5, %v2523_v5  ;;  %v8508_v39 = vpack.c.bf16 %v5901_v58, %v5887_v3  ;;  %v5139_v3 = vld [vmem:[%s8427_s4 + $0x10] ss:$8 sps:$4 sm:$0xff]   ;;  %v5140_v58 = vld [vmem:[%s8427_s4 + $0x24] ss:$8 sps:$4 sm:$0xff]  }
 0x3d9   :  { %v2550_v47 = vadd.f32 0.5, %v2524_v1  ;;  %v1908_v2 = vpack.c.bf16 %v1894_v38, %v1894_v38  ;;  %v5151_v37 = vld [vmem:[%s8427_s4 + $0x70] ss:$8 sps:$4 sm:$0xff]   ;;  %v5152_v55 = vld [vmem:[%s8427_s4 + $0x84] ss:$8 sps:$4 sm:$0xff]  }
 0x3da   :  { %v1909_v62 = vpack.c.bf16 %v1895_v34, %v1895_v34  ;;  %v2575_v6 = vmul.f32 %v2549_v52, %v6675_v24  ;;  %v5138_v24 = vld [vmem:[%s8427_s4 + $0x14] ss:$8 sps:$4 sm:$0xff]   ;;  %v8533_v7 = vld [vmem:[#allocation37_spill] sm:$0xff]  ;;  %v8534_v5 = vld [vmem:[#allocation36_spill] sm:$0xff] }
 0x3db   :  { %v2576_v53 = vmul.f32 %v2550_v47, %v2443_v15  ;;  %v8513_v15 = vpack.c.bf16 %v8511_v56, %v8512_v33  ;;  %v8535_v1 = vpack.c.bf16 %v8533_v7, %v8534_v5  ;;  %v8536_v34 = vld [vmem:[#allocation39_spill] sm:$0xff]  ;;  %v8537_v47 = vld [vmem:[#allocation38_spill] sm:$0xff]  ;;  %v8547_v35 = vld [vmem:[#allocation21_spill] sm:$0xff] }
 0x3dc   :  { %2164 = vmatmul.mubr.bf16.gmra.mrb[88].mxu1 %v1906_v25  ;;  %v2589_v14 = vpack.c.bf16 %v2575_v6, %v2575_v6  ;;  %v1307_v25 = vmul.f32 0.5, %v6745_v27  ;;  %v8538_v22 = vpack.c.bf16 %v8536_v34, %v8537_v47  ;;  %v5153_v52 = vld [vmem:[%s8427_s4 + $0x80] ss:$8 sps:$4 sm:$0xff]   ;;  %v5155_v6 = vld [vmem:[%s8427_s4 + $0x90] ss:$8 sps:$4 sm:$0xff]  }
 0x3dd   :  { %v2590_v57 = vpack.c.bf16 %v2576_v53, %v2576_v53  ;;  %2674 = vmatmul.mubr.bf16.gmra.mrb[92].mxu0 %v2587_v21  ;;  %2173 = vmatprep.mubr.bf16.mxu1 %v1909_v62  ;;  %v8530_v21 = vld [vmem:[#allocation33_spill] sm:$0xff] }
 0x3de   :  { %4804 = vtanh.f32 %v1307_v25  ;;  %v8532_v63 = vpack.c.bf16 %v8530_v21, %v8531_v41  ;;  %v5157_v56 = vld [vmem:[%s8427_s4 + $0xa0] ss:$8 sps:$4 sm:$0xff]   ;;  %v5163_v9 = vld [vmem:[%s8427_s4 + $0xd0] ss:$8 sps:$4 sm:$0xff]  }
 0x3df   :  { %2683 = vmatprep.mubr.bf16.mxu0 %v2590_v57  ;;  %4806 = vtanh.f32 %v1308_v20  ;;  %v5154_v57 = vld [vmem:[%s8427_s4 + $0x94] ss:$8 sps:$4 sm:$0xff]   ;;  %v5167_v28 = vld [vmem:[%s8427_s4 + $0xf0] ss:$8 sps:$4 sm:$0xff]  }
 0x3e4   :  { %2174 = vmatmul.mubr.bf16.gmra.mrb[92].mxu1 %v1908_v2 }
 0x3e5   :  { %2684 = vmatmul.mubr.bf16.gmra.mrb[96].mxu0 %v2589_v14  ;;  %3005 = vmatprep.mubr.bf16.mxu1 %v8507_v11  ;;  %v5156_v14 = vld [vmem:[%s8427_s4 + $0xa4] ss:$8 sps:$4 sm:$0xff]  }
 0x3e6   :  { %3514 = vmatprep.mubr.bf16.mxu0 %v8507_v11 }
 0x3e8   :  { %v4805_v16 = vpop.eup %4804 }
 0x3e9   :  { %v4807_v10 = vpop.eup %4806  ;;  %v1411_v62 = vmul.f32 0.5, %v4805_v16 }
 0x3ea   :  { %v1412_v53 = vmul.f32 0.5, %v4807_v10 }
 0x3eb   :  { %v1463_v38 = vadd.f32 0.5, %v1411_v62 }
 0x3ec   :  { %3006 = vmatmul.mubr.bf16.vlgmr.msra.gmra.mrb[96].mxu1 %v8508_v39  ;;  %v1464_v2 = vadd.f32 0.5, %v1412_v53  ;;  %v8539_v39 = vld [vmem:[#allocation41_spill] sm:$0xff] }
 0x3ed   :  { %3515 = vmatmul.mubr.bf16.vlgmr.msra.gmra.mrb[100].mxu0 %v8510_v50  ;;  %3015 = vmatprep.mubr.bf16.mxu1 %v8507_v11  ;;  %v8541_v50 = vpack.c.bf16 %v8539_v39, %v8540_v30 }
 0x3ee   :  { %3524 = vmatprep.mubr.bf16.mxu0 %v8507_v11  ;;  %3219 = vmatpush1.bf16.msra.mxu1 %v5137_v18  ;;  %v1516_v33 = vmul.f32 %v1464_v2, %v6749_v23  ;;  %v1566_v23 = vld [vmem:[#allocation12] sm:$0x3] }
 0x3ef   :  { %3728 = vmatpush1.bf16.msra.mxu0 %v5137_v18  ;;  %3220 = vmatprep.subr.bf16.mxu1 %v5138_v24  ;;  %v8542_v18 = vld [vmem:[#allocation43_spill] sm:$0xff]  ;;  %v6866_v40 = vrot.slane %v1566_v23, %v8547_v35 }
 0x3f0   :  { %3729 = vmatprep.subr.bf16.mxu0 %v5138_v24  ;;  %v8543_v24 = vld [vmem:[#allocation42_spill] sm:$0xff] }
 0x3f1   :  { %8548 = vst [vmem:[#allocation24_spill] sm:$0xff] %v6866_v40 }
 0x3f2   :  { %3221 = vmatpush1.bf16.msra.mxu1 %v5139_v3 }
 0x3f3   :  { %3730 = vmatpush1.bf16.msra.mxu0 %v5139_v3  ;;  %3222 = vmatprep.subr.bf16.mxu1 %v5140_v58  ;;  %v8544_v3 = vpack.c.bf16 %v8542_v18, %v8543_v24 }
 0x3f4   :  { %3016 = vmatmul.mubr.bf16.gmra.mrb[100].mxu1 %v8513_v15  ;;  %3731 = vmatprep.subr.bf16.mxu0 %v5140_v58  ;;  %v1515_v58 = vmul.f32 %v1463_v38, %v6745_v27  ;;  %v5158_v15 = vld [vmem:[%s8427_s4 + $0xb4] ss:$8 sps:$4 sm:$0xff]   ;;  %v5165_v27 = vld [vmem:[%s8427_s4 + $0xe0] ss:$8 sps:$4 sm:$0xff]  }
 0x3f5   :  { %3525 = vmatmul.mubr.bf16.gmra.mrb[104].mxu0 %v8516_v4  ;;  %3025 = vmatprep.mubr.bf16.mxu1 %v8507_v11  ;;  %v5160_v4 = vld [vmem:[%s8427_s4 + $0xc4] ss:$8 sps:$4 sm:$0xff]  }
 0x3f6   :  { %3534 = vmatprep.mubr.bf16.mxu0 %v8507_v11  ;;  %3223 = vmatpush1.bf16.msra.mxu1 %v5141_v13  ;;  %v2972_v32 = vpack.c.bf16 %v1515_v58, %v1515_v58 }
 0x3f7   :  { %3732 = vmatpush1.bf16.msra.mxu0 %v5141_v13  ;;  %3224 = vmatprep.subr.bf16.mxu1 %v5142_v43  ;;  %v5161_v13 = vld [vmem:[%s8427_s4 + $0xc0] ss:$8 sps:$4 sm:$0xff]  }
 0x3f8   :  { %3733 = vmatprep.subr.bf16.mxu0 %v5142_v43  ;;  %v5162_v43 = vld [vmem:[%s8427_s4 + $0xd4] ss:$8 sps:$4 sm:$0xff]  }
 0x3fa   :  { %3225 = vmatpush1.bf16.msra.mxu1 %v5143_v17 }
 0x3fb   :  { %3734 = vmatpush1.bf16.msra.mxu0 %v5143_v17  ;;  %3226 = vmatprep.subr.bf16.mxu1 %v5144_v42  ;;  %v8545_v17 = vld [vmem:[#allocation20_spill] sm:$0xff] }
 0x3fc   :  { %3026 = vmatmul.mubr.bf16.gmra.mrb[104].mxu1 %v8523_v29  ;;  %3735 = vmatprep.subr.bf16.mxu0 %v5144_v42  ;;  %v6863_v42 = vrot.slane %v1566_v23, %v8545_v17 }
 0x3fd   :  { %3535 = vmatmul.mubr.bf16.gmra.mrb[108].mxu0 %v8526_v49  ;;  %3035 = vmatprep.mubr.bf16.mxu1 %v8507_v11 }
 0x3fe   :  { %3544 = vmatprep.mubr.bf16.mxu0 %v8507_v11  ;;  %3227 = vmatpush1.bf16.msra.mxu1 %v5145_v46  ;;  %8546 = vst [vmem:[#allocation19_spill] sm:$0xff] %v6863_v42 }
 0x3ff   :  { %3736 = vmatpush1.bf16.msra.mxu0 %v5145_v46  ;;  %3228 = vmatprep.subr.bf16.mxu1 %v5146_v45 }
 0x400   :  { %3737 = vmatprep.subr.bf16.mxu0 %v5146_v45 }
 0x402   :  { %3229 = vmatpush1.bf16.msra.mxu1 %v5147_v48 }
 0x403   :  { %3738 = vmatpush1.bf16.msra.mxu0 %v5147_v48  ;;  %3230 = vmatprep.subr.bf16.mxu1 %v5148_v26 }
 0x404   :  { %3036 = vmatmul.mubr.bf16.gmra.mrb[108].mxu1 %v8529_v12  ;;  %3739 = vmatprep.subr.bf16.mxu0 %v5148_v26 }
 0x405   :  { %3545 = vmatmul.mubr.bf16.gmra.mrb[112].mxu0 %v8532_v63  ;;  %3045 = vmatprep.mubr.bf16.mxu1 %v8507_v11 }
 0x406   :  { %3554 = vmatprep.mubr.bf16.mxu0 %v8507_v11  ;;  %3231 = vmatpush1.bf16.msra.mxu1 %v5149_v54 }
 0x407   :  { %3740 = vmatpush1.bf16.msra.mxu0 %v5149_v54  ;;  %3232 = vmatprep.subr.bf16.mxu1 %v5150_v8 }
 0x408   :  { %3741 = vmatprep.subr.bf16.mxu0 %v5150_v8 }
 0x40a   :  { %3233 = vmatpush1.bf16.msra.mxu1 %v5151_v37 }
 0x40b   :  { %3742 = vmatpush1.bf16.msra.mxu0 %v5151_v37  ;;  %3234 = vmatprep.subr.bf16.mxu1 %v5152_v55 }
 0x40c   :  { %3046 = vmatmul.mubr.bf16.gmra.mrb[112].mxu1 %v8535_v1  ;;  %3743 = vmatprep.subr.bf16.mxu0 %v5152_v55 }
 0x40d   :  { %3555 = vmatmul.mubr.bf16.gmra.mrb[116].mxu0 %v8538_v22  ;;  %3055 = vmatprep.mubr.bf16.mxu1 %v8507_v11 }
 0x40e   :  { %3564 = vmatprep.mubr.bf16.mxu0 %v8507_v11  ;;  %3235 = vmatpush1.bf16.msra.mxu1 %v5153_v52 }
 0x40f   :  { %3744 = vmatpush1.bf16.msra.mxu0 %v5153_v52  ;;  %3236 = vmatprep.subr.bf16.mxu1 %v5154_v57 }
 0x410   :  { %3745 = vmatprep.subr.bf16.mxu0 %v5154_v57 }
 0x412   :  { %3237 = vmatpush1.bf16.msra.mxu1 %v5155_v6 }
 0x413   :  { %3746 = vmatpush1.bf16.msra.mxu0 %v5155_v6  ;;  %3238 = vmatprep.subr.bf16.mxu1 %v5156_v14 }
 0x414   :  { %3056 = vmatmul.mubr.bf16.gmra.mrb[116].mxu1 %v8541_v50  ;;  %3747 = vmatprep.subr.bf16.mxu0 %v5156_v14 }
 0x415   :  { %3565 = vmatmul.mubr.bf16.gmra.mrb[120].mxu0 %v8544_v3  ;;  %3065 = vmatprep.mubr.bf16.mxu1 %v8507_v11 }
 0x416   :  { %3574 = vmatprep.mubr.bf16.mxu0 %v8507_v11  ;;  %3239 = vmatpush1.bf16.msra.mxu1 %v5157_v56  ;;  %v3481_v11 = vpack.c.bf16 %v1516_v33, %v1516_v33 }
 0x417   :  { %3748 = vmatpush1.bf16.msra.mxu0 %v5157_v56  ;;  %3240 = vmatprep.subr.bf16.mxu1 %v5158_v15 }
 0x418   :  { %3749 = vmatprep.subr.bf16.mxu0 %v5158_v15 }
 0x41a   :  { %3241 = vmatpush1.bf16.msra.mxu1 %v5159_v51 }
 0x41b   :  { %3750 = vmatpush1.bf16.msra.mxu0 %v5159_v51  ;;  %3242 = vmatprep.subr.bf16.mxu1 %v5160_v4 }
 0x41c   :  { %3066 = vmatmul.mubr.bf16.gmra.mrb[120].mxu1 %v2972_v32  ;;  %3751 = vmatprep.subr.bf16.mxu0 %v5160_v4 }
 0x41d   :  { %3575 = vmatmul.mubr.bf16.gmra.mrb[124].mxu0 %v3481_v11 }
 0x41e   :  { %3243 = vmatpush1.bf16.msra.mxu1 %v5161_v13 }
 0x41f   :  { %3752 = vmatpush1.bf16.msra.mxu0 %v5161_v13  ;;  %3244 = vmatprep.subr.bf16.mxu1 %v5162_v43 }
 0x420   :  { %3753 = vmatprep.subr.bf16.mxu0 %v5162_v43 }
 0x422   :  { %3245 = vmatpush1.bf16.msra.mxu1 %v5163_v9 }
 0x423   :  { %3754 = vmatpush1.bf16.msra.mxu0 %v5163_v9  ;;  %3246 = vmatprep.subr.bf16.mxu1 %v5164_v0 }
 0x424   :  { %3755 = vmatprep.subr.bf16.mxu0 %v5164_v0 }
 0x426   :  { %3247 = vmatpush1.bf16.msra.mxu1 %v5165_v27 }
 0x427   :  { %3756 = vmatpush1.bf16.msra.mxu0 %v5165_v27  ;;  %3248 = vmatprep.subr.bf16.mxu1 %v5166_v36 }
 0x428   :  { %3757 = vmatprep.subr.bf16.mxu0 %v5166_v36 }
 0x42a   :  { %3249 = vmatpush1.bf16.msra.mxu1 %v5167_v28 }
 0x42b   :  { %3758 = vmatpush1.bf16.msra.mxu0 %v5167_v28 }
 0x463   :  { %v2115_v29 = vpop.f32.mrb[68].mxu1 }
 0x464   :  { %v2116_v25 = vadd.f32 %v2115_v29, %v6863_v42  ;;  %v2117_v31 = vpop.f32.mrb[69].mxu1  ;;  %v2625_v61 = vpop.f32.mrb[72].mxu0 }
 0x465   :  { %v2118_v49 = vadd.f32 %v2117_v31, %v6866_v40  ;;  %v2626_v20 = vadd.f32 %v2625_v61, %v6863_v42  ;;  %v2119_v46 = vpop.f32.mrb[70].mxu1  ;;  %v2627_v45 = vpop.f32.mrb[73].mxu0 }
 0x466   :  { %v2182_v48 = vmul.f32 0.5, %v2116_v25  ;;  %v2120_v26 = vadd.f32 %v2119_v46, %v6863_v42  ;;  %v2628_v44 = vadd.f32 %v2627_v45, %v6866_v40  ;;  %v2121_v19 = vpop.f32.mrb[71].mxu1  ;;  %v2629_v12 = vpop.f32.mrb[74].mxu0 }
 0x467   :  { %v2183_v21 = vmul.f32 0.5, %v2118_v49  ;;  %v2692_v41 = vmul.f32 0.5, %v2626_v20  ;;  %v2122_v63 = vadd.f32 %v2121_v19, %v6866_v40  ;;  %v2630_v54 = vadd.f32 %v2629_v12, %v6863_v42  ;;  %v2631_v8 = vpop.f32.mrb[75].mxu0 }
 0x468   :  { %4808 = vtanh.f32 %v2182_v48  ;;  %v2184_v37 = vmul.f32 0.5, %v2120_v26  ;;  %v2693_v16 = vmul.f32 0.5, %v2628_v44  ;;  %v2632_v55 = vadd.f32 %v2631_v8, %v6866_v40 }
 0x469   :  { %4810 = vtanh.f32 %v2183_v21  ;;  %v2185_v10 = vmul.f32 0.5, %v2122_v63  ;;  %v2694_v7 = vmul.f32 0.5, %v2630_v54 }
 0x46a   :  { %4812 = vtanh.f32 %v2692_v41  ;;  %v2695_v5 = vmul.f32 0.5, %v2632_v55 }
 0x46b   :  { %4814 = vtanh.f32 %v2184_v37 }
 0x46c   :  { %4816 = vtanh.f32 %v2693_v16 }
 0x46d   :  { %4818 = vtanh.f32 %v2185_v10 }
 0x46e   :  { %4820 = vtanh.f32 %v2694_v7 }
 0x46f   :  { %4822 = vtanh.f32 %v2695_v5 }
 0x472   :  { %v4809_v1 = vpop.eup %4808 }
 0x473   :  { %v4811_v34 = vpop.eup %4810  ;;  %v2234_v47 = vmul.f32 0.5, %v4809_v1 }
 0x474   :  { %v4813_v22 = vpop.eup %4812  ;;  %v2235_v62 = vmul.f32 0.5, %v4811_v34 }
 0x475   :  { %v4815_v52 = vpop.eup %4814  ;;  %v2260_v53 = vadd.f32 0.5, %v2234_v47  ;;  %v2744_v57 = vmul.f32 0.5, %v4813_v22 }
 0x476   :  { %v4817_v38 = vpop.eup %4816  ;;  %v2261_v6 = vadd.f32 0.5, %v2235_v62  ;;  %v2236_v2 = vmul.f32 0.5, %v4815_v52 }
 0x477   :  { %v4819_v14 = vpop.eup %4818  ;;  %v2286_v39 = vmul.f32 %v2260_v53, %v2116_v25  ;;  %v2745_v30 = vmul.f32 0.5, %v4817_v38  ;;  %v2770_v50 = vadd.f32 0.5, %v2744_v57 }
 0x478   :  { %v4821_v18 = vpop.eup %4820  ;;  %v2287_v24 = vmul.f32 %v2261_v6, %v2118_v49  ;;  %v2262_v3 = vadd.f32 0.5, %v2236_v2  ;;  %v2237_v58 = vmul.f32 0.5, %v4819_v14 }
 0x479   :  { %v4823_v56 = vpop.eup %4822  ;;  %2312 = vst [vmem:[%s8432_s9] sm:$0xff] %v2286_v39  ;;  %v2771_v33 = vadd.f32 0.5, %v2745_v30  ;;  %v2796_v15 = vmul.f32 %v2770_v50, %v2626_v20  ;;  %v2746_v32 = vmul.f32 0.5, %v4821_v18 }
 0x47a   :  { %2314 = vst.msk [vmem:[%s8432_s9 + $0x8] sm:$0xff] %vm2313_vm0, %v2287_v24  ;;  %v2288_v51 = vmul.f32 %v2262_v3, %v2120_v26  ;;  %v2263_v11 = vadd.f32 0.5, %v2237_v58  ;;  %v2747_v4 = vmul.f32 0.5, %v4823_v56 }
 0x47b   :  { %2848 = vrot.lane.b32.xlu0 %v2796_v15, %s5342_s2  ;;  %v2772_v13 = vadd.f32 0.5, %v2746_v32  ;;  %v2797_v9 = vmul.f32 %v2771_v33, %v2628_v44 }
 0x47c   :  { %2315 = vst [vmem:[%s8432_s9 + $0x30] sm:$0xff] %v2288_v51  ;;  %v2289_v43 = vmul.f32 %v2263_v11, %v2122_v63  ;;  %v2773_v0 = vadd.f32 0.5, %v2747_v4 }
 0x47d   :  { %v2798_v27 = vmul.f32 %v2772_v13, %v2630_v54 }
 0x47e   :  { %2316 = vst.msk [vmem:[%s8432_s9 + $0x38] sm:$0xff] %vm2313_vm0, %v2289_v43  ;;  %v2799_v36 = vmul.f32 %v2773_v0, %v2632_v55 }
 0x47f   :  { %2852 = vrot.lane.b32.xlu1 %v2798_v27, %s5342_s2  ;;  %2850 = vrot.lane.b32.xlu0 %v2797_v9, %s5342_s2 }
 0x483   :  { %2854 = vrot.lane.b32.xlu1 %v2799_v36, %s5342_s2 }
 0x486   :  { %v2125_v28 = vpop.f32.mrb[72].mxu1 }
 0x487   :  { %v2126_v23 = vadd.f32 %v2125_v28, %v6863_v42  ;;  %v2127_v17 = vpop.f32.mrb[73].mxu1 }
 0x488   :  { %v6896_v35 = vadd.f32 %v2127_v17, %v6866_v40  ;;  %v2635_v29 = vpop.f32.mrb[76].mxu0  ;;  %v2129_v25 = vpop.f32.mrb[74].mxu1 }
 0x489   :  { %v2186_v31 = vmul.f32 0.5, %v2126_v23  ;;  %v6899_v61 = vadd.f32 %v2635_v29, %v6863_v42  ;;  %v6902_v49 = vadd.f32 %v2129_v25, %v6863_v42  ;;  %v2637_v20 = vpop.f32.mrb[77].mxu0  ;;  %v2131_v46 = vpop.f32.mrb[75].mxu1 }
 0x48a   :  { %v2187_v45 = vmul.f32 0.5, %v6896_v35  ;;  %v6906_v48 = vadd.f32 %v2637_v20, %v6866_v40  ;;  %v6909_v26 = vadd.f32 %v2131_v46, %v6866_v40  ;;  %v2639_v44 = vpop.f32.mrb[78].mxu0 }
 0x48b   :  { %4824 = vtanh.f32 %v2186_v31  ;;  %v2696_v19 = vmul.f32 0.5, %v6899_v61  ;;  %v2188_v12 = vmul.f32 0.5, %v6902_v49  ;;  %v6914_v21 = vadd.f32 %v2639_v44, %v6863_v42  ;;  %v2641_v41 = vpop.f32.mrb[79].mxu0 }
 0x48c   :  { %4826 = vtanh.f32 %v2187_v45  ;;  %v2697_v63 = vmul.f32 0.5, %v6906_v48  ;;  %v2189_v54 = vmul.f32 0.5, %v6909_v26  ;;  %v6919_v8 = vadd.f32 %v2641_v41, %v6866_v40 }
 0x48d   :  { %4828 = vtanh.f32 %v2696_v19  ;;  %v2698_v37 = vmul.f32 0.5, %v6914_v21 }
 0x48e   :  { %4830 = vtanh.f32 %v2188_v12  ;;  %v2699_v16 = vmul.f32 0.5, %v6919_v8 }
 0x48f   :  { %4832 = vtanh.f32 %v2697_v63 }
 0x490   :  { %4834 = vtanh.f32 %v2189_v54 }
 0x491   :  { %4836 = vtanh.f32 %v2698_v37 }
 0x492   :  { %4838 = vtanh.f32 %v2699_v16 }
 0x494   :  { %v2135_v55 = vpop.f32.mrb[76].mxu1 }
 0x495   :  { %v6924_v10 = vadd.f32 %v2135_v55, %v6863_v42  ;;  %v2137_v7 = vpop.f32.mrb[77].mxu1  ;;  %v4825_v5 = vpop.eup %4824 }
 0x496   :  { %v6927_v1 = vadd.f32 %v2137_v7, %v6866_v40  ;;  %v2139_v34 = vpop.f32.mrb[78].mxu1  ;;  %v4827_v47 = vpop.eup %4826  ;;  %v2238_v22 = vmul.f32 0.5, %v4825_v5 }
 0x497   :  { %v2190_v62 = vmul.f32 0.5, %v6924_v10  ;;  %v6931_v52 = vadd.f32 %v2139_v34, %v6863_v42  ;;  %v2141_v53 = vpop.f32.mrb[79].mxu1  ;;  %v4829_v57 = vpop.eup %4828  ;;  %v2239_v38 = vmul.f32 0.5, %v4827_v47 }
 0x498   :  { %v2191_v6 = vmul.f32 0.5, %v6927_v1  ;;  %v6935_v2 = vadd.f32 %v2141_v53, %v6866_v40  ;;  %v4831_v14 = vpop.eup %4830  ;;  %v2264_v39 = vadd.f32 0.5, %v2238_v22  ;;  %v2748_v30 = vmul.f32 0.5, %v4829_v57  ;;  %v2645_v50 = vpop.f32.mrb[80].mxu0 }
 0x499   :  { %4840 = vtanh.f32 %v2190_v62  ;;  %v2192_v18 = vmul.f32 0.5, %v6931_v52  ;;  %v4833_v24 = vpop.eup %4832  ;;  %v2265_v3 = vadd.f32 0.5, %v2239_v38  ;;  %v2240_v58 = vmul.f32 0.5, %v4831_v14  ;;  %v2647_v33 = vpop.f32.mrb[81].mxu0 }
 0x49a   :  { %4842 = vtanh.f32 %v2191_v6  ;;  %v6939_v56 = vadd.f32 %v2645_v50, %v6863_v42  ;;  %v4835_v15 = vpop.eup %4834  ;;  %v2290_v32 = vmul.f32 %v2264_v39, %v2126_v23  ;;  %v2774_v51 = vadd.f32 0.5, %v2748_v30  ;;  %v2649_v4 = vpop.f32.mrb[82].mxu0 }
 0x49b   :  { %v2749_v11 = vmul.f32 0.5, %v4833_v24  ;;  %4844 = vtanh.f32 %v2192_v18  ;;  %v4837_v13 = vpop.eup %4836  ;;  %v2291_v43 = vmul.f32 %v2265_v3, %v6896_v35  ;;  %v2266_v9 = vadd.f32 0.5, %v2240_v58  ;;  %v2651_v36 = vpop.f32.mrb[83].mxu0 }
 0x49c   :  { %v2241_v0 = vmul.f32 0.5, %v4835_v15  ;;  %v2700_v27 = vmul.f32 0.5, %v6939_v56  ;;  %v4839_v28 = vpop.eup %4838  ;;  %2317 = vst [vmem:[%s8432_s9 + $0x60] sm:$0xff] %v2290_v32  ;;  %v2800_v17 = vmul.f32 %v2774_v51, %v6899_v61  ;;  %v2750_v29 = vmul.f32 0.5, %v4837_v13 }
 0x49d   :  { %v2775_v23 = vadd.f32 0.5, %v2749_v11  ;;  %v6948_v25 = vadd.f32 %v2647_v33, %v6866_v40  ;;  %2318 = vst.msk [vmem:[%s8432_s9 + $0x68] sm:$0xff] %vm2313_vm0, %v2291_v43  ;;  %v2292_v35 = vmul.f32 %v2266_v9, %v6902_v49  ;;  %v2751_v20 = vmul.f32 0.5, %v4839_v28 }
 0x49e   :  { %v2267_v31 = vadd.f32 0.5, %v2241_v0  ;;  %4846 = vtanh.f32 %v2700_v27  ;;  %v2776_v45 = vadd.f32 0.5, %v2750_v29  ;;  %v2193_v44 = vmul.f32 0.5, %v6935_v2  ;;  %2856 = vrot.lane.b32.xlu0 %v2800_v17, %s5342_s2 }
 0x49f   :  { %v2801_v46 = vmul.f32 %v2775_v23, %v6906_v48  ;;  %v2701_v61 = vmul.f32 0.5, %v6948_v25  ;;  %2319 = vst [vmem:[%s8432_s9 + $0x90] sm:$0xff] %v2292_v35  ;;  %v2777_v12 = vadd.f32 0.5, %v2751_v20  ;;  %v6964_v49 = vadd.f32 %v2649_v4, %v6863_v42  ;;  %v2145_v48 = vpop.f32.mrb[80].mxu1 }
 0x4a0   :  { %v2293_v19 = vmul.f32 %v2267_v31, %v6909_v26  ;;  %v6967_v41 = vadd.f32 %v2651_v36, %v6866_v40  ;;  %v2802_v63 = vmul.f32 %v2776_v45, %v6914_v21  ;;  %v6971_v54 = vadd.f32 %v2145_v48, %v6863_v42  ;;  %v2655_v37 = vpop.f32.mrb[84].mxu0  ;;  %v2147_v16 = vpop.f32.mrb[81].mxu1 }
 0x4a1   :  { %4848 = vtanh.f32 %v2701_v61  ;;  %2858 = vrot.lane.b32.xlu1 %v2801_v46, %s5342_s2  ;;  %v2803_v26 = vmul.f32 %v2777_v12, %v6919_v8  ;;  %v2702_v55 = vmul.f32 0.5, %v6964_v49  ;;  %v2149_v7 = vpop.f32.mrb[82].mxu1  ;;  %v2657_v5 = vpop.f32.mrb[85].mxu0  ;;  %v6983_v22 = vadd.f32 %v2655_v37, %v6863_v42 }
 0x4a2   :  { %2320 = vst.msk [vmem:[%s8432_s9 + $0x98] sm:$0xff] %vm2313_vm0, %v2293_v19  ;;  %4850 = vtanh.f32 %v2193_v44  ;;  %v2703_v21 = vmul.f32 0.5, %v6967_v41  ;;  %v2194_v47 = vmul.f32 0.5, %v6971_v54  ;;  %v6986_v62 = vadd.f32 %v2147_v16, %v6866_v40  ;;  %v2659_v8 = vpop.f32.mrb[86].mxu0  ;;  %v2151_v57 = vpop.f32.mrb[83].mxu1  ;;  %2860 = vrot.lane.b32.xlu0 %v2802_v63, %s5342_s2 }
 0x4a3   :  { %v4841_v34 = vpop.eup %4840  ;;  %v6989_v53 = vadd.f32 %v2149_v7, %v6863_v42  ;;  %4852 = vtanh.f32 %v2702_v55  ;;  %v6993_v14 = vadd.f32 %v2657_v5, %v6866_v40  ;;  %v6996_v39 = vadd.f32 %v2659_v8, %v6863_v42  ;;  %v2661_v30 = vpop.f32.mrb[87].mxu0 }
 0x4a4   :  { %v4843_v38 = vpop.eup %4842  ;;  %v2242_v6 = vmul.f32 0.5, %v4841_v34  ;;  %4854 = vtanh.f32 %v2703_v21  ;;  %v2704_v24 = vmul.f32 0.5, %v6983_v22  ;;  %v2195_v3 = vmul.f32 0.5, %v6986_v62 }
 0x4a5   :  { %v4845_v50 = vpop.eup %4844  ;;  %v2243_v18 = vmul.f32 0.5, %v4843_v38  ;;  %2862 = vrot.lane.b32.xlu1 %v2803_v26, %s5342_s2  ;;  %4856 = vtanh.f32 %v2194_v47  ;;  %v2196_v15 = vmul.f32 0.5, %v6989_v53  ;;  %v2705_v51 = vmul.f32 0.5, %v6993_v14 }
 0x4a6   :  { %v2268_v58 = vadd.f32 0.5, %v2242_v6  ;;  %v2244_v33 = vmul.f32 0.5, %v4845_v50  ;;  %4858 = vtanh.f32 %v2704_v24  ;;  %v2706_v11 = vmul.f32 0.5, %v6996_v39 }
 0x4a7   :  { %v2269_v32 = vadd.f32 0.5, %v2243_v18  ;;  %4860 = vtanh.f32 %v2195_v3  ;;  %v7006_v9 = vadd.f32 %v2151_v57, %v6866_v40  ;;  %v2155_v0 = vpop.f32.mrb[84].mxu1  ;;  %v7010_v28 = vadd.f32 %v2661_v30, %v6866_v40 }
 0x4a8   :  { %v4847_v4 = vpop.eup %4846  ;;  %v2294_v13 = vmul.f32 %v2268_v58, %v6924_v10  ;;  %v2270_v43 = vadd.f32 0.5, %v2244_v33  ;;  %4862 = vtanh.f32 %v2196_v15  ;;  %v2665_v17 = vpop.f32.mrb[88].mxu0  ;;  %v7018_v35 = vadd.f32 %v2155_v0, %v6863_v42 }
 0x4a9   :  { %v2295_v27 = vmul.f32 %v2269_v32, %v6927_v1  ;;  %v2752_v36 = vmul.f32 0.5, %v4847_v4  ;;  %v2157_v23 = vpop.f32.mrb[85].mxu1  ;;  %4864 = vtanh.f32 %v2705_v51  ;;  %v2197_v29 = vmul.f32 0.5, %v7006_v9  ;;  %v2667_v31 = vpop.f32.mrb[89].mxu0 }
 0x4aa   :  { %2321 = vst [vmem:[%s8432_s9 + $0xc0] sm:$0xff] %v2294_v13  ;;  %v2296_v10 = vmul.f32 %v2270_v43, %v6931_v52  ;;  %v2159_v1 = vpop.f32.mrb[86].mxu1  ;;  %4866 = vtanh.f32 %v2706_v11  ;;  %v2707_v45 = vmul.f32 0.5, %v7010_v28  ;;  %v7026_v52 = vadd.f32 %v2665_v17, %v6863_v42  ;;  %v2669_v61 = vpop.f32.mrb[90].mxu0 }
 0x4ab   :  { %v4849_v20 = vpop.eup %4848  ;;  %2322 = vst.msk [vmem:[%s8432_s9 + $0xc8] sm:$0xff] %vm2313_vm0, %v2295_v27  ;;  %v2778_v46 = vadd.f32 0.5, %v2752_v36  ;;  %v2161_v44 = vpop.f32.mrb[87].mxu1  ;;  %4868 = vtanh.f32 %v2197_v29  ;;  %v2198_v48 = vmul.f32 0.5, %v7018_v35  ;;  %v7033_v63 = vadd.f32 %v2157_v23, %v6866_v40 }
 0x4ac   :  { %v4851_v19 = vpop.eup %4850  ;;  %2323 = vst [vmem:[%s8432_s9 + $0xf0] sm:$0xff] %v2296_v10  ;;  %v2753_v12 = vmul.f32 0.5, %v4849_v20  ;;  %v7035_v37 = vpop.f32.mrb[91].mxu0  ;;  %4870 = vtanh.f32 %v2707_v45  ;;  %v2708_v55 = vmul.f32 0.5, %v7026_v52  ;;  %v7041_v34 = vadd.f32 %v2159_v1, %v6863_v42 }
 0x4ad   :  { %v2804_v16 = vmul.f32 %v2778_v46, %v6939_v56  ;;  %v2245_v26 = vmul.f32 0.5, %v4851_v19  ;;  %v4853_v21 = vpop.eup %4852  ;;  %4872 = vtanh.f32 %v2198_v48  ;;  %v2199_v5 = vmul.f32 0.5, %v7033_v63 }
 0x4ae   :  { %v2779_v7 = vadd.f32 0.5, %v2753_v12  ;;  %v4855_v47 = vpop.eup %4854  ;;  %v2754_v57 = vmul.f32 0.5, %v4853_v21  ;;  %4874 = vtanh.f32 %v2708_v55  ;;  %v7044_v38 = vadd.f32 %v2667_v31, %v6866_v40 }
 0x4af   :  { %v2271_v8 = vadd.f32 0.5, %v2245_v26  ;;  %2864 = vrot.lane.b32.xlu0 %v2804_v16, %s5342_s2  ;;  %v4857_v56 = vpop.eup %4856  ;;  %v2755_v30 = vmul.f32 0.5, %v4855_v47  ;;  %4876 = vtanh.f32 %v2199_v5  ;;  %v2200_v50 = vmul.f32 0.5, %v7041_v34  ;;  %v7049_v18 = vpop.f32.mrb[88].mxu1 }
 0x4b0   :  { %v2805_v6 = vmul.f32 %v2779_v7, %v6948_v25  ;;  %v4859_v24 = vpop.eup %4858  ;;  %v2780_v58 = vadd.f32 0.5, %v2754_v57  ;;  %v2246_v33 = vmul.f32 0.5, %v4857_v56  ;;  %v2709_v15 = vmul.f32 0.5, %v7044_v38  ;;  %v7053_v32 = vpop.f32.mrb[92].mxu0 }
 0x4b1   :  { %v2297_v3 = vmul.f32 %v2271_v8, %v6935_v2  ;;  %v7055_v51 = vpop.f32.mrb[89].mxu1  ;;  %v4861_v11 = vpop.eup %4860  ;;  %v2781_v4 = vadd.f32 0.5, %v2755_v30  ;;  %v2756_v25 = vmul.f32 0.5, %v4859_v24  ;;  %4878 = vtanh.f32 %v2200_v50 }
 0x4b2   :  { %v7058_v13 = vadd.f32 %v2669_v61, %v6863_v42  ;;  %2866 = vrot.lane.b32.xlu1 %v2805_v6, %s5342_s2  ;;  %v7061_v43 = vpop.f32.mrb[90].mxu1  ;;  %v7063_v2 = vpop.f32.mrb[93].mxu0  ;;  %v2806_v27 = vmul.f32 %v2780_v58, %v6964_v49  ;;  %v2272_v36 = vadd.f32 0.5, %v2246_v33  ;;  %v2247_v17 = vmul.f32 0.5, %v4861_v11 }
 0x4b3   :  { %v4863_v0 = vpop.eup %4862  ;;  %2324 = vst.msk [vmem:[%s8432_s9 + $0xf8] sm:$0xff] %vm2313_vm0, %v2297_v3  ;;  %4880 = vtanh.f32 %v2709_v15  ;;  %v7070_v23 = vpop.f32.mrb[94].mxu0  ;;  %v2807_v1 = vmul.f32 %v2781_v4, %v6967_v41  ;;  %v2782_v31 = vadd.f32 0.5, %v2756_v25  ;;  %v7080_v48 = vadd.f32 %v2161_v44, %v6866_v40 }
 0x4b4   :  { %v7072_v10 = vpop.f32.mrb[91].mxu1  ;;  %v4865_v29 = vpop.eup %4864  ;;  %v2248_v20 = vmul.f32 0.5, %v4863_v0  ;;  %v2710_v46 = vmul.f32 0.5, %v7058_v13  ;;  %v2298_v19 = vmul.f32 %v2272_v36, %v6971_v54  ;;  %v2273_v49 = vadd.f32 0.5, %v2247_v17  ;;  %2868 = vrot.lane.b32.xlu0 %v2806_v27, %s5342_s2 }
 0x4b5   :  { %v7076_v45 = vpop.f32.mrb[95].mxu0  ;;  %v4867_v61 = vpop.eup %4866  ;;  %v2757_v12 = vmul.f32 0.5, %v4865_v29  ;;  %v2808_v26 = vmul.f32 %v2782_v31, %v6983_v22  ;;  %v2201_v5 = vmul.f32 0.5, %v7080_v48  ;;  %v7093_v56 = vadd.f32 %v7035_v37, %v6866_v40 }
 0x4b6   :  { %v4869_v16 = vpop.eup %4868  ;;  %v2274_v41 = vadd.f32 0.5, %v2248_v20  ;;  %v2758_v55 = vmul.f32 0.5, %v4867_v61  ;;  %4882 = vtanh.f32 %v2710_v46  ;;  %2870 = vrot.lane.b32.xlu1 %v2807_v1, %s5342_s2  ;;  %2325 = vst [vmem:[%s8432_s9 + $0x120] sm:$0xff] %v2298_v19  ;;  %v2299_v54 = vmul.f32 %v2273_v49, %v6986_v62 }
 0x4b7   :  { %v4871_v21 = vpop.eup %4870  ;;  %v2783_v7 = vadd.f32 0.5, %v2757_v12  ;;  %v2249_v44 = vmul.f32 0.5, %v4869_v16  ;;  %v7095_v6 = vpop.f32.mrb[92].mxu1  ;;  %4884 = vtanh.f32 %v2201_v5  ;;  %v7117_v36 = vadd.f32 %v7049_v18, %v6863_v42 }
 0x4b8   :  { %v4873_v47 = vpop.eup %4872  ;;  %v2300_v8 = vmul.f32 %v2274_v41, %v6989_v53  ;;  %v2784_v22 = vadd.f32 0.5, %v2758_v55  ;;  %v2759_v57 = vmul.f32 0.5, %v4871_v21  ;;  %2326 = vst.msk [vmem:[%s8432_s9 + $0x128] sm:$0xff] %vm2313_vm0, %v2299_v54  ;;  %2872 = vrot.lane.b32.xlu0 %v2808_v26, %s5342_s2  ;;  %v7103_v53 = vpop.f32.mrb[96].mxu0  ;;  %v7123_v20 = vadd.f32 %v7053_v32, %v6863_v42 }
 0x4b9   :  { %v4875_v30 = vpop.eup %4874  ;;  %v2809_v62 = vmul.f32 %v2783_v7, %v6993_v14  ;;  %v2275_v50 = vadd.f32 0.5, %v2249_v44  ;;  %v2250_v24 = vmul.f32 0.5, %v4873_v47  ;;  %v7105_v3 = vpop.f32.mrb[93].mxu1  ;;  %v2711_v14 = vmul.f32 0.5, %v7093_v56 }
 0x4ba   :  { %v4877_v37 = vpop.eup %4876  ;;  %2327 = vst [vmem:[%s8432_s9 + $0x150] sm:$0xff] %v2300_v8  ;;  %v2810_v58 = vmul.f32 %v2784_v22, %v6996_v39  ;;  %v2785_v33 = vadd.f32 0.5, %v2759_v57  ;;  %v2760_v15 = vmul.f32 0.5, %v4875_v30  ;;  %v2179_v11 = vpop.f32.mrb[94].mxu1  ;;  %v2202_v49 = vmul.f32 0.5, %v7117_v36 }
 0x4bb   :  { %v7112_v4 = vpop.f32.mrb[97].mxu0  ;;  %v2301_v25 = vmul.f32 %v2275_v50, %v7006_v9  ;;  %v2276_v0 = vadd.f32 0.5, %v2250_v24  ;;  %v2251_v27 = vmul.f32 0.5, %v4877_v37  ;;  %2874 = vrot.lane.b32.xlu1 %v2809_v62, %s5342_s2  ;;  %v2180_v29 = vpop.f32.mrb[95].mxu1  ;;  %4886 = vtanh.f32 %v2711_v14 }
 0x4bc   :  { %v2689_v17 = vpop.f32.mrb[98].mxu0  ;;  %v4879_v39 = vpop.eup %4878  ;;  %v2811_v1 = vmul.f32 %v2785_v33, %v7010_v28  ;;  %v2786_v31 = vadd.f32 0.5, %v2760_v15  ;;  %2876 = vrot.lane.b32.xlu0 %v2810_v58, %s5342_s2  ;;  %v2712_v32 = vmul.f32 0.5, %v7123_v20  ;;  %v7136_v16 = vadd.f32 %v7055_v51, %v6866_v40 }
 0x4bd   :  { %v2690_v9 = vpop.f32.mrb[99].mxu0  ;;  %v4881_v46 = vpop.eup %4880  ;;  %2328 = vst.msk [vmem:[%s8432_s9 + $0x158] sm:$0xff] %vm2313_vm0, %v2301_v25  ;;  %v2302_v18 = vmul.f32 %v2276_v0, %v7018_v35  ;;  %v2277_v61 = vadd.f32 0.5, %v2251_v27  ;;  %v2252_v19 = vmul.f32 0.5, %v4879_v39  ;;  %4888 = vtanh.f32 %v2202_v49 }
 0x4be   :  { %v2812_v28 = vmul.f32 %v2786_v31, %v7026_v52  ;;  %v2761_v12 = vmul.f32 0.5, %v4881_v46  ;;  %v7144_v41 = vadd.f32 %v7061_v43, %v6863_v42  ;;  %4890 = vtanh.f32 %v2712_v32 }
 0x4bf   :  { %2329 = vst [vmem:[%s8432_s9 + $0x180] sm:$0xff] %v2302_v18  ;;  %v2303_v35 = vmul.f32 %v2277_v61, %v7033_v63  ;;  %v2278_v26 = vadd.f32 0.5, %v2252_v19  ;;  %2878 = vrot.lane.b32.xlu1 %v2811_v1, %s5342_s2  ;;  %v2203_v51 = vmul.f32 0.5, %v7136_v16  ;;  %v7150_v21 = vadd.f32 %v7063_v2, %v6866_v40  ;;  %v3007_v54 = vpop.f32.mrb[96].mxu1 }
 0x4c0   :  { %v4883_v52 = vpop.eup %4882  ;;  %v2787_v55 = vadd.f32 0.5, %v2761_v12  ;;  %v2204_v7 = vmul.f32 0.5, %v7144_v41  ;;  %v7160_v44 = vadd.f32 %v7070_v23, %v6863_v42  ;;  %2880 = vrot.lane.b32.xlu0 %v2812_v28, %s5342_s2  ;;  %v3516_v5 = vpop.f32.mrb[100].mxu0  ;;  %v7167_v22 = vadd.f32 %v7072_v10, %v6866_v40 }
 0x4c1   :  { %2330 = vst.msk [vmem:[%s8432_s9 + $0x188] sm:$0xff] %vm2313_vm0, %v2303_v35  ;;  %v2304_v63 = vmul.f32 %v2278_v26, %v7041_v34  ;;  %v2762_v43 = vmul.f32 0.5, %v4883_v52  ;;  %v3009_v2 = vpop.f32.mrb[97].mxu1  ;;  %4892 = vtanh.f32 %v2203_v51  ;;  %v2713_v8 = vmul.f32 0.5, %v7150_v21  ;;  %v7169_v57 = vpop.f32.mrb[101].mxu0 }
 0x4c2   :  { %v2813_v47 = vmul.f32 %v2787_v55, %v7044_v38  ;;  %v3011_v34 = vpop.f32.mrb[98].mxu1  ;;  %v4885_v30 = vpop.eup %4884  ;;  %4894 = vtanh.f32 %v2204_v7  ;;  %v2714_v62 = vmul.f32 0.5, %v7160_v44  ;;  %v7177_v38 = vadd.f32 %v7076_v45, %v6866_v40 }
 0x4c3   :  { %2331 = vst [vmem:[%s8432_s9 + $0x1b0] sm:$0xff] %v2304_v63  ;;  %v2788_v23 = vadd.f32 0.5, %v2762_v43  ;;  %v7179_v50 = vpop.f32.mrb[102].mxu0  ;;  %v7181_v10 = vpop.f32.mrb[99].mxu1  ;;  %v2253_v24 = vmul.f32 0.5, %v4885_v30  ;;  %4896 = vtanh.f32 %v2713_v8  ;;  %v2205_v37 = vmul.f32 0.5, %v7167_v22 }
 0x4c4   :  { %v7186_v58 = vadd.f32 %v7095_v6, %v6863_v42  ;;  %2882 = vrot.lane.b32.xlu1 %v2813_v47, %s5342_s2  ;;  %v7189_v33 = vpop.f32.mrb[103].mxu0  ;;  %4898 = vtanh.f32 %v2714_v62  ;;  %v2715_v45 = vmul.f32 0.5, %v7177_v38  ;;  %v7195_v14 = vadd.f32 %v7103_v53, %v6863_v42 }
 0x4c5   :  { %v2814_v15 = vmul.f32 %v2788_v23, %v7058_v13  ;;  %v4887_v11 = vpop.eup %4886  ;;  %v2279_v25 = vadd.f32 0.5, %v2253_v24  ;;  %4900 = vtanh.f32 %v2205_v37  ;;  %v7200_v6 = vadd.f32 %v7105_v3, %v6866_v40 }
 0x4c6   :  { %v2206_v0 = vmul.f32 0.5, %v7186_v58  ;;  %v2763_v27 = vmul.f32 0.5, %v4887_v11  ;;  %4902 = vtanh.f32 %v2715_v45  ;;  %v2716_v13 = vmul.f32 0.5, %v7195_v14 }
 0x4c7   :  { %v7205_v17 = vadd.f32 %v7112_v4, %v6866_v40  ;;  %2884 = vrot.lane.b32.xlu0 %v2814_v15, %s5342_s2  ;;  %v2305_v53 = vmul.f32 %v2279_v25, %v7080_v48  ;;  %v2207_v29 = vmul.f32 0.5, %v7200_v6  ;;  %v7211_v39 = vadd.f32 %v3007_v54, %v6319_v60  ;;  %v7213_v3 = vpop.f32.mrb[100].mxu1  ;;  %v4889_v1 = vpop.eup %4888 }
 0x4c8   :  { %4904 = vtanh.f32 %v2206_v0  ;;  %v2789_v31 = vadd.f32 0.5, %v2763_v27  ;;  %v7217_v4 = vadd.f32 %v3516_v5, %v6319_v60  ;;  %v7219_v46 = vpop.f32.mrb[104].mxu0  ;;  %v7221_v18 = vpop.f32.mrb[101].mxu1  ;;  %v2254_v61 = vmul.f32 0.5, %v4889_v1 }
 0x4c9   :  { %4906 = vtanh.f32 %v2716_v13  ;;  %v2717_v9 = vmul.f32 0.5, %v7205_v17  ;;  %v4891_v48 = vpop.eup %4890  ;;  %2332 = vst.msk [vmem:[%s8432_s9 + $0x1b8] sm:$0xff] %vm2313_vm0, %v2305_v53  ;;  %v3074_v19 = vmul.f32 0.5, %v7211_v39  ;;  %v7229_v49 = vadd.f32 %v3009_v2, %v6322_v59  ;;  %v7231_v28 = vpop.f32.mrb[102].mxu1 }
 0x4ca   :  { %4908 = vtanh.f32 %v2207_v29  ;;  %v7233_v12 = vpop.f32.mrb[105].mxu0  ;;  %v2815_v32 = vmul.f32 %v2789_v31, %v7093_v56  ;;  %v2764_v35 = vmul.f32 0.5, %v4891_v48  ;;  %v3583_v26 = vmul.f32 0.5, %v7217_v4  ;;  %v7239_v55 = vpop.f32.mrb[103].mxu1 }
 0x4cb   :  { %4910 = vtanh.f32 %v2717_v9  ;;  %v7237_v52 = vpop.f32.mrb[106].mxu0  ;;  %v4893_v51 = vpop.eup %4892  ;;  %v2280_v54 = vadd.f32 0.5, %v2254_v61  ;;  %v3075_v63 = vmul.f32 0.5, %v7229_v49  ;;  %v7243_v43 = vadd.f32 %v3011_v34, %v6319_v60 }
 0x4cc   :  { %4912 = vtanh.f32 %v3074_v19  ;;  %v7245_v7 = vpop.f32.mrb[107].mxu0  ;;  %v4895_v5 = vpop.eup %4894  ;;  %v2790_v56 = vadd.f32 0.5, %v2764_v35  ;;  %v2255_v2 = vmul.f32 0.5, %v4893_v51  ;;  %v7249_v47 = vadd.f32 %v7169_v57, %v6322_v59  ;;  %2886 = vrot.lane.b32.xlu1 %v2815_v32, %s5342_s2 }
 0x4cd   :  { %4914 = vtanh.f32 %v3583_v26  ;;  %v4897_v8 = vpop.eup %4896  ;;  %v2306_v30 = vmul.f32 %v2280_v54, %v7117_v36  ;;  %v2256_v23 = vmul.f32 0.5, %v4895_v5  ;;  %v3076_v34 = vmul.f32 0.5, %v7243_v43 }
 0x4ce   :  { %4916 = vtanh.f32 %v3075_v63  ;;  %v4899_v62 = vpop.eup %4898  ;;  %v2816_v24 = vmul.f32 %v2790_v56, %v7123_v20  ;;  %v2281_v37 = vadd.f32 0.5, %v2255_v2  ;;  %v2765_v15 = vmul.f32 0.5, %v4897_v8 }
 0x4cf   :  { %v3584_v45 = vmul.f32 0.5, %v7249_v47  ;;  %v4901_v11 = vpop.eup %4900  ;;  %2333 = vst [vmem:[%s8432_s9 + $0x1e0] sm:$0xff] %v2306_v30  ;;  %v2282_v57 = vadd.f32 0.5, %v2256_v23  ;;  %v2766_v25 = vmul.f32 0.5, %v4899_v62  ;;  %4918 = vtanh.f32 %v3076_v34  ;;  %v7263_v0 = vpop.f32.mrb[104].mxu1 }
 0x4d0   :  { %v7261_v36 = vadd.f32 %v7179_v50, %v6319_v60  ;;  %v4903_v27 = vpop.eup %4902  ;;  %v2307_v20 = vmul.f32 %v2281_v37, %v7136_v16  ;;  %v2791_v13 = vadd.f32 0.5, %v2765_v15  ;;  %v2257_v53 = vmul.f32 0.5, %v4901_v11  ;;  %2888 = vrot.lane.b32.xlu0 %v2816_v24, %s5342_s2  ;;  %v7267_v29 = vpop.f32.mrb[108].mxu0 }
 0x4d1   :  { %4920 = vtanh.f32 %v3584_v45  ;;  %v7269_v1 = vpop.f32.mrb[105].mxu1  ;;  %v2308_v9 = vmul.f32 %v2282_v57, %v7144_v41  ;;  %v2792_v48 = vadd.f32 0.5, %v2766_v25  ;;  %v2767_v50 = vmul.f32 0.5, %v4903_v27  ;;  %v7275_v32 = vpop.f32.mrb[109].mxu0 }
 0x4d2   :  { %v4905_v31 = vpop.eup %4904  ;;  %v3585_v61 = vmul.f32 0.5, %v7261_v36  ;;  %v7273_v19 = vpop.f32.mrb[106].mxu1  ;;  %2334 = vst.msk [vmem:[%s8432_s9 + $0x1e8] sm:$0xff] %vm2313_vm0, %v2307_v20  ;;  %v2817_v35 = vmul.f32 %v2791_v13, %v7150_v21  ;;  %v2283_v26 = vadd.f32 0.5, %v2257_v53  ;;  %v7284_v41 = vadd.f32 %v7181_v10, %v6322_v59 }
 0x4d3   :  { %v4907_v16 = vpop.eup %4906  ;;  %v2258_v51 = vmul.f32 0.5, %v4905_v31  ;;  %v7286_v54 = vpop.f32.mrb[107].mxu1  ;;  %2335 = vst [vmem:[%s8432_s9 + $0x210] sm:$0xff] %v2308_v9  ;;  %v2818_v56 = vmul.f32 %v2792_v48, %v7160_v44  ;;  %v2793_v2 = vadd.f32 0.5, %v2767_v50  ;;  %v7302_v44 = vadd.f32 %v7189_v33, %v6322_v59 }
 0x4d4   :  { %v7288_v63 = vpop.f32.mrb[110].mxu0  ;;  %v4909_v5 = vpop.eup %4908  ;;  %v2768_v8 = vmul.f32 0.5, %v4907_v16  ;;  %4922 = vtanh.f32 %v3585_v61  ;;  %v2309_v10 = vmul.f32 %v2283_v26, %v7167_v22  ;;  %v3077_v62 = vmul.f32 0.5, %v7284_v41  ;;  %2890 = vrot.lane.b32.xlu1 %v2817_v35, %s5342_s2 }
 0x4d5   :  { %v7294_v21 = vpop.f32.mrb[111].mxu0  ;;  %v4911_v30 = vpop.eup %4910  ;;  %v2284_v23 = vadd.f32 0.5, %v2258_v51  ;;  %v2259_v34 = vmul.f32 0.5, %v4909_v5  ;;  %v2819_v37 = vmul.f32 %v2793_v2, %v7177_v38  ;;  %2892 = vrot.lane.b32.xlu0 %v2818_v56, %s5342_s2  ;;  %v3586_v33 = vmul.f32 0.5, %v7302_v44 }
 0x4d6   :  { %v4913_v24 = vpop.eup %4912  ;;  %v2794_v15 = vadd.f32 0.5, %v2768_v8  ;;  %v2769_v45 = vmul.f32 0.5, %v4911_v30  ;;  %2336 = vst.msk [vmem:[%s8432_s9 + $0x218] sm:$0xff] %vm2313_vm0, %v2309_v10  ;;  %4924 = vtanh.f32 %v3077_v62  ;;  %v7320_v48 = vadd.f32 %v7213_v3, %v6319_v60 }
 0x4d7   :  { %v4915_v11 = vpop.eup %4914  ;;  %v2310_v22 = vmul.f32 %v2284_v23, %v7186_v58  ;;  %v2285_v57 = vadd.f32 0.5, %v2259_v34  ;;  %v3126_v25 = vmul.f32 0.5, %v4913_v24  ;;  %v7312_v53 = vpop.f32.mrb[108].mxu1  ;;  %4926 = vtanh.f32 %v3586_v33 }
 0x4d8   :  { %v4917_v38 = vpop.eup %4916  ;;  %v2820_v27 = vmul.f32 %v2794_v15, %v7195_v14  ;;  %v2795_v20 = vadd.f32 0.5, %v2769_v45  ;;  %v3635_v13 = vmul.f32 0.5, %v4915_v11  ;;  %2894 = vrot.lane.b32.xlu1 %v2819_v37, %s5342_s2  ;;  %v7323_v14 = vpop.f32.mrb[109].mxu1  ;;  %v7330_v35 = vadd.f32 %v7219_v46, %v6319_v60 }
 0x4d9   :  { %2337 = vst [vmem:[%s8432_s9 + $0x240] sm:$0xff] %v2310_v22  ;;  %v2311_v31 = vmul.f32 %v2285_v57, %v7200_v6  ;;  %v3152_v9 = vadd.f32 0.5, %v3126_v25  ;;  %v3127_v58 = vmul.f32 0.5, %v4917_v38  ;;  %v7325_v50 = vpop.f32.mrb[112].mxu0  ;;  %v4919_v61 = vpop.eup %4918  ;;  %v7352_v30 = vadd.f32 %v7221_v18, %v6322_v59 }
 0x4da   :  { %v2821_v16 = vmul.f32 %v2795_v20, %v7205_v17  ;;  %2896 = vrot.lane.b32.xlu0 %v2820_v27, %s5342_s2  ;;  %v7333_v6 = vpop.f32.mrb[110].mxu1  ;;  %v7335_v3 = vpop.f32.mrb[113].mxu0  ;;  %v3128_v51 = vmul.f32 0.5, %v4919_v61  ;;  %v3078_v17 = vmul.f32 0.5, %v7320_v48  ;;  %v3661_v2 = vadd.f32 0.5, %v3635_v13 }
 0x4db   :  { %v4921_v26 = vpop.eup %4920  ;;  %2338 = vst.msk [vmem:[%s8432_s9 + $0x248] sm:$0xff] %vm2313_vm0, %v2311_v31  ;;  %v7342_v5 = vpop.f32.mrb[111].mxu1  ;;  %v7347_v46 = vmul.f32 %v3152_v9, %v7211_v39  ;;  %v3587_v8 = vmul.f32 0.5, %v7330_v35  ;;  %v3153_v23 = vadd.f32 0.5, %v3127_v58  ;;  %v7358_v62 = vadd.f32 %v7231_v28, %v6319_v60 }
 0x4dc   :  { %v7344_v56 = vpop.f32.mrb[114].mxu0  ;;  %v3154_v34 = vadd.f32 0.5, %v3128_v51  ;;  %4928 = vtanh.f32 %v3078_v17  ;;  %2898 = vrot.lane.b32.xlu1 %v2821_v16, %s5342_s2  ;;  %v3636_v24 = vmul.f32 0.5, %v4921_v26  ;;  %v3079_v37 = vmul.f32 0.5, %v7352_v30 }
 0x4dd   :  { %v7354_v10 = vpop.f32.mrb[115].mxu0  ;;  %4930 = vtanh.f32 %v3587_v8  ;;  %v7364_v18 = vadd.f32 %v7233_v12, %v6322_v59  ;;  %v3080_v11 = vmul.f32 0.5, %v7358_v62  ;;  %v7372_v28 = vadd.f32 %v7237_v52, %v6319_v60 }
 0x4de   :  { %v4923_v39 = vpop.eup %4922  ;;  %v7367_v15 = vmul.f32 %v3154_v34, %v7243_v43  ;;  %v7375_v22 = vmul.f32 %v3661_v2, %v7217_v4  ;;  %4932 = vtanh.f32 %v3079_v37  ;;  %v7380_v12 = vadd.f32 %v7239_v55, %v6322_v59 }
 0x4df   :  { %v3637_v45 = vmul.f32 0.5, %v4923_v39  ;;  %v3588_v57 = vmul.f32 0.5, %v7364_v18  ;;  %v7382_v25 = vpop.f32.mrb[112].mxu1  ;;  %4934 = vtanh.f32 %v3080_v11  ;;  %v3589_v52 = vmul.f32 0.5, %v7372_v28 }
 0x4e0   :  { %v4925_v43 = vpop.eup %4924  ;;  %v7387_v20 = vpop.f32.mrb[113].mxu1  ;;  %v3662_v13 = vadd.f32 0.5, %v3636_v24  ;;  %v3081_v33 = vmul.f32 0.5, %v7380_v12  ;;  %v7394_v55 = vadd.f32 %v7245_v7, %v6322_v59  ;;  %v7405_v61 = vadd.f32 %v7263_v0, %v6319_v60 }
 0x4e1   :  { %v3663_v27 = vadd.f32 0.5, %v3637_v45  ;;  %v7389_v4 = vpop.f32.mrb[116].mxu0  ;;  %4936 = vtanh.f32 %v3588_v57  ;;  %v7396_v31 = vpop.f32.mrb[114].mxu1  ;;  %v7409_v16 = vadd.f32 %v7267_v29, %v6319_v60  ;;  %v7416_v17 = vmul.f32 %v3153_v23, %v7229_v49 }
 0x4e2   :  { %v7398_v9 = vpop.f32.mrb[117].mxu0  ;;  %4938 = vtanh.f32 %v3589_v52  ;;  %v7411_v26 = vpop.f32.mrb[115].mxu1  ;;  %v7421_v2 = vadd.f32 %v7269_v1, %v6322_v59  ;;  %v3129_v8 = vmul.f32 0.5, %v4925_v43  ;;  %v3082_v34 = vmul.f32 0.5, %v7405_v61 }
 0x4e3   :  { %v7401_v58 = vmul.f32 %v3663_v27, %v7261_v36  ;;  %v7413_v7 = vpop.f32.mrb[118].mxu0  ;;  %v4927_v51 = vpop.eup %4926  ;;  %4940 = vtanh.f32 %v3081_v33  ;;  %v3590_v36 = vmul.f32 0.5, %v7394_v55  ;;  %v3591_v39 = vmul.f32 0.5, %v7409_v16 }
 0x4e4   :  { %v7423_v0 = vpop.f32.mrb[119].mxu0  ;;  %v3638_v24 = vmul.f32 0.5, %v4927_v51  ;;  %v3083_v49 = vmul.f32 0.5, %v7421_v2  ;;  %v7432_v23 = vadd.f32 %v7273_v19, %v6319_v60  ;;  %v7435_v37 = vmul.f32 %v3662_v13, %v7249_v47 }
 0x4e5   :  { %4942 = vtanh.f32 %v3590_v36  ;;  %v7439_v45 = vadd.f32 %v7275_v32, %v6322_v59  ;;  %v7443_v11 = vadd.f32 %v7286_v54, %v6322_v59  ;;  %v7448_v19 = vadd.f32 %v7288_v63, %v6319_v60 }
 0x4e6   :  { %v4929_v1 = vpop.eup %4928  ;;  %4944 = vtanh.f32 %v3082_v34  ;;  %v3084_v27 = vmul.f32 0.5, %v7432_v23  ;;  %v3155_v52 = vadd.f32 0.5, %v3129_v8  ;;  %v3664_v36 = vadd.f32 0.5, %v3638_v24 }
 0x4e7   :  { %v4931_v57 = vpop.eup %4930  ;;  %v3130_v43 = vmul.f32 0.5, %v4929_v1  ;;  %4946 = vtanh.f32 %v3591_v39  ;;  %v7450_v47 = vpop.f32.mrb[116].mxu1  ;;  %v3592_v32 = vmul.f32 0.5, %v7439_v45  ;;  %v3085_v34 = vmul.f32 0.5, %v7443_v11 }
 0x4e8   :  { %8549 = vst [vmem:[#allocation22_spill] sm:$0xff] %v7450_v47  ;;  %v3639_v13 = vmul.f32 0.5, %v4931_v57  ;;  %4948 = vtanh.f32 %v3083_v49  ;;  %v7453_v33 = vpop.f32.mrb[117].mxu1  ;;  %v7455_v54 = vpop.f32.mrb[120].mxu0  ;;  %v3593_v39 = vmul.f32 0.5, %v7448_v19  ;;  %v7465_v29 = vadd.f32 %v7294_v21, %v6322_v59 }
 0x4e9   :  { %8550 = vst [vmem:[#allocation25_spill] sm:$0xff] %v7453_v33  ;;  %8551 = vst [vmem:[#allocation23_spill] sm:$0xff] %v7455_v54  ;;  %v4933_v51 = vpop.eup %4932  ;;  %4950 = vtanh.f32 %v3084_v27  ;;  %v7459_v63 = vpop.f32.mrb[118].mxu1  ;;  %v3156_v57 = vadd.f32 0.5, %v3130_v43  ;;  %v7521_v33 = vadd.f32 %v7335_v3, %v6322_v59 }
 0x4ea   :  { %8552 = vst [vmem:[#allocation17_spill] sm:$0xff] %v7459_v63  ;;  %v7461_v1 = vpop.f32.mrb[121].mxu0  ;;  %v4935_v8 = vpop.eup %4934  ;;  %v3131_v49 = vmul.f32 0.5, %v4933_v51  ;;  %4952 = vtanh.f32 %v3592_v32  ;;  %v3665_v40 = vadd.f32 0.5, %v3639_v13  ;;  %v7473_v63 = vadd.f32 %v7312_v53, %v6319_v60 }
 0x4eb   :  { %8553 = vst [vmem:[#allocation34_spill] sm:$0xff] %v7461_v1  ;;  %v7467_v38 = vpop.f32.mrb[119].mxu1  ;;  %v7469_v24 = vpop.f32.mrb[122].mxu0  ;;  %v3132_v42 = vmul.f32 0.5, %v4935_v8  ;;  %4954 = vtanh.f32 %v3085_v34  ;;  %v7478_v32 = vmul.f32 %v3155_v52, %v7284_v41  ;;  %v3594_v13 = vmul.f32 0.5, %v7465_v29 }
 0x4ec   :  { %8554 = vst [vmem:[#allocation18_spill] sm:$0xff] %v7467_v38  ;;  %8555 = vst [vmem:[#allocation35_spill] sm:$0xff] %v7469_v24  ;;  %v4937_v27 = vpop.eup %4936  ;;  %v7475_v1 = vpop.f32.mrb[123].mxu0  ;;  %v3157_v21 = vadd.f32 0.5, %v3131_v49  ;;  %4956 = vtanh.f32 %v3593_v39  ;;  %v3086_v34 = vmul.f32 0.5, %v7473_v63  ;;  %v7483_v8 = vmul.f32 %v3664_v36, %v7302_v44 }
 0x4ed   :  { %8556 = vst [vmem:[#allocation28_spill] sm:$0xff] %v7475_v1  ;;  %v4939_v43 = vpop.eup %4938  ;;  %v3640_v51 = vmul.f32 0.5, %v4937_v27  ;;  %v3158_v54 = vadd.f32 0.5, %v3132_v42  ;;  %v7486_v53 = vmul.f32 %v3156_v57, %v7320_v48  ;;  %v7490_v41 = vadd.f32 %v7323_v14, %v6322_v59 }
 0x4ee   :  { %v4941_v38 = vpop.eup %4940  ;;  %v3641_v24 = vmul.f32 0.5, %v4939_v43  ;;  %v7493_v39 = vmul.f32 %v3665_v40, %v7330_v35  ;;  %v7496_v42 = vmul.f32 %v3157_v21, %v7352_v30  ;;  %4958 = vtanh.f32 %v3594_v13 }
 0x4ef   :  { %v3133_v1 = vmul.f32 0.5, %v4941_v38  ;;  %v4943_v52 = vpop.eup %4942  ;;  %v7500_v44 = vadd.f32 %v7325_v50, %v6319_v60  ;;  %v7502_v36 = vpop.f32.mrb[120].mxu1  ;;  %v7505_v38 = vmul.f32 %v3158_v54, %v7358_v62  ;;  %v3666_v14 = vadd.f32 0.5, %v3640_v51 }
 0x4f0   :  { %8557 = vst [vmem:[#allocation26_spill] sm:$0xff] %v7502_v36  ;;  %v4945_v48 = vpop.eup %4944  ;;  %v3642_v57 = vmul.f32 0.5, %v4943_v52  ;;  %4960 = vtanh.f32 %v3086_v34  ;;  %v7507_v49 = vpop.f32.mrb[121].mxu1  ;;  %v3667_v30 = vadd.f32 0.5, %v3641_v24  ;;  %v3087_v43 = vmul.f32 0.5, %v7490_v41 }
 0x4f1   :  { %8558 = vst [vmem:[#allocation29_spill] sm:$0xff] %v7507_v49  ;;  %v7509_v40 = vpop.f32.mrb[124].mxu0  ;;  %v4947_v35 = vpop.eup %4946  ;;  %v3134_v27 = vmul.f32 0.5, %v4945_v48  ;;  %v3595_v50 = vmul.f32 0.5, %v7500_v44  ;;  %v3159_v62 = vadd.f32 0.5, %v3133_v1  ;;  %v7517_v34 = vadd.f32 %v7333_v6, %v6319_v60 }
 0x4f2   :  { %8559 = vst [vmem:[#allocation27_spill] sm:$0xff] %v7509_v40  ;;  %v3071_v21 = vpop.f32.mrb[122].mxu1  ;;  %v7513_v13 = vpop.f32.mrb[125].mxu0  ;;  %v3668_v54 = vadd.f32 0.5, %v3642_v57  ;;  %v3643_v51 = vmul.f32 0.5, %v4947_v35  ;;  %4962 = vtanh.f32 %v3087_v43  ;;  %v7524_v1 = vmul.f32 %v3666_v14, %v7364_v18 }
 0x4f3   :  { %8560 = vst [vmem:[#allocation32_spill] sm:$0xff] %v7513_v13  ;;  %v4949_v36 = vpop.eup %4948  ;;  %v3072_v52 = vpop.f32.mrb[123].mxu1  ;;  %v3160_v24 = vadd.f32 0.5, %v3134_v27  ;;  %4964 = vtanh.f32 %v3595_v50  ;;  %v7531_v3 = vmul.f32 %v3159_v62, %v7380_v12  ;;  %v3596_v18 = vmul.f32 0.5, %v7521_v33 }
 0x4f4   :  { %v3580_v40 = vpop.f32.mrb[126].mxu0  ;;  %v4951_v49 = vpop.eup %4950  ;;  %v3135_v48 = vmul.f32 0.5, %v4949_v36  ;;  %v3669_v57 = vadd.f32 0.5, %v3643_v51  ;;  %v7527_v52 = vmul.f32 %v3667_v30, %v7372_v28  ;;  %v3088_v36 = vmul.f32 0.5, %v7517_v34 }
 0x4f5   :  { %v3581_v21 = vpop.f32.mrb[127].mxu0  ;;  %v4953_v13 = vpop.eup %4952  ;;  %v3136_v35 = vmul.f32 0.5, %v4951_v49  ;;  %v7535_v14 = vmul.f32 %v3668_v54, %v7394_v55  ;;  %v7538_v49 = vmul.f32 %v3160_v24, %v7405_v61  ;;  %v7545_v12 = vadd.f32 %v7342_v5, %v6322_v59 }
 0x4f6   :  { %v4955_v6 = vpop.eup %4954  ;;  %v3161_v40 = vadd.f32 0.5, %v3135_v48  ;;  %v3644_v27 = vmul.f32 0.5, %v4953_v13  ;;  %4966 = vtanh.f32 %v3088_v36  ;;  %v7541_v30 = vmul.f32 %v3669_v57, %v7409_v16 }
 0x4f7   :  { %v4957_v43 = vpop.eup %4956  ;;  %v3162_v21 = vadd.f32 0.5, %v3136_v35  ;;  %v3137_v47 = vmul.f32 0.5, %v4955_v6  ;;  %4968 = vtanh.f32 %v3596_v18  ;;  %v3205_v61 = vpack.c.bf16 %v7478_v32, %v7416_v17 }
 0x4f8   :  { %v3670_v28 = vadd.f32 0.5, %v3644_v27  ;;  %v3645_v50 = vmul.f32 0.5, %v4957_v43  ;;  %v4959_v13 = vpop.eup %4958  ;;  %v7548_v62 = vmul.f32 %v3161_v40, %v7421_v2  ;;  %v7554_v54 = vadd.f32 %v7344_v56, %v6319_v60 }
 0x4f9   :  { %v3163_v55 = vadd.f32 0.5, %v3137_v47  ;;  %v7557_v51 = vmul.f32 %v3162_v21, %v7432_v23  ;;  %v3646_v24 = vmul.f32 0.5, %v4959_v13  ;;  %v3089_v5 = vmul.f32 0.5, %v7545_v12  ;;  %3250 = vmatprep.mubr.bf16.mxu1 %v3205_v61 }
 0x4fa   :  { %v4961_v16 = vpop.eup %4960  ;;  %v7562_v48 = vadd.f32 %v7354_v10, %v6322_v59  ;;  %v7565_v2 = vmul.f32 %v3670_v28, %v7439_v45  ;;  %v3597_v17 = vmul.f32 0.5, %v7554_v54  ;;  %v3714_v56 = vpack.c.bf16 %v7483_v8, %v7435_v37 }
 0x4fb   :  { %v3138_v47 = vmul.f32 0.5, %v4961_v16  ;;  %v3671_v32 = vadd.f32 0.5, %v3645_v50  ;;  %4970 = vtanh.f32 %v3089_v5  ;;  %v8561_v23 = vpack.c.bf16 %v7367_v15, %v7347_v46 }
 0x4fc   :  { %v3598_v57 = vmul.f32 0.5, %v7562_v48  ;;  %v7576_v10 = vadd.f32 %v7382_v25, %v6319_v60  ;;  %v4963_v45 = vpop.eup %4962  ;;  %v7579_v35 = vmul.f32 %v3163_v55, %v7443_v11  ;;  %4972 = vtanh.f32 %v3597_v17  ;;  %3759 = vmatprep.mubr.bf16.mxu0 %v3714_v56  ;;  %v8563_v56 = vld [vmem:[#allocation22_spill] sm:$0xff] }
 0x4fd   :  { %3251 = vmatmul.mubr.bf16.vlgmr.msra.gmra.mrb[124].mxu1 %v8561_v23  ;;  %v7583_v37 = vadd.f32 %v7387_v20, %v6322_v59  ;;  %v7587_v46 = vadd.f32 %v7389_v4, %v6319_v60  ;;  %v4965_v15 = vpop.eup %4964  ;;  %v3672_v8 = vadd.f32 0.5, %v3646_v24  ;;  %v3139_v6 = vmul.f32 0.5, %v4963_v45  ;;  %v8564_v23 = vld [vmem:[#allocation25_spill] sm:$0xff] }
 0x4fe   :  { %4974 = vtanh.f32 %v3598_v57  ;;  %v8562_v25 = vpack.c.bf16 %v7401_v58, %v7375_v22  ;;  %v3090_v11 = vmul.f32 0.5, %v7576_v10  ;;  %v3164_v40 = vadd.f32 0.5, %v3138_v47 }
 0x4ff   :  { %v3647_v27 = vmul.f32 0.5, %v4965_v15  ;;  %v3091_v36 = vmul.f32 0.5, %v7583_v37  ;;  %v3599_v20 = vmul.f32 0.5, %v7587_v46  ;;  %v3165_v43 = vadd.f32 0.5, %v3139_v6 }
 0x500   :  { %3760 = vmatmul.mubr.bf16.vlgmr.msra.gmra.mrb[128].mxu0 %v8562_v25  ;;  %4976 = vtanh.f32 %v3090_v11  ;;  %v7597_v4 = vadd.f32 %v7396_v31, %v6319_v60  ;;  %v7601_v21 = vadd.f32 %v7398_v9, %v6322_v59  ;;  %v4967_v22 = vpop.eup %4966  ;;  %v7604_v58 = vmul.f32 %v3671_v32, %v7448_v19 }
 0x501   :  { %4978 = vtanh.f32 %v3091_v36  ;;  %v7608_v18 = vadd.f32 %v7411_v26, %v6322_v59  ;;  %v3207_v28 = vpack.c.bf16 %v7531_v3, %v7496_v42  ;;  %v4969_v50 = vpop.eup %4968  ;;  %v7613_v31 = vmul.f32 %v3672_v8, %v7465_v29 }
 0x502   :  { %v3140_v13 = vmul.f32 0.5, %v4967_v22  ;;  %4980 = vtanh.f32 %v3599_v20  ;;  %v3092_v9 = vmul.f32 0.5, %v7597_v4  ;;  %v7617_v55 = vmul.f32 %v3164_v40, %v7473_v63 }
 0x503   :  { %v3673_v19 = vadd.f32 0.5, %v3647_v27  ;;  %v3600_v61 = vmul.f32 0.5, %v7601_v21  ;;  %v3093_v26 = vmul.f32 0.5, %v7608_v18  ;;  %3260 = vmatprep.mubr.bf16.mxu1 %v3207_v28  ;;  %v7622_v16 = vmul.f32 %v3165_v43, %v7490_v41  ;;  %v8566_v27 = vld [vmem:[#allocation17_spill] sm:$0xff] }
 0x504   :  { %4982 = vtanh.f32 %v3092_v9  ;;  %v7626_v29 = vadd.f32 %v7413_v7, %v6319_v60  ;;  %v3206_v42 = vpack.c.bf16 %v7505_v38, %v7486_v53  ;;  %v3648_v3 = vmul.f32 0.5, %v4969_v50  ;;  %v7667_v50 = vpop.permute.xlu1 %2852 }
 0x505   :  { %4984 = vtanh.f32 %v3600_v61  ;;  %v7632_v63 = vadd.f32 %v7423_v0, %v6322_v59  ;;  %v3716_v24 = vpack.c.bf16 %v7535_v14, %v7524_v1  ;;  %v4971_v5 = vpop.eup %4970  ;;  %v3166_v41 = vadd.f32 0.5, %v3140_v13  ;;  %2942 = vst.msk [vmem:[%s8432_s9 + $0x38] sm:$0xff] %vm2939_vm1, %v7667_v50 }
 0x506   :  { %4986 = vtanh.f32 %v3093_v26  ;;  %v3601_v47 = vmul.f32 0.5, %v7626_v29  ;;  %3261 = vmatmul.mubr.bf16.gmra.mrb[128].mxu1 %v3206_v42  ;;  %v3715_v7 = vpack.c.bf16 %v7527_v52, %v7493_v39  ;;  %v4973_v17 = vpop.eup %4972  ;;  %v7640_v53 = vmul.f32 %v3673_v19, %v7500_v44  ;;  %v8565_v39 = vld [vmem:[#allocation23_spill] sm:$0xff]  ;;  %v7655_v52 = vpop.permute.xlu0 %2848 }
 0x507   :  { %v3141_v38 = vmul.f32 0.5, %v4971_v5  ;;  %v3602_v0 = vmul.f32 0.5, %v7632_v63  ;;  %3769 = vmatprep.mubr.bf16.mxu0 %v3716_v24  ;;  %v7645_v1 = vadd.f32 %v8563_v56, %v6319_v60  ;;  %v3649_v32 = vmul.f32 0.5, %v4973_v17  ;;  %v8567_v5 = vld [vmem:[#allocation34_spill] sm:$0xff]  ;;  %2940 = vst.msk [vmem:[%s8432_s9 + $0x8] sm:$0xff] %vm2939_vm1, %v7655_v52 }
 0x508   :  { %v4975_v14 = vpop.eup %4974  ;;  %4988 = vtanh.f32 %v3601_v47  ;;  %3770 = vmatmul.mubr.bf16.gmra.mrb[132].mxu0 %v3715_v7  ;;  %v7649_v57 = vadd.f32 %v8564_v23, %v6322_v59  ;;  %v7653_v44 = vadd.f32 %v8565_v39, %v6319_v60  ;;  %v3674_v45 = vadd.f32 0.5, %v3648_v3  ;;  %v8568_v47 = vld [vmem:[#allocation18_spill] sm:$0xff] }
 0x509   :  { %v3650_v15 = vmul.f32 0.5, %v4975_v14  ;;  %4990 = vtanh.f32 %v3602_v0  ;;  %v3094_v8 = vmul.f32 0.5, %v7645_v1  ;;  %v7659_v25 = vmul.f32 %v3166_v41, %v7517_v34 }
 0x50a   :  { %v4977_v6 = vpop.eup %4976  ;;  %v3095_v11 = vmul.f32 0.5, %v7649_v57  ;;  %v3603_v40 = vmul.f32 0.5, %v7653_v44  ;;  %v7665_v36 = vadd.f32 %v8566_v27, %v6319_v60  ;;  %v3167_v43 = vadd.f32 0.5, %v3141_v38  ;;  %v7681_v17 = vpop.permute.xlu0 %2850 }
 0x50b   :  { %v4979_v20 = vpop.eup %4978  ;;  %v3675_v22 = vadd.f32 0.5, %v3649_v32  ;;  %v3142_v28 = vmul.f32 0.5, %v4977_v6  ;;  %4992 = vtanh.f32 %v3094_v8  ;;  %v3676_v9 = vadd.f32 0.5, %v3650_v15 }
 0x50c   :  { %v4981_v13 = vpop.eup %4980  ;;  %v3143_v19 = vmul.f32 0.5, %v4979_v20  ;;  %4994 = vtanh.f32 %v3095_v11  ;;  %v3096_v34 = vmul.f32 0.5, %v7665_v36  ;;  %v7671_v61 = vmul.f32 %v3674_v45, %v7521_v33 }
 0x50d   :  { %v3168_v26 = vadd.f32 0.5, %v3142_v28  ;;  %v3651_v42 = vmul.f32 0.5, %v4981_v13  ;;  %4996 = vtanh.f32 %v3603_v40  ;;  %v7675_v41 = vadd.f32 %v8567_v5, %v6322_v59 }
 0x50e   :  { %v4983_v3 = vpop.eup %4982  ;;  %v3169_v24 = vadd.f32 0.5, %v3143_v19  ;;  %4998 = vtanh.f32 %v3096_v34  ;;  %v7679_v7 = vadd.f32 %v8568_v47, %v6322_v59  ;;  %v7684_v33 = vmul.f32 %v3167_v43, %v7545_v12 }
 0x50f   :  { %v4985_v38 = vpop.eup %4984  ;;  %v7687_v0 = vmul.f32 %v3675_v22, %v7554_v54  ;;  %v3144_v56 = vmul.f32 0.5, %v4983_v3  ;;  %v3209_v14 = vpack.c.bf16 %v7579_v35, %v7548_v62  ;;  %v7692_v23 = vmul.f32 %v3676_v9, %v7562_v48  ;;  %v8569_v54 = vld [vmem:[#allocation35_spill] sm:$0xff]  ;;  %v7703_v62 = vpop.permute.xlu1 %2854 }
 0x510   :  { %v4987_v32 = vpop.eup %4986  ;;  %v3652_v39 = vmul.f32 0.5, %v4985_v38  ;;  %v3604_v45 = vmul.f32 0.5, %v7675_v41  ;;  %v3097_v15 = vmul.f32 0.5, %v7679_v7  ;;  %v7697_v8 = vmul.f32 %v3168_v26, %v7576_v10  ;;  %v8570_v10 = vld [vmem:[#allocation28_spill] sm:$0xff]  ;;  %v7716_v34 = vpop.permute.xlu0 %2856  ;;  %v8571_v38 = vld [vmem:[#allocation26_spill] sm:$0xff] }
 0x511   :  { %v3677_v12 = vadd.f32 0.5, %v3651_v42  ;;  %v3145_v6 = vmul.f32 0.5, %v4987_v32  ;;  %3270 = vmatprep.mubr.bf16.mxu1 %v3209_v14  ;;  %v7701_v11 = vadd.f32 %v8569_v54, %v6319_v60  ;;  %v7706_v48 = vmul.f32 %v3169_v24, %v7583_v37  ;;  %2944 = vst.msk [vmem:[%s8432_s9 + $0x68] sm:$0xff] %vm2939_vm1, %v7716_v34 }
 0x512   :  { %v4989_v35 = vpop.eup %4988  ;;  %5000 = vtanh.f32 %v3604_v45  ;;  %v3208_v40 = vpack.c.bf16 %v7557_v51, %v7538_v49  ;;  %v7712_v27 = vadd.f32 %v8570_v10, %v6322_v59  ;;  %v3170_v43 = vadd.f32 0.5, %v3144_v56 }
 0x513   :  { %v4991_v20 = vpop.eup %4990  ;;  %v3678_v22 = vadd.f32 0.5, %v3652_v39  ;;  %v3653_v28 = vmul.f32 0.5, %v4989_v35  ;;  %5002 = vtanh.f32 %v3097_v15  ;;  %v3171_v13 = vadd.f32 0.5, %v3145_v6  ;;  %v8573_v35 = vld [vmem:[#allocation27_spill] sm:$0xff] }
 0x514   :  { %v3654_v9 = vmul.f32 0.5, %v4991_v20  ;;  %v3605_v19 = vmul.f32 0.5, %v7701_v11  ;;  %3271 = vmatmul.mubr.bf16.gmra.mrb[132].mxu1 %v3208_v40  ;;  %v3606_v37 = vmul.f32 0.5, %v7712_v27  ;;  %v7719_v49 = vmul.f32 %v3677_v12, %v7587_v46 }
 0x515   :  { %v4993_v26 = vpop.eup %4992  ;;  %v3679_v51 = vadd.f32 0.5, %v3653_v28  ;;  %v3718_v42 = vpack.c.bf16 %v7613_v31, %v7565_v2  ;;  %v3717_v3 = vpack.c.bf16 %v7604_v58, %v7541_v30  ;;  %v7727_v56 = vadd.f32 %v8571_v38, %v6319_v60  ;;  %v8572_v2 = vld [vmem:[#allocation29_spill] sm:$0xff]  ;;  %v2859_v30 = vpop.permute.xlu1 %2858 }
 0x516   :  { %v4995_v24 = vpop.eup %4994  ;;  %v3680_v5 = vadd.f32 0.5, %v3654_v9  ;;  %v3146_v47 = vmul.f32 0.5, %v4993_v26  ;;  %5004 = vtanh.f32 %v3605_v19  ;;  %v7730_v32 = vmul.f32 %v3170_v43, %v7597_v4 }
 0x517   :  { %v4997_v14 = vpop.eup %4996  ;;  %v3147_v46 = vmul.f32 0.5, %v4995_v24  ;;  %5006 = vtanh.f32 %v3606_v37  ;;  %3779 = vmatprep.mubr.bf16.mxu0 %v3718_v42  ;;  %v7734_v31 = vadd.f32 %v8572_v2, %v6322_v59  ;;  %v3704_v39 = vmul.f32 %v3678_v22, %v7601_v21  ;;  %v2861_v22 = vpop.permute.xlu0 %2860 }
 0x518   :  { %v4999_v58 = vpop.eup %4998  ;;  %v3197_v45 = vmul.f32 %v3171_v13, %v7608_v18  ;;  %v3172_v15 = vadd.f32 0.5, %v3146_v47  ;;  %3780 = vmatmul.mubr.bf16.gmra.mrb[136].mxu0 %v3717_v3  ;;  %v3098_v12 = vmul.f32 0.5, %v7727_v56  ;;  %v7740_v4 = vmul.f32 %v3679_v51, %v7626_v29  ;;  %v8574_v18 = vld [vmem:[#allocation32_spill] sm:$0xff]  ;;  %2946 = vst.msk [vmem:[%s8432_s9 + $0x98] sm:$0xff] %vm2939_vm1, %v2861_v22 }
 0x519   :  { %v3148_v6 = vmul.f32 0.5, %v4999_v58  ;;  %v3099_v54 = vmul.f32 0.5, %v7734_v31  ;;  %v7745_v40 = vadd.f32 %v8573_v35, %v6319_v60  ;;  %v3706_v10 = vmul.f32 %v3680_v5, %v7632_v63  ;;  %v2863_v51 = vpop.permute.xlu1 %2862 }
 0x51a   :  { %v3173_v20 = vadd.f32 0.5, %v3147_v46  ;;  %v3655_v21 = vmul.f32 0.5, %v4997_v14  ;;  %v7750_v43 = vadd.f32 %v8574_v18, %v6322_v59  ;;  %v7753_v28 = vmul.f32 %v3172_v15, %v7645_v1 }
 0x51b   :  { %v3174_v29 = vadd.f32 0.5, %v3148_v6  ;;  %5008 = vtanh.f32 %v3099_v54  ;;  %v3607_v13 = vmul.f32 0.5, %v7745_v40  ;;  %v3211_v63 = vpack.c.bf16 %v7684_v33, %v7622_v16 }
 0x51c   :  { %v5001_v9 = vpop.eup %5000  ;;  %5010 = vtanh.f32 %v3098_v12  ;;  %v3608_v60 = vmul.f32 0.5, %v7750_v43  ;;  %v3210_v19 = vpack.c.bf16 %v7659_v25, %v7617_v55  ;;  %v3720_v26 = vpack.c.bf16 %v7692_v23, %v7671_v61 }
 0x51d   :  { %v5003_v59 = vpop.eup %5002  ;;  %v7762_v37 = vmul.f32 %v3174_v29, %v7665_v36  ;;  %v3656_v1 = vmul.f32 0.5, %v5001_v9  ;;  %5012 = vtanh.f32 %v3607_v13  ;;  %3280 = vmatprep.mubr.bf16.mxu1 %v3211_v63  ;;  %v3719_v3 = vpack.c.bf16 %v7687_v0, %v7640_v53 }
 0x51e   :  { %v3149_v42 = vmul.f32 0.5, %v5003_v59  ;;  %5014 = vtanh.f32 %v3608_v60  ;;  %v3213_v16 = vpack.c.bf16 %v3197_v45, %v7706_v48  ;;  %v3681_v33 = vadd.f32 0.5, %v3655_v21  ;;  %3281 = vmatmul.mubr.bf16.gmra.mrb[136].mxu1 %v3210_v19  ;;  %3789 = vmatprep.mubr.bf16.mxu0 %v3720_v26 }
 0x51f   :  { %v3212_v55 = vpack.c.bf16 %v7730_v32, %v7697_v8  ;;  %v3722_v25 = vpack.c.bf16 %v3706_v10, %v3704_v39  ;;  %v3721_v36 = vpack.c.bf16 %v7740_v4, %v7719_v49  ;;  %v3214_v24 = vpack.c.bf16 %v7762_v37, %v7753_v28 }
 0x520   :  { %v5005_v61 = vpop.eup %5004  ;;  %v3175_v23 = vadd.f32 0.5, %v3149_v42  ;;  %3790 = vmatmul.mubr.bf16.gmra.mrb[140].mxu0 %v3719_v3  ;;  %3290 = vmatprep.mubr.bf16.mxu1 %v3213_v16  ;;  %v2900_v53 = vsel %vm2313_vm0, %v7655_v52, %v7681_v17  ;;  %v3199_v8 = vmul.f32 %v3173_v20, %v7649_v57  ;;  %v2901_v57 = vsel %vm2313_vm0, %v7667_v50, %v7703_v62 }
 0x521   :  { %v2865_v0 = vpop.permute.xlu0 %2864  ;;  %v5007_v48 = vpop.eup %5006  ;;  %v3657_v5 = vmul.f32 0.5, %v5005_v61  ;;  %3799 = vmatprep.mubr.bf16.mxu0 %v3722_v25  ;;  %2941 = vst [vmem:[%s8432_s9 + $0x10] sm:$0xff] %v2900_v53  ;;  %v2902_v52 = vsel %vm2313_vm0, %v7716_v34, %v2859_v30  ;;  %v3682_v50 = vadd.f32 0.5, %v3656_v1  ;;  %2943 = vst [vmem:[%s8432_s9 + $0x40] sm:$0xff] %v2901_v57  ;;  %v2903_v34 = vsel %vm2313_vm0, %v2861_v22, %v2863_v51 }
 0x522   :  { %2948 = vst.msk [vmem:[%s8432_s9 + $0xc8] sm:$0xff] %vm2939_vm1, %v2865_v0  ;;  %v3201_v17 = vmul.f32 %v3175_v23, %v7679_v7  ;;  %v3658_v62 = vmul.f32 0.5, %v5007_v48  ;;  %2945 = vst [vmem:[%s8432_s9 + $0x70] sm:$0xff] %v2902_v52  ;;  %v3707_v46 = vmul.f32 %v3681_v33, %v7653_v44  ;;  %v8576_v52 = vld [vmem:[#allocation24_spill] sm:$0xff] }
 0x523   :  { %v3683_v49 = vadd.f32 0.5, %v3657_v5  ;;  %2947 = vst [vmem:[%s8432_s9 + $0xa0] sm:$0xff] %v2903_v34  ;;  %v3708_v58 = vmul.f32 %v3682_v50, %v7675_v41 }
 0x524   :  { %v2867_v47 = vpop.permute.xlu1 %2866  ;;  %v3684_v38 = vadd.f32 0.5, %v3658_v62  ;;  %v3215_v14 = vpack.c.bf16 %v3201_v17, %v3199_v8  ;;  %v8575_v8 = vld [vmem:[#allocation19_spill] sm:$0xff] }
 0x525   :  { %v2904_v7 = vsel %vm2313_vm0, %v2865_v0, %v2867_v47  ;;  %v5009_v32 = vpop.eup %5008  ;;  %v3709_v2 = vmul.f32 %v3683_v49, %v7701_v11 }
 0x526   :  { %2949 = vst [vmem:[%s8432_s9 + $0xd0] sm:$0xff] %v2904_v7  ;;  %v5011_v30 = vpop.eup %5010  ;;  %v3710_v39 = vmul.f32 %v3684_v38, %v7712_v27  ;;  %v3151_v45 = vmul.f32 0.5, %v5009_v32  ;;  %v2869_v15 = vpop.permute.xlu0 %2868  ;;  %3291 = vmatmul.mubr.bf16.gmra.mrb[140].mxu1 %v3212_v55 }
 0x527   :  { %v5013_v12 = vpop.eup %5012  ;;  %v3723_v4 = vpack.c.bf16 %v3709_v2, %v3707_v46  ;;  %2950 = vst.msk [vmem:[%s8432_s9 + $0xf8] sm:$0xff] %vm2939_vm1, %v2869_v15  ;;  %3300 = vmatprep.mubr.bf16.mxu1 %v3215_v14  ;;  %v3150_v35 = vmul.f32 0.5, %v5011_v30 }
 0x528   :  { %v2871_v44 = vpop.permute.xlu1 %2870  ;;  %v5015_v11 = vpop.eup %5014  ;;  %v3177_v6 = vadd.f32 0.5, %v3151_v45  ;;  %3800 = vmatmul.mubr.bf16.gmra.mrb[144].mxu0 %v3721_v36  ;;  %v3724_v54 = vpack.c.bf16 %v3710_v39, %v3708_v58  ;;  %v3659_v20 = vmul.f32 0.5, %v5013_v12 }
 0x529   :  { %v2905_v41 = vsel %vm2313_vm0, %v2869_v15, %v2871_v44  ;;  %v3660_v27 = vmul.f32 0.5, %v5015_v11  ;;  %v3176_v13 = vadd.f32 0.5, %v3150_v35 }
 0x52a   :  { %2951 = vst [vmem:[%s8432_s9 + $0x100] sm:$0xff] %v2905_v41  ;;  %v3203_v10 = vmul.f32 %v3177_v6, %v7734_v31  ;;  %3809 = vmatprep.mubr.bf16.mxu0 %v3724_v54  ;;  %v2873_v21 = vpop.permute.xlu0 %2872  ;;  %v3685_v63 = vadd.f32 0.5, %v3659_v20 }
 0x52b   :  { %v3686_v18 = vadd.f32 0.5, %v3660_v27  ;;  %2952 = vst.msk [vmem:[%s8432_s9 + $0x128] sm:$0xff] %vm2939_vm1, %v2873_v21  ;;  %v3202_v59 = vmul.f32 %v3176_v13, %v7727_v56 }
 0x52c   :  { %v3217_v22 = vpack.c.bf16 %v3203_v10, %v3203_v10  ;;  %v3711_v26 = vmul.f32 %v3685_v63, %v7745_v40 }
 0x52d   :  { %v2875_v29 = vpop.permute.xlu1 %2874  ;;  %v3712_v9 = vmul.f32 %v3686_v18, %v7750_v43  ;;  %v3216_v37 = vpack.c.bf16 %v3202_v59, %v3202_v59 }
 0x52e   :  { %v2906_v60 = vsel %vm2313_vm0, %v2873_v21, %v2875_v29  ;;  %v2877_v31 = vpop.permute.xlu0 %2876  ;;  %3301 = vmatmul.mubr.bf16.gmra.mrb[144].mxu1 %v3214_v24  ;;  %v3725_v42 = vpack.c.bf16 %v3711_v26, %v3711_v26 }
 0x52f   :  { %2953 = vst [vmem:[%s8432_s9 + $0x130] sm:$0xff] %v2906_v60  ;;  %v3726_v19 = vpack.c.bf16 %v3712_v9, %v3712_v9  ;;  %2954 = vst.msk [vmem:[%s8432_s9 + $0x158] sm:$0xff] %vm2939_vm1, %v2877_v31  ;;  %3310 = vmatprep.mubr.bf16.mxu1 %v3217_v22 }
 0x530   :  { %3810 = vmatmul.mubr.bf16.gmra.mrb[148].mxu0 %v3723_v4 }
 0x531   :  { %v2879_v43 = vpop.permute.xlu1 %2878  ;;  %3819 = vmatprep.mubr.bf16.mxu0 %v3726_v19 }
 0x532   :  { %v2907_v1 = vsel %vm2313_vm0, %v2877_v31, %v2879_v43  ;;  %v2881_v28 = vpop.permute.xlu0 %2880 }
 0x533   :  { %2955 = vst [vmem:[%s8432_s9 + $0x160] sm:$0xff] %v2907_v1  ;;  %2956 = vst.msk [vmem:[%s8432_s9 + $0x188] sm:$0xff] %vm2939_vm1, %v2881_v28 }
 0x536   :  { %v2883_v51 = vpop.permute.xlu1 %2882  ;;  %3311 = vmatmul.mubr.bf16.gmra.mrb[148].mxu1 %v3216_v37 }
 0x537   :  { %v2908_v56 = vsel %vm2313_vm0, %v2881_v28, %v2883_v51 }
 0x538   :  { %2957 = vst [vmem:[%s8432_s9 + $0x190] sm:$0xff] %v2908_v56  ;;  %3820 = vmatmul.mubr.bf16.gmra.mrb[152].mxu0 %v3725_v42 }
 0x539   :  { %v2885_v40 = vpop.permute.xlu0 %2884 }
 0x53a   :  { %2958 = vst.msk [vmem:[%s8432_s9 + $0x1b8] sm:$0xff] %vm2939_vm1, %v2885_v40 }
 0x53e   :  { %v2887_v3 = vpop.permute.xlu1 %2886 }
 0x53f   :  { %v2909_v16 = vsel %vm2313_vm0, %v2885_v40, %v2887_v3 }
 0x540   :  { %2959 = vst [vmem:[%s8432_s9 + $0x1c0] sm:$0xff] %v2909_v16 }
 0x542   :  { %v2889_v33 = vpop.permute.xlu0 %2888 }
 0x543   :  { %2960 = vst.msk [vmem:[%s8432_s9 + $0x1e8] sm:$0xff] %vm2939_vm1, %v2889_v33 }
 0x546   :  { %v2891_v55 = vpop.permute.xlu1 %2890 }
 0x547   :  { %v2910_v25 = vsel %vm2313_vm0, %v2889_v33, %v2891_v55  ;;  %v2893_v36 = vpop.permute.xlu0 %2892 }
 0x548   :  { %2961 = vst [vmem:[%s8432_s9 + $0x1f0] sm:$0xff] %v2910_v25  ;;  %2962 = vst.msk [vmem:[%s8432_s9 + $0x218] sm:$0xff] %vm2939_vm1, %v2893_v36 }
 0x54a   :  { %v2895_v61 = vpop.permute.xlu1 %2894 }
 0x54b   :  { %v2911_v23 = vsel %vm2313_vm0, %v2893_v36, %v2895_v61 }
 0x54c   :  { %v2897_v24 = vpop.permute.xlu0 %2896  ;;  %2963 = vst [vmem:[%s8432_s9 + $0x220] sm:$0xff] %v2911_v23 }
 0x54d   :  { %2964 = vst.msk [vmem:[%s8432_s9 + $0x248] sm:$0xff] %vm2939_vm1, %v2897_v24 }
 0x54e   :  { %v2899_v53 = vpop.permute.xlu1 %2898 }
 0x54f   :  { %v2912_v0 = vsel %vm2313_vm0, %v2897_v24, %v2899_v53 }
 0x550   :  { %2965 = vst [vmem:[%s8432_s9 + $0x250] sm:$0xff] %v2912_v0 }
 0x5d0   :  { %v3252_v48 = vpop.f32.mrb[124].mxu1 }
 0x5d1   :  { %v7901_v5 = vadd.f32 %v3252_v48, %v8575_v8  ;;  %v3254_v57 = vpop.f32.mrb[125].mxu1 }
 0x5d2   :  { %v7904_v50 = vadd.f32 %v3254_v57, %v8576_v52  ;;  %v3256_v62 = vpop.f32.mrb[126].mxu1 }
 0x5d3   :  { %v3761_v17 = vpop.f32.mrb[128].mxu0  ;;  %v3319_v34 = vmul.f32 0.5, %v7901_v5  ;;  %v7911_v47 = vadd.f32 %v3256_v62, %v8575_v8  ;;  %v3258_v14 = vpop.f32.mrb[127].mxu1 }
 0x5d4   :  { %v7908_v49 = vadd.f32 %v3761_v17, %v8575_v8  ;;  %v3763_v38 = vpop.f32.mrb[129].mxu0  ;;  %v3320_v7 = vmul.f32 0.5, %v7904_v50  ;;  %v7918_v46 = vadd.f32 %v3258_v14, %v8576_v52 }
 0x5d5   :  { %v7915_v32 = vadd.f32 %v3763_v38, %v8576_v52  ;;  %v3765_v2 = vpop.f32.mrb[130].mxu0  ;;  %5016 = vtanh.f32 %v3319_v34  ;;  %v3321_v58 = vmul.f32 0.5, %v7911_v47 }
 0x5d6   :  { %v3828_v30 = vmul.f32 0.5, %v7908_v49  ;;  %v7923_v39 = vadd.f32 %v3765_v2, %v8575_v8  ;;  %v3767_v45 = vpop.f32.mrb[131].mxu0  ;;  %5018 = vtanh.f32 %v3320_v7  ;;  %v3322_v12 = vmul.f32 0.5, %v7918_v46 }
 0x5d7   :  { %v3829_v15 = vmul.f32 0.5, %v7915_v32  ;;  %v7928_v4 = vadd.f32 %v3767_v45, %v8576_v52 }
 0x5d8   :  { %5020 = vtanh.f32 %v3828_v30  ;;  %v3830_v44 = vmul.f32 0.5, %v7923_v39 }
 0x5d9   :  { %5022 = vtanh.f32 %v3321_v58  ;;  %v3831_v11 = vmul.f32 0.5, %v7928_v4  ;;  %v3262_v6 = vpop.f32.mrb[128].mxu1 }
 0x5da   :  { %5024 = vtanh.f32 %v3829_v15  ;;  %v7933_v54 = vadd.f32 %v3262_v6, %v8575_v8  ;;  %v3264_v41 = vpop.f32.mrb[129].mxu1 }
 0x5db   :  { %5026 = vtanh.f32 %v3322_v12  ;;  %v7936_v35 = vadd.f32 %v3264_v41, %v8576_v52  ;;  %v3771_v27 = vpop.f32.mrb[132].mxu0  ;;  %v3266_v10 = vpop.f32.mrb[130].mxu1 }
 0x5dc   :  { %5028 = vtanh.f32 %v3830_v44  ;;  %v3323_v20 = vmul.f32 0.5, %v7933_v54  ;;  %v7940_v21 = vadd.f32 %v3771_v27, %v8575_v8  ;;  %v7943_v18 = vadd.f32 %v3266_v10, %v8575_v8  ;;  %v3773_v22 = vpop.f32.mrb[133].mxu0  ;;  %v3268_v29 = vpop.f32.mrb[131].mxu1 }
 0x5dd   :  { %5030 = vtanh.f32 %v3831_v11  ;;  %v3324_v13 = vmul.f32 0.5, %v7936_v35  ;;  %v7947_v9 = vadd.f32 %v3773_v22, %v8576_v52  ;;  %v7950_v60 = vadd.f32 %v3268_v29, %v8576_v52  ;;  %v3775_v63 = vpop.f32.mrb[134].mxu0 }
 0x5de   :  { %5032 = vtanh.f32 %v3323_v20  ;;  %v3832_v19 = vmul.f32 0.5, %v7940_v21  ;;  %v3325_v43 = vmul.f32 0.5, %v7943_v18  ;;  %v7955_v59 = vadd.f32 %v3775_v63, %v8575_v8  ;;  %v3777_v1 = vpop.f32.mrb[135].mxu0 }
 0x5df   :  { %v5017_v31 = vpop.eup %5016  ;;  %5034 = vtanh.f32 %v3324_v13  ;;  %v3833_v37 = vmul.f32 0.5, %v7947_v9  ;;  %v3326_v51 = vmul.f32 0.5, %v7950_v60  ;;  %v7961_v3 = vadd.f32 %v3777_v1, %v8576_v52 }
 0x5e0   :  { %v5019_v26 = vpop.eup %5018  ;;  %v3371_v28 = vmul.f32 0.5, %v5017_v31  ;;  %5036 = vtanh.f32 %v3832_v19  ;;  %v3834_v40 = vmul.f32 0.5, %v7955_v59 }
 0x5e1   :  { %v3372_v56 = vmul.f32 0.5, %v5019_v26  ;;  %5038 = vtanh.f32 %v3325_v43  ;;  %v3835_v23 = vmul.f32 0.5, %v7961_v3 }
 0x5e2   :  { %v5021_v42 = vpop.eup %5020  ;;  %v3397_v33 = vadd.f32 0.5, %v3371_v28  ;;  %5040 = vtanh.f32 %v3833_v37 }
 0x5e3   :  { %v5023_v16 = vpop.eup %5022  ;;  %v3880_v55 = vmul.f32 0.5, %v5021_v42  ;;  %v3398_v36 = vadd.f32 0.5, %v3372_v56  ;;  %5042 = vtanh.f32 %v3326_v51 }
 0x5e4   :  { %v5025_v25 = vpop.eup %5024  ;;  %v3373_v61 = vmul.f32 0.5, %v5023_v16  ;;  %v3423_v53 = vmul.f32 %v3397_v33, %v7901_v5  ;;  %5044 = vtanh.f32 %v3834_v40 }
 0x5e5   :  { %v5027_v24 = vpop.eup %5026  ;;  %v3906_v0 = vadd.f32 0.5, %v3880_v55  ;;  %v3881_v48 = vmul.f32 0.5, %v5025_v25  ;;  %v3424_v17 = vmul.f32 %v3398_v36, %v7904_v50  ;;  %5046 = vtanh.f32 %v3835_v23 }
 0x5e6   :  { %v5029_v57 = vpop.eup %5028  ;;  %v3399_v62 = vadd.f32 0.5, %v3373_v61  ;;  %v3374_v34 = vmul.f32 0.5, %v5027_v24  ;;  %3449 = vst [vmem:[%s8432_s9 + $0x18] sm:$0xff] %v3423_v53 }
 0x5e7   :  { %v5031_v38 = vpop.eup %5030  ;;  %v3932_v14 = vmul.f32 %v3906_v0, %v7908_v49  ;;  %v3907_v7 = vadd.f32 0.5, %v3881_v48  ;;  %v3882_v2 = vmul.f32 0.5, %v5029_v57  ;;  %3450 = vst.msk [vmem:[%s8432_s9 + $0x20] sm:$0xff] %vm2313_vm0, %v3424_v17  ;;  %v3272_v15 = vpop.f32.mrb[132].mxu1 }
 0x5e8   :  { %v3425_v5 = vmul.f32 %v3399_v62, %v7911_v47  ;;  %v3400_v50 = vadd.f32 0.5, %v3374_v34  ;;  %v3883_v30 = vmul.f32 0.5, %v5031_v38  ;;  %v5033_v12 = vpop.eup %5032  ;;  %v7982_v11 = vadd.f32 %v3272_v15, %v8575_v8  ;;  %v3274_v47 = vpop.f32.mrb[133].mxu1 }
 0x5e9   :  { %v3933_v58 = vmul.f32 %v3907_v7, %v7915_v32  ;;  %v3908_v45 = vadd.f32 0.5, %v3882_v2  ;;  %3984 = vrot.lane.b32.xlu0 %v3932_v14, %s5342_s2  ;;  %v5035_v6 = vpop.eup %5034  ;;  %v3375_v32 = vmul.f32 0.5, %v5033_v12  ;;  %v7986_v27 = vadd.f32 %v3274_v47, %v8576_v52  ;;  %v3276_v10 = vpop.f32.mrb[134].mxu1 }
 0x5ea   :  { %3451 = vst [vmem:[%s8432_s9 + $0x48] sm:$0xff] %v3425_v5  ;;  %v3426_v49 = vmul.f32 %v3400_v50, %v7918_v46  ;;  %v3909_v44 = vadd.f32 0.5, %v3883_v30  ;;  %v5037_v20 = vpop.eup %5036  ;;  %v3376_v22 = vmul.f32 0.5, %v5035_v6  ;;  %v3327_v29 = vmul.f32 0.5, %v7982_v11  ;;  %v3278_v13 = vpop.f32.mrb[135].mxu1 }
 0x5eb   :  { %v3934_v41 = vmul.f32 %v3908_v45, %v7923_v39  ;;  %3986 = vrot.lane.b32.xlu1 %v3933_v58, %s5342_s2  ;;  %v7996_v39 = vadd.f32 %v3276_v10, %v8575_v8  ;;  %v5039_v63 = vpop.eup %5038  ;;  %v3401_v31 = vadd.f32 0.5, %v3375_v32  ;;  %v3884_v19 = vmul.f32 0.5, %v5037_v20  ;;  %v3781_v1 = vpop.f32.mrb[136].mxu0 }
 0x5ec   :  { %3452 = vst.msk [vmem:[%s8432_s9 + $0x50] sm:$0xff] %vm2313_vm0, %v3426_v49  ;;  %v3935_v46 = vmul.f32 %v3909_v44, %v7928_v4  ;;  %v3328_v43 = vmul.f32 0.5, %v7986_v27  ;;  %v8000_v26 = vadd.f32 %v3278_v13, %v8576_v52  ;;  %v5041_v28 = vpop.eup %5040  ;;  %v3402_v4 = vadd.f32 0.5, %v3376_v22  ;;  %v3783_v42 = vpop.f32.mrb[137].mxu0 }
 0x5ed   :  { %3988 = vrot.lane.b32.xlu0 %v3934_v41, %s5342_s2  ;;  %v3377_v37 = vmul.f32 0.5, %v5039_v63  ;;  %5048 = vtanh.f32 %v3327_v29  ;;  %v8004_v51 = vadd.f32 %v3781_v1, %v8575_v8  ;;  %v5043_v56 = vpop.eup %5042  ;;  %v3427_v40 = vmul.f32 %v3401_v31, %v7933_v54  ;;  %v3785_v55 = vpop.f32.mrb[138].mxu0 }
 0x5ee   :  { %v3910_v16 = vadd.f32 0.5, %v3884_v19  ;;  %v3885_v33 = vmul.f32 0.5, %v5041_v28  ;;  %5050 = vtanh.f32 %v3328_v43  ;;  %v5045_v25 = vpop.eup %5044  ;;  %v3428_v36 = vmul.f32 %v3402_v4, %v7936_v35  ;;  %v3787_v53 = vpop.f32.mrb[139].mxu0 }
 0x5ef   :  { %3990 = vrot.lane.b32.xlu1 %v3935_v46, %s5342_s2  ;;  %v3403_v61 = vadd.f32 0.5, %v3377_v37  ;;  %v3378_v23 = vmul.f32 0.5, %v5043_v56  ;;  %v3836_v24 = vmul.f32 0.5, %v8004_v51  ;;  %v5047_v0 = vpop.eup %5046  ;;  %3453 = vst [vmem:[%s8432_s9 + $0x78] sm:$0xff] %v3427_v40  ;;  %v3886_v57 = vmul.f32 0.5, %v5045_v25 }
 0x5f0   :  { %v3936_v54 = vmul.f32 %v3910_v16, %v7940_v21  ;;  %v3911_v48 = vadd.f32 0.5, %v3885_v33  ;;  %v3329_v17 = vmul.f32 0.5, %v7996_v39  ;;  %3454 = vst.msk [vmem:[%s8432_s9 + $0x80] sm:$0xff] %vm2313_vm0, %v3428_v36  ;;  %v3887_v34 = vmul.f32 0.5, %v5047_v0 }
 0x5f1   :  { %v3429_v35 = vmul.f32 %v3403_v61, %v7943_v18  ;;  %v3404_v62 = vadd.f32 0.5, %v3378_v23  ;;  %5052 = vtanh.f32 %v3836_v24  ;;  %v3912_v14 = vadd.f32 0.5, %v3886_v57 }
 0x5f2   :  { %v3937_v38 = vmul.f32 %v3911_v48, %v7947_v9  ;;  %5054 = vtanh.f32 %v3329_v17  ;;  %v8022_v21 = vadd.f32 %v3783_v42, %v8576_v52  ;;  %3992 = vrot.lane.b32.xlu0 %v3936_v54, %s5342_s2  ;;  %v3913_v2 = vadd.f32 0.5, %v3887_v34  ;;  %v3282_v9 = vpop.f32.mrb[136].mxu1 }
 0x5f3   :  { %3455 = vst [vmem:[%s8432_s9 + $0xa8] sm:$0xff] %v3429_v35  ;;  %v3430_v7 = vmul.f32 %v3404_v62, %v7950_v60  ;;  %v3330_v18 = vmul.f32 0.5, %v8000_v26  ;;  %v8031_v5 = vadd.f32 %v3785_v55, %v8575_v8  ;;  %v3938_v50 = vmul.f32 %v3912_v14, %v7955_v59  ;;  %v3284_v15 = vpop.f32.mrb[137].mxu1  ;;  %v3791_v12 = vpop.f32.mrb[140].mxu0 }
 0x5f4   :  { %v3837_v30 = vmul.f32 0.5, %v8022_v21  ;;  %v8036_v58 = vadd.f32 %v3787_v53, %v8576_v52  ;;  %v8039_v45 = vadd.f32 %v3282_v9, %v8575_v8  ;;  %3994 = vrot.lane.b32.xlu1 %v3937_v38, %s5342_s2  ;;  %v3939_v60 = vmul.f32 %v3913_v2, %v7961_v3  ;;  %v3286_v44 = vpop.f32.mrb[138].mxu1  ;;  %v3793_v47 = vpop.f32.mrb[141].mxu0 }
 0x5f5   :  { %3456 = vst.msk [vmem:[%s8432_s9 + $0xb0] sm:$0xff] %vm2313_vm0, %v3430_v7  ;;  %5056 = vtanh.f32 %v3330_v18  ;;  %v3838_v59 = vmul.f32 0.5, %v8031_v5  ;;  %v8049_v49 = vadd.f32 %v3284_v15, %v8576_v52  ;;  %v8054_v32 = vadd.f32 %v3791_v12, %v8575_v8  ;;  %v3795_v10 = vpop.f32.mrb[142].mxu0  ;;  %v3288_v20 = vpop.f32.mrb[139].mxu1 }
 0x5f6   :  { %5058 = vtanh.f32 %v3837_v30  ;;  %v3839_v6 = vmul.f32 0.5, %v8036_v58  ;;  %v3331_v41 = vmul.f32 0.5, %v8039_v45  ;;  %3996 = vrot.lane.b32.xlu0 %v3938_v50, %s5342_s2  ;;  %v8059_v22 = vadd.f32 %v3286_v44, %v8575_v8  ;;  %v3797_v13 = vpop.f32.mrb[143].mxu0 }
 0x5f7   :  { %v5049_v3 = vpop.eup %5048  ;;  %5060 = vtanh.f32 %v3838_v59  ;;  %v3332_v46 = vmul.f32 0.5, %v8049_v49  ;;  %v8062_v29 = vadd.f32 %v3793_v47, %v8576_v52  ;;  %v3840_v19 = vmul.f32 0.5, %v8054_v32 }
 0x5f8   :  { %v5051_v63 = vpop.eup %5050  ;;  %v3379_v31 = vmul.f32 0.5, %v5049_v3  ;;  %5062 = vtanh.f32 %v3839_v6  ;;  %v8066_v43 = vadd.f32 %v3795_v10, %v8575_v8  ;;  %3998 = vrot.lane.b32.xlu1 %v3939_v60, %s5342_s2  ;;  %v3333_v28 = vmul.f32 0.5, %v8059_v22 }
 0x5f9   :  { %v3380_v1 = vmul.f32 0.5, %v5051_v63  ;;  %5064 = vtanh.f32 %v3331_v41  ;;  %v3841_v4 = vmul.f32 0.5, %v8062_v29  ;;  %v8073_v56 = vadd.f32 %v3288_v20, %v8576_v52  ;;  %v3292_v55 = vpop.f32.mrb[140].mxu1 }
 0x5fa   :  { %v3405_v37 = vadd.f32 0.5, %v3379_v31  ;;  %5066 = vtanh.f32 %v3332_v46  ;;  %v3842_v42 = vmul.f32 0.5, %v8066_v43  ;;  %v8076_v33 = vadd.f32 %v3797_v13, %v8576_v52  ;;  %v3294_v24 = vpop.f32.mrb[141].mxu1 }
 0x5fb   :  { %v5053_v40 = vpop.eup %5052  ;;  %v3406_v16 = vadd.f32 0.5, %v3380_v1  ;;  %5068 = vtanh.f32 %v3840_v19  ;;  %v3334_v23 = vmul.f32 0.5, %v8073_v56  ;;  %v3801_v53 = vpop.f32.mrb[144].mxu0  ;;  %v8089_v62 = vadd.f32 %v3294_v24, %v8576_v52 }
 0x5fc   :  { %v5055_v25 = vpop.eup %5054  ;;  %v3431_v36 = vmul.f32 %v3405_v37, %v7982_v11  ;;  %v3888_v61 = vmul.f32 0.5, %v5053_v40  ;;  %5070 = vtanh.f32 %v3333_v28  ;;  %v3843_v48 = vmul.f32 0.5, %v8076_v33  ;;  %v3296_v57 = vpop.f32.mrb[142].mxu1 }
 0x5fd   :  { %v3432_v0 = vmul.f32 %v3406_v16, %v7986_v27  ;;  %v3381_v54 = vmul.f32 0.5, %v5055_v25  ;;  %5072 = vtanh.f32 %v3841_v4  ;;  %v3803_v17 = vpop.f32.mrb[145].mxu0  ;;  %v8086_v11 = vadd.f32 %v3292_v55, %v8575_v8  ;;  %v8091_v27 = vpop.f32.mrb[143].mxu1 }
 0x5fe   :  { %3457 = vst [vmem:[%s8432_s9 + $0xd8] sm:$0xff] %v3431_v36  ;;  %v3914_v35 = vadd.f32 0.5, %v3888_v61  ;;  %5074 = vtanh.f32 %v3842_v42  ;;  %v3805_v34 = vpop.f32.mrb[146].mxu0  ;;  %v8098_v7 = vadd.f32 %v3801_v53, %v8575_v8  ;;  %v8101_v2 = vadd.f32 %v3296_v57, %v8575_v8 }
 0x5ff   :  { %v5057_v38 = vpop.eup %5056  ;;  %3458 = vst.msk [vmem:[%s8432_s9 + $0xe0] sm:$0xff] %vm2313_vm0, %v3432_v0  ;;  %v3407_v14 = vadd.f32 0.5, %v3381_v54  ;;  %5076 = vtanh.f32 %v3334_v23  ;;  %v8103_v18 = vpop.f32.mrb[147].mxu0  ;;  %v3335_v15 = vmul.f32 0.5, %v8086_v11  ;;  %v3336_v44 = vmul.f32 0.5, %v8089_v62 }
 0x600   :  { %v5059_v9 = vpop.eup %5058  ;;  %v3940_v50 = vmul.f32 %v3914_v35, %v8004_v51  ;;  %v3382_v30 = vmul.f32 0.5, %v5057_v38  ;;  %5078 = vtanh.f32 %v3843_v48  ;;  %v3844_v47 = vmul.f32 0.5, %v8098_v7 }
 0x601   :  { %v5061_v12 = vpop.eup %5060  ;;  %v3433_v60 = vmul.f32 %v3407_v14, %v7996_v39  ;;  %v3889_v59 = vmul.f32 0.5, %v5059_v9  ;;  %5080 = vtanh.f32 %v3335_v15  ;;  %v3337_v20 = vmul.f32 0.5, %v8101_v2  ;;  %v8118_v13 = vpop.f32.mrb[144].mxu1 }
 0x602   :  { %v5063_v6 = vpop.eup %5062  ;;  %v3408_v41 = vadd.f32 0.5, %v3382_v30  ;;  %v3890_v10 = vmul.f32 0.5, %v5061_v12  ;;  %4000 = vrot.lane.b32.xlu0 %v3940_v50, %s5342_s2  ;;  %5082 = vtanh.f32 %v3336_v44  ;;  %v8116_v46 = vadd.f32 %v3803_v17, %v8576_v52  ;;  %v8121_v28 = vpop.f32.mrb[145].mxu1 }
 0x603   :  { %v5065_v51 = vpop.eup %5064  ;;  %3459 = vst [vmem:[%s8432_s9 + $0x108] sm:$0xff] %v3433_v60  ;;  %v3915_v3 = vadd.f32 0.5, %v3889_v59  ;;  %v3891_v39 = vmul.f32 0.5, %v5063_v6  ;;  %5084 = vtanh.f32 %v3844_v47  ;;  %v8123_v4 = vpop.f32.mrb[148].mxu0  ;;  %v8142_v17 = vadd.f32 %v3805_v34, %v8575_v8 }
 0x604   :  { %v5067_v63 = vpop.eup %5066  ;;  %v3434_v31 = vmul.f32 %v3408_v41, %v8000_v26  ;;  %v3916_v19 = vadd.f32 0.5, %v3890_v10  ;;  %v3383_v1 = vmul.f32 0.5, %v5065_v51  ;;  %5086 = vtanh.f32 %v3337_v20  ;;  %v8126_v55 = vpop.f32.mrb[146].mxu1 }
 0x605   :  { %v5069_v37 = vpop.eup %5068  ;;  %v3941_v42 = vmul.f32 %v3915_v3, %v8022_v21  ;;  %v3917_v40 = vadd.f32 0.5, %v3891_v39  ;;  %v3384_v16 = vmul.f32 0.5, %v5067_v63  ;;  %v8128_v25 = vpop.f32.mrb[149].mxu0  ;;  %v3845_v24 = vmul.f32 0.5, %v8116_v46 }
 0x606   :  { %v5071_v36 = vpop.eup %5070  ;;  %3460 = vst.msk [vmem:[%s8432_s9 + $0x110] sm:$0xff] %vm2313_vm0, %v3434_v31  ;;  %v3942_v26 = vmul.f32 %v3916_v19, %v8031_v5  ;;  %v3409_v61 = vadd.f32 0.5, %v3383_v1  ;;  %v3892_v23 = vmul.f32 0.5, %v5069_v37  ;;  %v8136_v21 = vpop.f32.mrb[150].mxu0  ;;  %v3846_v34 = vmul.f32 0.5, %v8142_v17 }
 0x607   :  { %v8138_v53 = vpop.f32.mrb[147].mxu1  ;;  %v5073_v0 = vpop.eup %5072  ;;  %v3943_v54 = vmul.f32 %v3917_v40, %v8036_v58  ;;  %v3410_v48 = vadd.f32 0.5, %v3384_v16  ;;  %v3385_v57 = vmul.f32 0.5, %v5071_v36  ;;  %4002 = vrot.lane.b32.xlu1 %v3941_v42, %s5342_s2  ;;  %5088 = vtanh.f32 %v3845_v24 }
 0x608   :  { %v8145_v35 = vpop.f32.mrb[151].mxu0  ;;  %v5075_v5 = vpop.eup %5074  ;;  %v3435_v38 = vmul.f32 %v3409_v61, %v8039_v45  ;;  %v3918_v14 = vadd.f32 0.5, %v3892_v23  ;;  %v3893_v9 = vmul.f32 0.5, %v5073_v0  ;;  %4004 = vrot.lane.b32.xlu0 %v3942_v26, %s5342_s2  ;;  %v8157_v44 = vadd.f32 %v8091_v27, %v8576_v52 }
 0x609   :  { %v5077_v50 = vpop.eup %5076  ;;  %v3436_v58 = vmul.f32 %v3410_v48, %v8049_v49  ;;  %v3411_v30 = vadd.f32 0.5, %v3385_v57  ;;  %v3894_v15 = vmul.f32 0.5, %v5075_v5  ;;  %5090 = vtanh.f32 %v3846_v34  ;;  %v8165_v41 = vpop.f32.mrb[148].mxu1 }
 0x60a   :  { %v5079_v12 = vpop.eup %5078  ;;  %3461 = vst [vmem:[%s8432_s9 + $0x138] sm:$0xff] %v3435_v38  ;;  %v3944_v60 = vmul.f32 %v3918_v14, %v8054_v32  ;;  %v3919_v45 = vadd.f32 0.5, %v3893_v9  ;;  %v3386_v59 = vmul.f32 0.5, %v5077_v50  ;;  %v3338_v27 = vmul.f32 0.5, %v8157_v44 }
 0x60b   :  { %3462 = vst.msk [vmem:[%s8432_s9 + $0x140] sm:$0xff] %vm2313_vm0, %v3436_v58  ;;  %v3437_v49 = vmul.f32 %v3411_v30, %v8059_v22  ;;  %v3920_v47 = vadd.f32 0.5, %v3894_v15  ;;  %v3895_v6 = vmul.f32 0.5, %v5079_v12  ;;  %4006 = vrot.lane.b32.xlu1 %v3943_v54, %s5342_s2  ;;  %v5081_v32 = vpop.eup %5080  ;;  %v8171_v51 = vadd.f32 %v8103_v18, %v8576_v52  ;;  %v8174_v22 = vpop.f32.mrb[149].mxu1 }
 0x60c   :  { %v3945_v10 = vmul.f32 %v3919_v45, %v8062_v29  ;;  %v3412_v20 = vadd.f32 0.5, %v3386_v59  ;;  %4008 = vrot.lane.b32.xlu0 %v3944_v60, %s5342_s2  ;;  %v8176_v3 = vpop.f32.mrb[152].mxu0  ;;  %v5083_v39 = vpop.eup %5082  ;;  %v3387_v31 = vmul.f32 0.5, %v5081_v32  ;;  %v8184_v19 = vadd.f32 %v8118_v13, %v8575_v8 }
 0x60d   :  { %3463 = vst [vmem:[%s8432_s9 + $0x168] sm:$0xff] %v3437_v49  ;;  %v3946_v29 = vmul.f32 %v3920_v47, %v8066_v43  ;;  %v3921_v63 = vadd.f32 0.5, %v3895_v6  ;;  %v3316_v18 = vpop.f32.mrb[150].mxu1  ;;  %v8186_v1 = vpop.f32.mrb[153].mxu0  ;;  %v3388_v40 = vmul.f32 0.5, %v5083_v39  ;;  %5092 = vtanh.f32 %v3338_v27 }
 0x60e   :  { %v5085_v37 = vpop.eup %5084  ;;  %v3438_v42 = vmul.f32 %v3412_v20, %v8073_v56  ;;  %v3847_v16 = vmul.f32 0.5, %v8171_v51  ;;  %v3825_v36 = vpop.f32.mrb[154].mxu0  ;;  %v3413_v23 = vadd.f32 0.5, %v3387_v31  ;;  %v3339_v13 = vmul.f32 0.5, %v8184_v19 }
 0x60f   :  { %v3317_v26 = vpop.f32.mrb[151].mxu1  ;;  %v5087_v61 = vpop.eup %5086  ;;  %v3947_v43 = vmul.f32 %v3921_v63, %v8076_v33  ;;  %v3896_v24 = vmul.f32 0.5, %v5085_v37  ;;  %4010 = vrot.lane.b32.xlu1 %v3945_v10, %s5342_s2  ;;  %v3414_v56 = vadd.f32 0.5, %v3388_v40  ;;  %v8199_v48 = vadd.f32 %v8121_v28, %v8576_v52 }
 0x610   :  { %v3826_v0 = vpop.f32.mrb[155].mxu0  ;;  %3464 = vst.msk [vmem:[%s8432_s9 + $0x170] sm:$0xff] %vm2313_vm0, %v3438_v42  ;;  %v3389_v54 = vmul.f32 0.5, %v5087_v61  ;;  %5094 = vtanh.f32 %v3847_v16  ;;  %4012 = vrot.lane.b32.xlu0 %v3946_v29, %s5342_s2  ;;  %v3439_v33 = vmul.f32 %v3413_v23, %v8086_v11  ;;  %v8205_v5 = vadd.f32 %v8123_v4, %v8575_v8 }
 0x611   :  { %v3922_v57 = vadd.f32 0.5, %v3896_v24  ;;  %5096 = vtanh.f32 %v3339_v13  ;;  %v5089_v38 = vpop.eup %5088  ;;  %v3440_v14 = vmul.f32 %v3414_v56, %v8089_v62  ;;  %v3340_v50 = vmul.f32 0.5, %v8199_v48 }
 0x612   :  { %v3415_v9 = vadd.f32 0.5, %v3389_v54  ;;  %v8211_v28 = vadd.f32 %v8126_v55, %v8575_v8  ;;  %3465 = vst [vmem:[%s8432_s9 + $0x198] sm:$0xff] %v3439_v33  ;;  %v3897_v58 = vmul.f32 0.5, %v5089_v38  ;;  %v3848_v4 = vmul.f32 0.5, %v8205_v5 }
 0x613   :  { %v3948_v11 = vmul.f32 %v3922_v57, %v8098_v7  ;;  %v8220_v30 = vadd.f32 %v8128_v25, %v8576_v52  ;;  %4014 = vrot.lane.b32.xlu1 %v3947_v43, %s5342_s2  ;;  %3466 = vst.msk [vmem:[%s8432_s9 + $0x1a0] sm:$0xff] %vm2313_vm0, %v3440_v14  ;;  %5098 = vtanh.f32 %v3340_v50  ;;  %v8231_v7 = vadd.f32 %v8136_v21, %v8575_v8  ;;  %v5091_v15 = vpop.eup %5090 }
 0x614   :  { %v3441_v62 = vmul.f32 %v3415_v9, %v8101_v2  ;;  %v3341_v55 = vmul.f32 0.5, %v8211_v28  ;;  %v3923_v34 = vadd.f32 0.5, %v3897_v58  ;;  %5100 = vtanh.f32 %v3848_v4 }
 0x615   :  { %v3849_v25 = vmul.f32 0.5, %v8220_v30  ;;  %v8236_v12 = vadd.f32 %v8138_v53, %v8576_v52  ;;  %4016 = vrot.lane.b32.xlu0 %v3948_v11, %s5342_s2  ;;  %v3898_v2 = vmul.f32 0.5, %v5091_v15  ;;  %v3850_v21 = vmul.f32 0.5, %v8231_v7 }
 0x616   :  { %3467 = vst [vmem:[%s8432_s9 + $0x1c8] sm:$0xff] %v3441_v62  ;;  %5102 = vtanh.f32 %v3341_v55  ;;  %v8245_v60 = vadd.f32 %v8145_v35, %v8576_v52  ;;  %v3949_v45 = vmul.f32 %v3923_v34, %v8116_v46  ;;  %v8251_v59 = vadd.f32 %v8165_v41, %v8575_v8 }
 0x617   :  { %5104 = vtanh.f32 %v3849_v25  ;;  %v3342_v53 = vmul.f32 0.5, %v8236_v12  ;;  %v5093_v49 = vpop.eup %5092  ;;  %v3924_v47 = vadd.f32 0.5, %v3898_v2  ;;  %v8256_v32 = vadd.f32 %v8174_v22, %v8576_v52 }
 0x618   :  { %5106 = vtanh.f32 %v3850_v21  ;;  %v3851_v6 = vmul.f32 0.5, %v8245_v60  ;;  %v3390_v35 = vmul.f32 0.5, %v5093_v49  ;;  %v3343_v46 = vmul.f32 0.5, %v8251_v59  ;;  %4018 = vrot.lane.b32.xlu1 %v3949_v45, %s5342_s2 }
 0x619   :  { %5108 = vtanh.f32 %v3342_v53  ;;  %v8261_v10 = vadd.f32 %v8176_v3, %v8575_v8  ;;  %v3950_v20 = vmul.f32 %v3924_v47, %v8142_v17  ;;  %v3344_v27 = vmul.f32 0.5, %v8256_v32 }
 0x61a   :  { %v5095_v41 = vpop.eup %5094  ;;  %5110 = vtanh.f32 %v3851_v6  ;;  %v8268_v22 = vadd.f32 %v8186_v1, %v8576_v52  ;;  %v3416_v29 = vadd.f32 0.5, %v3390_v35 }
 0x61b   :  { %v5097_v39 = vpop.eup %5096  ;;  %v3899_v63 = vmul.f32 0.5, %v5095_v41  ;;  %5112 = vtanh.f32 %v3343_v46  ;;  %v3852_v31 = vmul.f32 0.5, %v8261_v10  ;;  %4020 = vrot.lane.b32.xlu0 %v3950_v20, %s5342_s2 }
 0x61c   :  { %v3391_v8 = vmul.f32 0.5, %v5097_v39  ;;  %5114 = vtanh.f32 %v3344_v27  ;;  %v3853_v3 = vmul.f32 0.5, %v8268_v22  ;;  %v3442_v17 = vmul.f32 %v3416_v29, %v8157_v44 }
 0x61d   :  { %v3925_v18 = vadd.f32 0.5, %v3899_v63  ;;  %5116 = vtanh.f32 %v3852_v31  ;;  %v5099_v37 = vpop.eup %5098 }
 0x61e   :  { %v3417_v42 = vadd.f32 0.5, %v3391_v8  ;;  %5118 = vtanh.f32 %v3853_v3  ;;  %v5101_v52 = vpop.eup %5100  ;;  %3468 = vst.msk [vmem:[%s8432_s9 + $0x1d0] sm:$0xff] %vm2313_vm0, %v3442_v17  ;;  %v3392_v40 = vmul.f32 0.5, %v5099_v37 }
 0x61f   :  { %v3951_v1 = vmul.f32 %v3925_v18, %v8171_v51  ;;  %v3900_v26 = vmul.f32 0.5, %v5101_v52 }
 0x620   :  { %v5103_v16 = vpop.eup %5102  ;;  %v3443_v36 = vmul.f32 %v3417_v42, %v8184_v19  ;;  %v3418_v44 = vadd.f32 0.5, %v3392_v40 }
 0x621   :  { %v5105_v61 = vpop.eup %5104  ;;  %v3393_v43 = vmul.f32 0.5, %v5103_v16  ;;  %4022 = vrot.lane.b32.xlu1 %v3951_v1, %s5342_s2  ;;  %v3926_v24 = vadd.f32 0.5, %v3900_v26 }
 0x622   :  { %v5107_v23 = vpop.eup %5106  ;;  %3469 = vst [vmem:[%s8432_s9 + $0x1f8] sm:$0xff] %v3443_v36  ;;  %v3901_v13 = vmul.f32 0.5, %v5105_v61  ;;  %v3444_v51 = vmul.f32 %v3418_v44, %v8199_v48 }
 0x623   :  { %v5109_v0 = vpop.eup %5108  ;;  %v3419_v56 = vadd.f32 0.5, %v3393_v43  ;;  %v3902_v54 = vmul.f32 0.5, %v5107_v23  ;;  %v3952_v19 = vmul.f32 %v3926_v24, %v8205_v5 }
 0x624   :  { %v5111_v33 = vpop.eup %5110  ;;  %v3927_v57 = vadd.f32 0.5, %v3901_v13  ;;  %v3394_v38 = vmul.f32 0.5, %v5109_v0  ;;  %3470 = vst.msk [vmem:[%s8432_s9 + $0x200] sm:$0xff] %vm2313_vm0, %v3444_v51 }
 0x625   :  { %v5113_v14 = vpop.eup %5112  ;;  %v3445_v9 = vmul.f32 %v3419_v56, %v8211_v28  ;;  %v3928_v50 = vadd.f32 0.5, %v3902_v54  ;;  %v3903_v11 = vmul.f32 0.5, %v5111_v33  ;;  %4024 = vrot.lane.b32.xlu0 %v3952_v19, %s5342_s2 }
 0x626   :  { %v5115_v58 = vpop.eup %5114  ;;  %v3953_v48 = vmul.f32 %v3927_v57, %v8220_v30  ;;  %v3420_v4 = vadd.f32 0.5, %v3394_v38  ;;  %v3395_v62 = vmul.f32 0.5, %v5113_v14 }
 0x627   :  { %v5117_v5 = vpop.eup %5116  ;;  %3471 = vst [vmem:[%s8432_s9 + $0x228] sm:$0xff] %v3445_v9  ;;  %v3929_v55 = vadd.f32 0.5, %v3903_v11  ;;  %v3396_v15 = vmul.f32 0.5, %v5115_v58  ;;  %v3954_v25 = vmul.f32 %v3928_v50, %v8231_v7 }
 0x628   :  { %v5119_v34 = vpop.eup %5118  ;;  %v3446_v28 = vmul.f32 %v3420_v4, %v8236_v12  ;;  %v3421_v2 = vadd.f32 0.5, %v3395_v62  ;;  %v3904_v21 = vmul.f32 0.5, %v5117_v5  ;;  %4026 = vrot.lane.b32.xlu1 %v3953_v48, %s5342_s2 }
 0x629   :  { %v3422_v30 = vadd.f32 0.5, %v3396_v15  ;;  %v3905_v45 = vmul.f32 0.5, %v5119_v34  ;;  %v3955_v53 = vmul.f32 %v3929_v55, %v8245_v60  ;;  %4028 = vrot.lane.b32.xlu0 %v3954_v25, %s5342_s2 }
 0x62a   :  { %3472 = vst.msk [vmem:[%s8432_s9 + $0x230] sm:$0xff] %vm2313_vm0, %v3446_v28  ;;  %v3447_v49 = vmul.f32 %v3421_v2, %v8251_v59  ;;  %v3930_v47 = vadd.f32 0.5, %v3904_v21 }
 0x62b   :  { %v3448_v7 = vmul.f32 %v3422_v30, %v8256_v32  ;;  %v3931_v12 = vadd.f32 0.5, %v3905_v45 }
 0x62c   :  { %3473 = vst [vmem:[%s8432_s9 + $0x258] sm:$0xff] %v3447_v49  ;;  %v3956_v6 = vmul.f32 %v3930_v47, %v8261_v10  ;;  %4030 = vrot.lane.b32.xlu1 %v3955_v53, %s5342_s2 }
 0x62d   :  { %3474 = vst.msk [vmem:[%s8432_s9 + $0x260] sm:$0xff] %vm2313_vm0, %v3448_v7  ;;  %v3957_v60 = vmul.f32 %v3931_v12, %v8268_v22 }
 0x62e   :  { %4032 = vrot.lane.b32.xlu0 %v3956_v6, %s5342_s2 }
 0x630   :  { %4034 = vrot.lane.b32.xlu1 %v3957_v60, %s5342_s2 }
 0x65b   :  { %v3985_v59 = vpop.permute.xlu0 %3984 }
 0x65c   :  { %4075 = vst.msk [vmem:[%s8432_s9 + $0x20] sm:$0xff] %vm2939_vm1, %v3985_v59 }
 0x65d   :  { %v3987_v32 = vpop.permute.xlu1 %3986 }
 0x65e   :  { %v4036_v35 = vsel %vm2313_vm0, %v3985_v59, %v3987_v32 }
 0x65f   :  { %4076 = vst [vmem:[%s8432_s9 + $0x28] sm:$0xff] %v4036_v35  ;;  %v3989_v46 = vpop.permute.xlu0 %3988 }
 0x660   :  { %4077 = vst.msk [vmem:[%s8432_s9 + $0x50] sm:$0xff] %vm2939_vm1, %v3989_v46 }
 0x661   :  { %v3991_v10 = vpop.permute.xlu1 %3990 }
 0x662   :  { %v4037_v41 = vsel %vm2313_vm0, %v3989_v46, %v3991_v10 }
 0x663   :  { %4078 = vst [vmem:[%s8432_s9 + $0x58] sm:$0xff] %v4037_v41 }
 0x664   :  { %v3993_v20 = vpop.permute.xlu0 %3992 }
 0x665   :  { %4079 = vst.msk [vmem:[%s8432_s9 + $0x80] sm:$0xff] %vm2939_vm1, %v3993_v20 }
 0x666   :  { %v3995_v27 = vpop.permute.xlu1 %3994 }
 0x667   :  { %v4038_v22 = vsel %vm2313_vm0, %v3993_v20, %v3995_v27 }
 0x668   :  { %4080 = vst [vmem:[%s8432_s9 + $0x88] sm:$0xff] %v4038_v22  ;;  %v3997_v39 = vpop.permute.xlu0 %3996 }
 0x669   :  { %4081 = vst.msk [vmem:[%s8432_s9 + $0xb0] sm:$0xff] %vm2939_vm1, %v3997_v39 }
 0x66a   :  { %v3999_v29 = vpop.permute.xlu1 %3998 }
 0x66b   :  { %v4039_v63 = vsel %vm2313_vm0, %v3997_v39, %v3999_v29 }
 0x66c   :  { %4082 = vst [vmem:[%s8432_s9 + $0xb8] sm:$0xff] %v4039_v63 }
 0x674   :  { %v4001_v31 = vpop.permute.xlu0 %4000 }
 0x675   :  { %4083 = vst.msk [vmem:[%s8432_s9 + $0xe0] sm:$0xff] %vm2939_vm1, %v4001_v31 }
 0x679   :  { %v4003_v8 = vpop.permute.xlu1 %4002 }
 0x67a   :  { %v4040_v3 = vsel %vm2313_vm0, %v4001_v31, %v4003_v8  ;;  %v4005_v17 = vpop.permute.xlu0 %4004 }
 0x67b   :  { %4084 = vst [vmem:[%s8432_s9 + $0xe8] sm:$0xff] %v4040_v3  ;;  %4085 = vst.msk [vmem:[%s8432_s9 + $0x110] sm:$0xff] %vm2939_vm1, %v4005_v17 }
 0x67d   :  { %v4007_v18 = vpop.permute.xlu1 %4006 }
 0x67e   :  { %v4041_v37 = vsel %vm2313_vm0, %v4005_v17, %v4007_v18  ;;  %v4009_v42 = vpop.permute.xlu0 %4008 }
 0x67f   :  { %4086 = vst [vmem:[%s8432_s9 + $0x118] sm:$0xff] %v4041_v37  ;;  %4087 = vst.msk [vmem:[%s8432_s9 + $0x140] sm:$0xff] %vm2939_vm1, %v4009_v42 }
 0x681   :  { %v4011_v52 = vpop.permute.xlu1 %4010 }
 0x682   :  { %v4042_v1 = vsel %vm2313_vm0, %v4009_v42, %v4011_v52  ;;  %v4013_v40 = vpop.permute.xlu0 %4012 }
 0x683   :  { %4088 = vst [vmem:[%s8432_s9 + $0x148] sm:$0xff] %v4042_v1  ;;  %4089 = vst.msk [vmem:[%s8432_s9 + $0x170] sm:$0xff] %vm2939_vm1, %v4013_v40 }
 0x685   :  { %v4015_v16 = vpop.permute.xlu1 %4014 }
 0x686   :  { %v4043_v36 = vsel %vm2313_vm0, %v4013_v40, %v4015_v16 }
 0x687   :  { %4090 = vst [vmem:[%s8432_s9 + $0x178] sm:$0xff] %v4043_v36  ;;  %v4017_v26 = vpop.permute.xlu0 %4016 }
 0x688   :  { %4091 = vst.msk [vmem:[%s8432_s9 + $0x1a0] sm:$0xff] %vm2939_vm1, %v4017_v26 }
 0x68a   :  { %v4019_v61 = vpop.permute.xlu1 %4018 }
 0x68b   :  { %v4044_v44 = vsel %vm2313_vm0, %v4017_v26, %v4019_v61 }
 0x68c   :  { %4092 = vst [vmem:[%s8432_s9 + $0x1a8] sm:$0xff] %v4044_v44 }
 0x68d   :  { %v4021_v43 = vpop.permute.xlu0 %4020 }
 0x68e   :  { %4093 = vst.msk [vmem:[%s8432_s9 + $0x1d0] sm:$0xff] %vm2939_vm1, %v4021_v43 }
 0x693   :  { %v4023_v23 = vpop.permute.xlu1 %4022 }
 0x694   :  { %v4045_v24 = vsel %vm2313_vm0, %v4021_v43, %v4023_v23 }
 0x695   :  { %4094 = vst [vmem:[%s8432_s9 + $0x1d8] sm:$0xff] %v4045_v24 }
 0x697   :  { %v4025_v13 = vpop.permute.xlu0 %4024 }
 0x698   :  { %4095 = vst.msk [vmem:[%s8432_s9 + $0x200] sm:$0xff] %vm2939_vm1, %v4025_v13 }
 0x69a   :  { %v4027_v0 = vpop.permute.xlu1 %4026 }
 0x69b   :  { %v4046_v51 = vsel %vm2313_vm0, %v4025_v13, %v4027_v0  ;;  %v4029_v56 = vpop.permute.xlu0 %4028 }
 0x69c   :  { %4096 = vst [vmem:[%s8432_s9 + $0x208] sm:$0xff] %v4046_v51  ;;  %4097 = vst.msk [vmem:[%s8432_s9 + $0x230] sm:$0xff] %vm2939_vm1, %v4029_v56 }
 0x69e   :  { %v4031_v54 = vpop.permute.xlu1 %4030 }
 0x69f   :  { %v4047_v33 = vsel %vm2313_vm0, %v4029_v56, %v4031_v54 }
 0x6a0   :  { %4098 = vst [vmem:[%s8432_s9 + $0x238] sm:$0xff] %v4047_v33  ;;  %v4033_v19 = vpop.permute.xlu0 %4032 }
 0x6a1   :  { %4099 = vst.msk [vmem:[%s8432_s9 + $0x260] sm:$0xff] %vm2939_vm1, %v4033_v19 }
 0x6a2   :  { %v4035_v57 = vpop.permute.xlu1 %4034 }
 0x6a3   :  { %v4048_v38 = vsel %vm2313_vm0, %v4033_v19, %v4035_v57 }
 0x6a4   :  { %4100 = vst [vmem:[%s8432_s9 + $0x268] sm:$0xff] %v4048_v38 }
 0x6a5   :  { %4105 = vsyncpa [#allocation3], 1 }
 0x6a6   :  { %4106 = vsyncpa [#allocation5], 1 }
 0x6a7   :  { %4107 = vsyncpa [#allocation8], 1 }
 0x6a8   :  { %4108 = vsyncpa [#allocation11], 1 }

</bundles_post_ra>
